<compile_context>
chip_gen: v7x
topology: tpu7x:2x2x1
jax: 0.10.0
libtpu: 0.0.40
codegen_flags: <defaults>
</compile_context>

<pallas_src>
import math

import numpy as np
import jax
import jax.numpy as jnp
from jax.experimental import pallas as pl
from jax.experimental.pallas import tpu as pltpu


def _make_kernel(sizes, b_blk):
    K, L, L1, Lp1, L2, Lp2, C, H6, NCLS = sizes

    def kernel(x_ref, w4_ref, b4_ref, w6_ref, b6_ref, w7_ref, b7_ref,
               out_ref, h1, p1, h2, f2):
        # stride-2 "valid" Conv1d + bias + ReLU for one sample.
        def conv_relu(src, src_base, L_out, dst, dst_base):
            acc = jnp.broadcast_to(b4_ref[...], (L_out, C))      # bias-init
            for k in range(K):                                   # static tap loop
                lhs = src[pl.ds(src_base + k, L_out, stride=2), :]
                acc = acc + jnp.dot(lhs.astype(jnp.bfloat16), w4_ref[k],
                                    preferred_element_type=jnp.float32)
            dst[dst_base:dst_base + L_out, :] = jnp.maximum(acc, 0.0)

        # MaxPool1d(2), floor mode: max of two stride-2 sublane reads.
        def maxpool2(src, src_base, L_out, dst, dst_base):
            a = src[pl.ds(src_base + 0, L_out, stride=2), :]
            b = src[pl.ds(src_base + 1, L_out, stride=2), :]
            dst[dst_base:dst_base + L_out, :] = jnp.maximum(a, b)

        for b in range(b_blk):                                   # static sample loop
            conv_relu(x_ref, b * L, L1, h1, b * L1)              # l4
            maxpool2(h1, b * L1, Lp1, p1, b * Lp1)               # l4_pool
            conv_relu(p1, b * Lp1, L2, h2, b * L2)               # l4 applied again
            maxpool2(h2, b * L2, Lp2, f2, b * Lp2)               # l5_pool

        # l6: Linear(896 -> 224) + ReLU, batched over the B_BLK samples.
        # f2 row (b*Lp2 + t) holds pooled[t, :] of sample b, so a stride-Lp2
        # sublane read gathers tap t of every sample into one (B_BLK, C) tile.
        # The NCW flatten(1) ordering is folded into w6_ref (see wrapper).
        x6 = jnp.broadcast_to(b6_ref[...], (b_blk, H6))
        for t in range(Lp2):
            lhs = f2[pl.ds(t, b_blk, stride=Lp2), :]
            x6 = x6 + jnp.dot(lhs.astype(jnp.bfloat16), w6_ref[t],
                              preferred_element_type=jnp.float32)
        x6 = jnp.maximum(x6, 0.0)

        # l7: Linear(224 -> 2) + Softmax over classes (lane axis).
        x7 = jnp.dot(x6.astype(jnp.bfloat16), w7_ref[...],
                     preferred_element_type=jnp.float32) + b7_ref[...]
        m = jnp.max(x7, axis=1, keepdims=True)
        e = jnp.exp(x7 - m)
        out_ref[...] = e * pl.reciprocal(jnp.sum(e, axis=1, keepdims=True),
                                         approx=True)

    return kernel


def domain_critic2_forward(x, params, b_blk=None):
    """x: (B, 64, L) float32 (PyTorch NCW); returns (B, 2) softmax probs."""
    W4, b4, W6, b6, W7, b7 = params
    B, Cin, L = x.shape
    K = 5
    C = W4.shape[0]
    assert Cin == W4.shape[1] == C, (Cin, W4.shape)
    L1 = (L - K) // 2 + 1
    Lp1 = L1 // 2
    L2 = (Lp1 - K) // 2 + 1
    Lp2 = L2 // 2
    H6, NCLS = W6.shape[0], W7.shape[0]
    assert C * Lp2 == W6.shape[1], (C * Lp2, W6.shape)

    if b_blk is None:
        b_blk = 8 if B >= 8 else B    # fits all generations; raise on v5e/v6e if wanted
    B_pad = -(-B // b_blk) * b_blk

    # ---- glue: layout transforms (no compute) ----
    xT = jnp.transpose(x, (0, 2, 1)).astype(jnp.float32)        # (B, L, C)
    if B_pad != B:
        xT = jnp.concatenate(
            [xT, jnp.zeros((B_pad - B, L, Cin), xT.dtype)], axis=0)
    x2 = xT.reshape(B_pad * L, Cin)                              # samples stacked on sublanes

    W4p = jnp.transpose(W4, (2, 1, 0)).astype(jnp.bfloat16)      # (K, C_in, C_out)
    # W6p[t, c, o] = W6[o, c*Lp2 + t]  (folds PyTorch NCW flatten(1) order)
    W6p = jnp.transpose(W6.reshape(H6, C, Lp2), (2, 1, 0)).astype(jnp.bfloat16)
    W7T = jnp.transpose(W7).astype(jnp.bfloat16)                 # (H6, NCLS)
    b4r = b4.reshape(1, C).astype(jnp.float32)
    b6r = b6.reshape(1, H6).astype(jnp.float32)
    b7r = b7.reshape(1, NCLS).astype(jnp.float32)

    kernel = _make_kernel((K, L, L1, Lp1, L2, Lp2, C, H6, NCLS), b_blk)

    def full_spec(a):
        nd = a.ndim
        return pl.BlockSpec(a.shape, lambda i, nd=nd: (0,) * nd)

    out = pl.pallas_call(
        kernel,
        out_shape=jax.ShapeDtypeStruct((B_pad, NCLS), jnp.float32),
        grid=(B_pad // b_blk,),
        in_specs=[
            pl.BlockSpec((b_blk * L, Cin), lambda i: (i, 0)),    # B_BLK samples/step
            full_spec(W4p), full_spec(b4r),
            full_spec(W6p), full_spec(b6r),
            full_spec(W7T), full_spec(b7r),
        ],
        out_specs=pl.BlockSpec((b_blk, NCLS), lambda i: (i, 0)),
        scratch_shapes=[
            pltpu.VMEM((b_blk * L1, C), jnp.float32),    # conv1 + relu
            pltpu.VMEM((b_blk * Lp1, C), jnp.float32),   # pool1
            pltpu.VMEM((b_blk * L2, C), jnp.float32),    # conv2 + relu
            pltpu.VMEM((b_blk * Lp2, C), jnp.float32),   # pool2 (FC features)
        ],
        compiler_params=pltpu.CompilerParams(
            # Batch axis is fully independent -> shard across TCs on v7x.
            dimension_semantics=("parallel",),
            # Actual need at b_blk<=16 is only a few MiB (lane-padded); 32 MiB
            # leaves headroom and is below every generation's physical VMEM.
            vmem_limit_bytes=32 * 1024 * 1024,
        ),
    )(x2, W4p, b4r, W6p, b6r, W7T, b7r)
    return out[:B]


def reference_forward(x, params):
    """Pure-JAX f32 reference mirroring the PyTorch module (NCW layout)."""
    W4, b4, W6, b6, W7, b7 = params
    dn = ('NCH', 'OIH', 'NCH')

    def conv(h, W, b):
        y = jax.lax.conv_general_dilated(h, W, (2,), 'VALID',
                                         dimension_numbers=dn)
        return y + b[None, :, None]

    def pool(h, P=2):
        B, C, L = h.shape
        Lp = L // P
        return jnp.max(h[:, :, :Lp * P].reshape(B, C, Lp, P), axis=-1)

    h = pool(jax.nn.relu(conv(x, W4, b4)))
    h = pool(jax.nn.relu(conv(h, W4, b4)))   # module quirk: l4 applied twice
    f = h.reshape(h.shape[0], -1)
    h6 = jax.nn.relu(f @ W6.T + b6)
    logits = h6 @ W7.T + b7
    return jax.nn.softmax(logits, axis=1)


if __name__ == "__main__":
    key = jax.random.PRNGKey(0)
    ks = jax.random.split(key, 7)

    def u(k, shape, fan_in):
        bound = 1.0 / math.sqrt(fan_in)
        w = jax.random.uniform(k, shape, jnp.float32, -bound, bound)
        # keep values bf16-representable so MXU-vs-XLA rounding stays tiny
        return w.astype(jnp.bfloat16).astype(jnp.float32)

    # DomainCritic2 parameters actually used by forward().  self.l5 is defined
    # in __init__ but never used (forward applies self.l4 twice), so it is
    # omitted here.
    W4 = u(ks[0], (64, 64, 5), 64 * 5); b4 = u(ks[1], (64,), 64 * 5)   # l4
    W6 = u(ks[2], (224, 896), 896);     b6 = u(ks[3], (224,), 896)     # l6
    W7 = u(ks[4], (2, 224), 224);       b7 = u(ks[5], (2,), 224)       # l7
    params = (W4, b4, W6, b6, W7, b7)

    # Input length 240 is implied by Linear(896, 224): 64 ch * 14 = 896
    # (240 -conv s2 k5-> 118 -pool2-> 59 -conv s2 k5-> 28 -pool2-> 14).
    B = 2
    x = jax.random.normal(ks[6], (B, 64, 240), jnp.float32)
    x = x.astype(jnp.bfloat16).astype(jnp.float32)

    out = jax.block_until_ready(domain_critic2_forward(x, params))
    ref = jax.block_until_ready(reference_forward(x, params))

    assert out.shape == (B, 2), out.shape
    np.testing.assert_allclose(np.asarray(out), np.asarray(ref),
                               atol=2e-2, rtol=2e-2)
    np.testing.assert_allclose(np.asarray(out).sum(axis=1), np.ones(B),
                               atol=5e-3, rtol=0)
    print("KERNEL_OK")
</pallas_src>

<mosaic_0001>
module attributes {stable_mosaic.version = 11 : i64} {
  func.func @kernel(%arg0: i32, %arg1: memref<480x64xf32, #tpu.memory_space<vmem>>, %arg2: memref<5x64x64xbf16, #tpu.memory_space<vmem>>, %arg3: memref<1x64xf32, #tpu.memory_space<vmem>>, %arg4: memref<14x64x224xbf16, #tpu.memory_space<vmem>>, %arg5: memref<1x224xf32, #tpu.memory_space<vmem>>, %arg6: memref<224x2xbf16, #tpu.memory_space<vmem>>, %arg7: memref<1x2xf32, #tpu.memory_space<vmem>>, %arg8: memref<2x2xf32, #tpu.memory_space<vmem>>, %arg9: memref<236x64xf32, #tpu.memory_space<vmem>>, %arg10: memref<118x64xf32, #tpu.memory_space<vmem>>, %arg11: memref<56x64xf32, #tpu.memory_space<vmem>>, %arg12: memref<28x64xf32, #tpu.memory_space<vmem>>) attributes {dimension_semantics = [#tpu.dimension_semantics<parallel>], iteration_bounds = array<i64: 1>, scalar_prefetch = 0 : i64, scratch_operands = 4 : i64, tpu.core_type = #tpu.core_type<tc>, window_params = [{transform_indices = @transform_0, window_bounds = array<i64: 480, 64>}, {pipeline_mode = #tpu.pipeline_mode<synchronous>, transform_indices = @transform_1, window_bounds = array<i64: 5, 64, 64>}, {pipeline_mode = #tpu.pipeline_mode<synchronous>, transform_indices = @transform_2, window_bounds = array<i64: 1, 64>}, {pipeline_mode = #tpu.pipeline_mode<synchronous>, transform_indices = @transform_3, window_bounds = array<i64: 14, 64, 224>}, {pipeline_mode = #tpu.pipeline_mode<synchronous>, transform_indices = @transform_4, window_bounds = array<i64: 1, 224>}, {pipeline_mode = #tpu.pipeline_mode<synchronous>, transform_indices = @transform_5, window_bounds = array<i64: 224, 2>}, {pipeline_mode = #tpu.pipeline_mode<synchronous>, transform_indices = @transform_6, window_bounds = array<i64: 1, 2>}, {transform_indices = @transform_7, window_bounds = array<i64: 2, 2>}]} {
    %c0 = arith.constant 0 : index
    %c0_0 = arith.constant 0 : index
    %0 = vector.load %arg3[%c0, %c0_0] : memref<1x64xf32, #tpu.memory_space<vmem>>, vector<1x64xf32>
    %1 = vector.shape_cast %0 : vector<1x64xf32> to vector<1x64xf32>
    %2 = vector.broadcast %1 : vector<1x64xf32> to vector<118x64xf32>
    %c0_1 = arith.constant 0 : index
    %c0_2 = arith.constant 0 : index
    %3 = tpu.strided_load %arg1[%c0_1, %c0_2] {strides = array<i32: 2, 1>} : memref<480x64xf32, #tpu.memory_space<vmem>>, vector<118x64xf32>
    %4 = arith.truncf %3 : vector<118x64xf32> to vector<118x64xbf16>
    %c0_3 = arith.constant 0 : index
    %c0_4 = arith.constant 0 : index
    %c0_5 = arith.constant 0 : index
    %5 = vector.load %arg2[%c0_3, %c0_4, %c0_5] : memref<5x64x64xbf16, #tpu.memory_space<vmem>>, vector<1x64x64xbf16>
    %6 = vector.shape_cast %5 : vector<1x64x64xbf16> to vector<64x64xbf16>
    %cst = arith.constant dense<0.000000e+00> : vector<118x64xf32>
    %7 = tpu.matmul %4, %6, %cst {dimension_numbers = #tpu.dot_dimension_numbers<[1], [0], [0], [1], [0, 0, 1, 1], [], []>} : vector<118x64xbf16>, vector<64x64xbf16>, vector<118x64xf32> -> vector<118x64xf32>
    %8 = arith.addf %2, %7 : vector<118x64xf32>
    %c1 = arith.constant 1 : index
    %c0_6 = arith.constant 0 : index
    %9 = tpu.strided_load %arg1[%c1, %c0_6] {strides = array<i32: 2, 1>} : memref<480x64xf32, #tpu.memory_space<vmem>>, vector<118x64xf32>
    %10 = arith.truncf %9 : vector<118x64xf32> to vector<118x64xbf16>
    %c1_7 = arith.constant 1 : index
    %c0_8 = arith.constant 0 : index
    %c0_9 = arith.constant 0 : index
    %11 = vector.load %arg2[%c1_7, %c0_8, %c0_9] : memref<5x64x64xbf16, #tpu.memory_space<vmem>>, vector<1x64x64xbf16>
    %12 = vector.shape_cast %11 : vector<1x64x64xbf16> to vector<64x64xbf16>
    %cst_10 = arith.constant dense<0.000000e+00> : vector<118x64xf32>
    %13 = tpu.matmul %10, %12, %cst_10 {dimension_numbers = #tpu.dot_dimension_numbers<[1], [0], [0], [1], [0, 0, 1, 1], [], []>} : vector<118x64xbf16>, vector<64x64xbf16>, vector<118x64xf32> -> vector<118x64xf32>
    %14 = arith.addf %8, %13 : vector<118x64xf32>
    %c2 = arith.constant 2 : index
    %c0_11 = arith.constant 0 : index
    %15 = tpu.strided_load %arg1[%c2, %c0_11] {strides = array<i32: 2, 1>} : memref<480x64xf32, #tpu.memory_space<vmem>>, vector<118x64xf32>
    %16 = arith.truncf %15 : vector<118x64xf32> to vector<118x64xbf16>
    %c2_12 = arith.constant 2 : index
    %c0_13 = arith.constant 0 : index
    %c0_14 = arith.constant 0 : index
    %17 = vector.load %arg2[%c2_12, %c0_13, %c0_14] : memref<5x64x64xbf16, #tpu.memory_space<vmem>>, vector<1x64x64xbf16>
    %18 = vector.shape_cast %17 : vector<1x64x64xbf16> to vector<64x64xbf16>
    %cst_15 = arith.constant dense<0.000000e+00> : vector<118x64xf32>
    %19 = tpu.matmul %16, %18, %cst_15 {dimension_numbers = #tpu.dot_dimension_numbers<[1], [0], [0], [1], [0, 0, 1, 1], [], []>} : vector<118x64xbf16>, vector<64x64xbf16>, vector<118x64xf32> -> vector<118x64xf32>
    %20 = arith.addf %14, %19 : vector<118x64xf32>
    %c3 = arith.constant 3 : index
    %c0_16 = arith.constant 0 : index
    %21 = tpu.strided_load %arg1[%c3, %c0_16] {strides = array<i32: 2, 1>} : memref<480x64xf32, #tpu.memory_space<vmem>>, vector<118x64xf32>
    %22 = arith.truncf %21 : vector<118x64xf32> to vector<118x64xbf16>
    %c3_17 = arith.constant 3 : index
    %c0_18 = arith.constant 0 : index
    %c0_19 = arith.constant 0 : index
    %23 = vector.load %arg2[%c3_17, %c0_18, %c0_19] : memref<5x64x64xbf16, #tpu.memory_space<vmem>>, vector<1x64x64xbf16>
    %24 = vector.shape_cast %23 : vector<1x64x64xbf16> to vector<64x64xbf16>
    %cst_20 = arith.constant dense<0.000000e+00> : vector<118x64xf32>
    %25 = tpu.matmul %22, %24, %cst_20 {dimension_numbers = #tpu.dot_dimension_numbers<[1], [0], [0], [1], [0, 0, 1, 1], [], []>} : vector<118x64xbf16>, vector<64x64xbf16>, vector<118x64xf32> -> vector<118x64xf32>
    %26 = arith.addf %20, %25 : vector<118x64xf32>
    %c4 = arith.constant 4 : index
    %c0_21 = arith.constant 0 : index
    %27 = tpu.strided_load %arg1[%c4, %c0_21] {strides = array<i32: 2, 1>} : memref<480x64xf32, #tpu.memory_space<vmem>>, vector<118x64xf32>
    %28 = arith.truncf %27 : vector<118x64xf32> to vector<118x64xbf16>
    %c4_22 = arith.constant 4 : index
    %c0_23 = arith.constant 0 : index
    %c0_24 = arith.constant 0 : index
    %29 = vector.load %arg2[%c4_22, %c0_23, %c0_24] : memref<5x64x64xbf16, #tpu.memory_space<vmem>>, vector<1x64x64xbf16>
    %30 = vector.shape_cast %29 : vector<1x64x64xbf16> to vector<64x64xbf16>
    %cst_25 = arith.constant dense<0.000000e+00> : vector<118x64xf32>
    %31 = tpu.matmul %28, %30, %cst_25 {dimension_numbers = #tpu.dot_dimension_numbers<[1], [0], [0], [1], [0, 0, 1, 1], [], []>} : vector<118x64xbf16>, vector<64x64xbf16>, vector<118x64xf32> -> vector<118x64xf32>
    %32 = arith.addf %26, %31 : vector<118x64xf32>
    %cst_26 = arith.constant 0.000000e+00 : f32
    %33 = vector.broadcast %cst_26 : f32 to vector<118x64xf32>
    %34 = arith.maximumf %32, %33 : vector<118x64xf32>
    %c0_27 = arith.constant 0 : index
    %c0_28 = arith.constant 0 : index
    %35 = vector.load %arg9[%c0_27, %c0_28] : memref<236x64xf32, #tpu.memory_space<vmem>>, vector<118x64xf32>
    tpu.vector_store %arg9[%c0_27, %c0_28], %34 {strides = array<i32>} : memref<236x64xf32, #tpu.memory_space<vmem>>, vector<118x64xf32>,
    %c0_29 = arith.constant 0 : index
    %c0_30 = arith.constant 0 : index
    %36 = tpu.strided_load %arg9[%c0_29, %c0_30] {strides = array<i32: 2, 1>} : memref<236x64xf32, #tpu.memory_space<vmem>>, vector<59x64xf32>
    %c1_31 = arith.constant 1 : index
    %c0_32 = arith.constant 0 : index
    %37 = tpu.strided_load %arg9[%c1_31, %c0_32] {strides = array<i32: 2, 1>} : memref<236x64xf32, #tpu.memory_space<vmem>>, vector<59x64xf32>
    %38 = arith.maximumf %36, %37 : vector<59x64xf32>
    %c0_33 = arith.constant 0 : index
    %c0_34 = arith.constant 0 : index
    %39 = vector.load %arg10[%c0_33, %c0_34] : memref<118x64xf32, #tpu.memory_space<vmem>>, vector<59x64xf32>
    tpu.vector_store %arg10[%c0_33, %c0_34], %38 {strides = array<i32>} : memref<118x64xf32, #tpu.memory_space<vmem>>, vector<59x64xf32>,
    %c0_35 = arith.constant 0 : index
    %c0_36 = arith.constant 0 : index
    %40 = vector.load %arg3[%c0_35, %c0_36] : memref<1x64xf32, #tpu.memory_space<vmem>>, vector<1x64xf32>
    %41 = vector.shape_cast %40 : vector<1x64xf32> to vector<1x64xf32>
    %42 = vector.broadcast %41 : vector<1x64xf32> to vector<28x64xf32>
    %c0_37 = arith.constant 0 : index
    %c0_38 = arith.constant 0 : index
    %43 = tpu.strided_load %arg10[%c0_37, %c0_38] {strides = array<i32: 2, 1>} : memref<118x64xf32, #tpu.memory_space<vmem>>, vector<28x64xf32>
    %44 = arith.truncf %43 : vector<28x64xf32> to vector<28x64xbf16>
    %c0_39 = arith.constant 0 : index
    %c0_40 = arith.constant 0 : index
    %c0_41 = arith.constant 0 : index
    %45 = vector.load %arg2[%c0_39, %c0_40, %c0_41] : memref<5x64x64xbf16, #tpu.memory_space<vmem>>, vector<1x64x64xbf16>
    %46 = vector.shape_cast %45 : vector<1x64x64xbf16> to vector<64x64xbf16>
    %cst_42 = arith.constant dense<0.000000e+00> : vector<28x64xf32>
    %47 = tpu.matmul %44, %46, %cst_42 {dimension_numbers = #tpu.dot_dimension_numbers<[1], [0], [0], [1], [0, 0, 1, 1], [], []>} : vector<28x64xbf16>, vector<64x64xbf16>, vector<28x64xf32> -> vector<28x64xf32>
    %48 = arith.addf %42, %47 : vector<28x64xf32>
    %c1_43 = arith.constant 1 : index
    %c0_44 = arith.constant 0 : index
    %49 = tpu.strided_load %arg10[%c1_43, %c0_44] {strides = array<i32: 2, 1>} : memref<118x64xf32, #tpu.memory_space<vmem>>, vector<28x64xf32>
    %50 = arith.truncf %49 : vector<28x64xf32> to vector<28x64xbf16>
    %c1_45 = arith.constant 1 : index
    %c0_46 = arith.constant 0 : index
    %c0_47 = arith.constant 0 : index
    %51 = vector.load %arg2[%c1_45, %c0_46, %c0_47] : memref<5x64x64xbf16, #tpu.memory_space<vmem>>, vector<1x64x64xbf16>
    %52 = vector.shape_cast %51 : vector<1x64x64xbf16> to vector<64x64xbf16>
    %cst_48 = arith.constant dense<0.000000e+00> : vector<28x64xf32>
    %53 = tpu.matmul %50, %52, %cst_48 {dimension_numbers = #tpu.dot_dimension_numbers<[1], [0], [0], [1], [0, 0, 1, 1], [], []>} : vector<28x64xbf16>, vector<64x64xbf16>, vector<28x64xf32> -> vector<28x64xf32>
    %54 = arith.addf %48, %53 : vector<28x64xf32>
    %c2_49 = arith.constant 2 : index
    %c0_50 = arith.constant 0 : index
    %55 = tpu.strided_load %arg10[%c2_49, %c0_50] {strides = array<i32: 2, 1>} : memref<118x64xf32, #tpu.memory_space<vmem>>, vector<28x64xf32>
    %56 = arith.truncf %55 : vector<28x64xf32> to vector<28x64xbf16>
    %c2_51 = arith.constant 2 : index
    %c0_52 = arith.constant 0 : index
    %c0_53 = arith.constant 0 : index
    %57 = vector.load %arg2[%c2_51, %c0_52, %c0_53] : memref<5x64x64xbf16, #tpu.memory_space<vmem>>, vector<1x64x64xbf16>
    %58 = vector.shape_cast %57 : vector<1x64x64xbf16> to vector<64x64xbf16>
    %cst_54 = arith.constant dense<0.000000e+00> : vector<28x64xf32>
    %59 = tpu.matmul %56, %58, %cst_54 {dimension_numbers = #tpu.dot_dimension_numbers<[1], [0], [0], [1], [0, 0, 1, 1], [], []>} : vector<28x64xbf16>, vector<64x64xbf16>, vector<28x64xf32> -> vector<28x64xf32>
    %60 = arith.addf %54, %59 : vector<28x64xf32>
    %c3_55 = arith.constant 3 : index
    %c0_56 = arith.constant 0 : index
    %61 = tpu.strided_load %arg10[%c3_55, %c0_56] {strides = array<i32: 2, 1>} : memref<118x64xf32, #tpu.memory_space<vmem>>, vector<28x64xf32>
    %62 = arith.truncf %61 : vector<28x64xf32> to vector<28x64xbf16>
    %c3_57 = arith.constant 3 : index
    %c0_58 = arith.constant 0 : index
    %c0_59 = arith.constant 0 : index
    %63 = vector.load %arg2[%c3_57, %c0_58, %c0_59] : memref<5x64x64xbf16, #tpu.memory_space<vmem>>, vector<1x64x64xbf16>
    %64 = vector.shape_cast %63 : vector<1x64x64xbf16> to vector<64x64xbf16>
    %cst_60 = arith.constant dense<0.000000e+00> : vector<28x64xf32>
    %65 = tpu.matmul %62, %64, %cst_60 {dimension_numbers = #tpu.dot_dimension_numbers<[1], [0], [0], [1], [0, 0, 1, 1], [], []>} : vector<28x64xbf16>, vector<64x64xbf16>, vector<28x64xf32> -> vector<28x64xf32>
    %66 = arith.addf %60, %65 : vector<28x64xf32>
    %c4_61 = arith.constant 4 : index
    %c0_62 = arith.constant 0 : index
    %67 = tpu.strided_load %arg10[%c4_61, %c0_62] {strides = array<i32: 2, 1>} : memref<118x64xf32, #tpu.memory_space<vmem>>, vector<28x64xf32>
    %68 = arith.truncf %67 : vector<28x64xf32> to vector<28x64xbf16>
    %c4_63 = arith.constant 4 : index
    %c0_64 = arith.constant 0 : index
    %c0_65 = arith.constant 0 : index
    %69 = vector.load %arg2[%c4_63, %c0_64, %c0_65] : memref<5x64x64xbf16, #tpu.memory_space<vmem>>, vector<1x64x64xbf16>
    %70 = vector.shape_cast %69 : vector<1x64x64xbf16> to vector<64x64xbf16>
    %cst_66 = arith.constant dense<0.000000e+00> : vector<28x64xf32>
    %71 = tpu.matmul %68, %70, %cst_66 {dimension_numbers = #tpu.dot_dimension_numbers<[1], [0], [0], [1], [0, 0, 1, 1], [], []>} : vector<28x64xbf16>, vector<64x64xbf16>, vector<28x64xf32> -> vector<28x64xf32>
    %72 = arith.addf %66, %71 : vector<28x64xf32>
    %cst_67 = arith.constant 0.000000e+00 : f32
    %73 = vector.broadcast %cst_67 : f32 to vector<28x64xf32>
    %74 = arith.maximumf %72, %73 : vector<28x64xf32>
    %c0_68 = arith.constant 0 : index
    %c0_69 = arith.constant 0 : index
    %75 = vector.load %arg11[%c0_68, %c0_69] : memref<56x64xf32, #tpu.memory_space<vmem>>, vector<28x64xf32>
    tpu.vector_store %arg11[%c0_68, %c0_69], %74 {strides = array<i32>} : memref<56x64xf32, #tpu.memory_space<vmem>>, vector<28x64xf32>,
    %c0_70 = arith.constant 0 : index
    %c0_71 = arith.constant 0 : index
    %76 = tpu.strided_load %arg11[%c0_70, %c0_71] {strides = array<i32: 2, 1>} : memref<56x64xf32, #tpu.memory_space<vmem>>, vector<14x64xf32>
    %c1_72 = arith.constant 1 : index
    %c0_73 = arith.constant 0 : index
    %77 = tpu.strided_load %arg11[%c1_72, %c0_73] {strides = array<i32: 2, 1>} : memref<56x64xf32, #tpu.memory_space<vmem>>, vector<14x64xf32>
    %78 = arith.maximumf %76, %77 : vector<14x64xf32>
    %c0_74 = arith.constant 0 : index
    %c0_75 = arith.constant 0 : index
    %79 = vector.load %arg12[%c0_74, %c0_75] : memref<28x64xf32, #tpu.memory_space<vmem>>, vector<14x64xf32>
    tpu.vector_store %arg12[%c0_74, %c0_75], %78 {strides = array<i32>} : memref<28x64xf32, #tpu.memory_space<vmem>>, vector<14x64xf32>,
    %c0_76 = arith.constant 0 : index
    %c0_77 = arith.constant 0 : index
    %80 = vector.load %arg3[%c0_76, %c0_77] : memref<1x64xf32, #tpu.memory_space<vmem>>, vector<1x64xf32>
    %81 = vector.shape_cast %80 : vector<1x64xf32> to vector<1x64xf32>
    %82 = vector.broadcast %81 : vector<1x64xf32> to vector<118x64xf32>
    %c240 = arith.constant 240 : index
    %c0_78 = arith.constant 0 : index
    %83 = tpu.strided_load %arg1[%c240, %c0_78] {strides = array<i32: 2, 1>} : memref<480x64xf32, #tpu.memory_space<vmem>>, vector<118x64xf32>
    %84 = arith.truncf %83 : vector<118x64xf32> to vector<118x64xbf16>
    %c0_79 = arith.constant 0 : index
    %c0_80 = arith.constant 0 : index
    %c0_81 = arith.constant 0 : index
    %85 = vector.load %arg2[%c0_79, %c0_80, %c0_81] : memref<5x64x64xbf16, #tpu.memory_space<vmem>>, vector<1x64x64xbf16>
    %86 = vector.shape_cast %85 : vector<1x64x64xbf16> to vector<64x64xbf16>
    %cst_82 = arith.constant dense<0.000000e+00> : vector<118x64xf32>
    %87 = tpu.matmul %84, %86, %cst_82 {dimension_numbers = #tpu.dot_dimension_numbers<[1], [0], [0], [1], [0, 0, 1, 1], [], []>} : vector<118x64xbf16>, vector<64x64xbf16>, vector<118x64xf32> -> vector<118x64xf32>
    %88 = arith.addf %82, %87 : vector<118x64xf32>
    %c241 = arith.constant 241 : index
    %c0_83 = arith.constant 0 : index
    %89 = tpu.strided_load %arg1[%c241, %c0_83] {strides = array<i32: 2, 1>} : memref<480x64xf32, #tpu.memory_space<vmem>>, vector<118x64xf32>
    %90 = arith.truncf %89 : vector<118x64xf32> to vector<118x64xbf16>
    %c1_84 = arith.constant 1 : index
    %c0_85 = arith.constant 0 : index
    %c0_86 = arith.constant 0 : index
    %91 = vector.load %arg2[%c1_84, %c0_85, %c0_86] : memref<5x64x64xbf16, #tpu.memory_space<vmem>>, vector<1x64x64xbf16>
    %92 = vector.shape_cast %91 : vector<1x64x64xbf16> to vector<64x64xbf16>
    %cst_87 = arith.constant dense<0.000000e+00> : vector<118x64xf32>
    %93 = tpu.matmul %90, %92, %cst_87 {dimension_numbers = #tpu.dot_dimension_numbers<[1], [0], [0], [1], [0, 0, 1, 1], [], []>} : vector<118x64xbf16>, vector<64x64xbf16>, vector<118x64xf32> -> vector<118x64xf32>
    %94 = arith.addf %88, %93 : vector<118x64xf32>
    %c242 = arith.constant 242 : index
    %c0_88 = arith.constant 0 : index
    %95 = tpu.strided_load %arg1[%c242, %c0_88] {strides = array<i32: 2, 1>} : memref<480x64xf32, #tpu.memory_space<vmem>>, vector<118x64xf32>
    %96 = arith.truncf %95 : vector<118x64xf32> to vector<118x64xbf16>
    %c2_89 = arith.constant 2 : index
    %c0_90 = arith.constant 0 : index
    %c0_91 = arith.constant 0 : index
    %97 = vector.load %arg2[%c2_89, %c0_90, %c0_91] : memref<5x64x64xbf16, #tpu.memory_space<vmem>>, vector<1x64x64xbf16>
    %98 = vector.shape_cast %97 : vector<1x64x64xbf16> to vector<64x64xbf16>
    %cst_92 = arith.constant dense<0.000000e+00> : vector<118x64xf32>
    %99 = tpu.matmul %96, %98, %cst_92 {dimension_numbers = #tpu.dot_dimension_numbers<[1], [0], [0], [1], [0, 0, 1, 1], [], []>} : vector<118x64xbf16>, vector<64x64xbf16>, vector<118x64xf32> -> vector<118x64xf32>
    %100 = arith.addf %94, %99 : vector<118x64xf32>
    %c243 = arith.constant 243 : index
    %c0_93 = arith.constant 0 : index
    %101 = tpu.strided_load %arg1[%c243, %c0_93] {strides = array<i32: 2, 1>} : memref<480x64xf32, #tpu.memory_space<vmem>>, vector<118x64xf32>
    %102 = arith.truncf %101 : vector<118x64xf32> to vector<118x64xbf16>
    %c3_94 = arith.constant 3 : index
    %c0_95 = arith.constant 0 : index
    %c0_96 = arith.constant 0 : index
    %103 = vector.load %arg2[%c3_94, %c0_95, %c0_96] : memref<5x64x64xbf16, #tpu.memory_space<vmem>>, vector<1x64x64xbf16>
    %104 = vector.shape_cast %103 : vector<1x64x64xbf16> to vector<64x64xbf16>
    %cst_97 = arith.constant dense<0.000000e+00> : vector<118x64xf32>
    %105 = tpu.matmul %102, %104, %cst_97 {dimension_numbers = #tpu.dot_dimension_numbers<[1], [0], [0], [1], [0, 0, 1, 1], [], []>} : vector<118x64xbf16>, vector<64x64xbf16>, vector<118x64xf32> -> vector<118x64xf32>
    %106 = arith.addf %100, %105 : vector<118x64xf32>
    %c244 = arith.constant 244 : index
    %c0_98 = arith.constant 0 : index
    %107 = tpu.strided_load %arg1[%c244, %c0_98] {strides = array<i32: 2, 1>} : memref<480x64xf32, #tpu.memory_space<vmem>>, vector<118x64xf32>
    %108 = arith.truncf %107 : vector<118x64xf32> to vector<118x64xbf16>
    %c4_99 = arith.constant 4 : index
    %c0_100 = arith.constant 0 : index
    %c0_101 = arith.constant 0 : index
    %109 = vector.load %arg2[%c4_99, %c0_100, %c0_101] : memref<5x64x64xbf16, #tpu.memory_space<vmem>>, vector<1x64x64xbf16>
    %110 = vector.shape_cast %109 : vector<1x64x64xbf16> to vector<64x64xbf16>
    %cst_102 = arith.constant dense<0.000000e+00> : vector<118x64xf32>
    %111 = tpu.matmul %108, %110, %cst_102 {dimension_numbers = #tpu.dot_dimension_numbers<[1], [0], [0], [1], [0, 0, 1, 1], [], []>} : vector<118x64xbf16>, vector<64x64xbf16>, vector<118x64xf32> -> vector<118x64xf32>
    %112 = arith.addf %106, %111 : vector<118x64xf32>
    %cst_103 = arith.constant 0.000000e+00 : f32
    %113 = vector.broadcast %cst_103 : f32 to vector<118x64xf32>
    %114 = arith.maximumf %112, %113 : vector<118x64xf32>
    %c118 = arith.constant 118 : index
    %c0_104 = arith.constant 0 : index
    %115 = vector.load %arg9[%c118, %c0_104] : memref<236x64xf32, #tpu.memory_space<vmem>>, vector<118x64xf32>
    tpu.vector_store %arg9[%c118, %c0_104], %114 {strides = array<i32>} : memref<236x64xf32, #tpu.memory_space<vmem>>, vector<118x64xf32>,
    %c118_105 = arith.constant 118 : index
    %c0_106 = arith.constant 0 : index
    %116 = tpu.strided_load %arg9[%c118_105, %c0_106] {strides = array<i32: 2, 1>} : memref<236x64xf32, #tpu.memory_space<vmem>>, vector<59x64xf32>
    %c119 = arith.constant 119 : index
    %c0_107 = arith.constant 0 : index
    %117 = tpu.strided_load %arg9[%c119, %c0_107] {strides = array<i32: 2, 1>} : memref<236x64xf32, #tpu.memory_space<vmem>>, vector<59x64xf32>
    %118 = arith.maximumf %116, %117 : vector<59x64xf32>
    %c59 = arith.constant 59 : index
    %c0_108 = arith.constant 0 : index
    %119 = vector.load %arg10[%c59, %c0_108] : memref<118x64xf32, #tpu.memory_space<vmem>>, vector<59x64xf32>
    tpu.vector_store %arg10[%c59, %c0_108], %118 {strides = array<i32>} : memref<118x64xf32, #tpu.memory_space<vmem>>, vector<59x64xf32>,
    %c0_109 = arith.constant 0 : index
    %c0_110 = arith.constant 0 : index
    %120 = vector.load %arg3[%c0_109, %c0_110] : memref<1x64xf32, #tpu.memory_space<vmem>>, vector<1x64xf32>
    %121 = vector.shape_cast %120 : vector<1x64xf32> to vector<1x64xf32>
    %122 = vector.broadcast %121 : vector<1x64xf32> to vector<28x64xf32>
    %c59_111 = arith.constant 59 : index
    %c0_112 = arith.constant 0 : index
    %123 = tpu.strided_load %arg10[%c59_111, %c0_112] {strides = array<i32: 2, 1>} : memref<118x64xf32, #tpu.memory_space<vmem>>, vector<28x64xf32>
    %124 = arith.truncf %123 : vector<28x64xf32> to vector<28x64xbf16>
    %c0_113 = arith.constant 0 : index
    %c0_114 = arith.constant 0 : index
    %c0_115 = arith.constant 0 : index
    %125 = vector.load %arg2[%c0_113, %c0_114, %c0_115] : memref<5x64x64xbf16, #tpu.memory_space<vmem>>, vector<1x64x64xbf16>
    %126 = vector.shape_cast %125 : vector<1x64x64xbf16> to vector<64x64xbf16>
    %cst_116 = arith.constant dense<0.000000e+00> : vector<28x64xf32>
    %127 = tpu.matmul %124, %126, %cst_116 {dimension_numbers = #tpu.dot_dimension_numbers<[1], [0], [0], [1], [0, 0, 1, 1], [], []>} : vector<28x64xbf16>, vector<64x64xbf16>, vector<28x64xf32> -> vector<28x64xf32>
    %128 = arith.addf %122, %127 : vector<28x64xf32>
    %c60 = arith.constant 60 : index
    %c0_117 = arith.constant 0 : index
    %129 = tpu.strided_load %arg10[%c60, %c0_117] {strides = array<i32: 2, 1>} : memref<118x64xf32, #tpu.memory_space<vmem>>, vector<28x64xf32>
    %130 = arith.truncf %129 : vector<28x64xf32> to vector<28x64xbf16>
    %c1_118 = arith.constant 1 : index
    %c0_119 = arith.constant 0 : index
    %c0_120 = arith.constant 0 : index
    %131 = vector.load %arg2[%c1_118, %c0_119, %c0_120] : memref<5x64x64xbf16, #tpu.memory_space<vmem>>, vector<1x64x64xbf16>
    %132 = vector.shape_cast %131 : vector<1x64x64xbf16> to vector<64x64xbf16>
    %cst_121 = arith.constant dense<0.000000e+00> : vector<28x64xf32>
    %133 = tpu.matmul %130, %132, %cst_121 {dimension_numbers = #tpu.dot_dimension_numbers<[1], [0], [0], [1], [0, 0, 1, 1], [], []>} : vector<28x64xbf16>, vector<64x64xbf16>, vector<28x64xf32> -> vector<28x64xf32>
    %134 = arith.addf %128, %133 : vector<28x64xf32>
    %c61 = arith.constant 61 : index
    %c0_122 = arith.constant 0 : index
    %135 = tpu.strided_load %arg10[%c61, %c0_122] {strides = array<i32: 2, 1>} : memref<118x64xf32, #tpu.memory_space<vmem>>, vector<28x64xf32>
    %136 = arith.truncf %135 : vector<28x64xf32> to vector<28x64xbf16>
    %c2_123 = arith.constant 2 : index
    %c0_124 = arith.constant 0 : index
    %c0_125 = arith.constant 0 : index
    %137 = vector.load %arg2[%c2_123, %c0_124, %c0_125] : memref<5x64x64xbf16, #tpu.memory_space<vmem>>, vector<1x64x64xbf16>
    %138 = vector.shape_cast %137 : vector<1x64x64xbf16> to vector<64x64xbf16>
    %cst_126 = arith.constant dense<0.000000e+00> : vector<28x64xf32>
    %139 = tpu.matmul %136, %138, %cst_126 {dimension_numbers = #tpu.dot_dimension_numbers<[1], [0], [0], [1], [0, 0, 1, 1], [], []>} : vector<28x64xbf16>, vector<64x64xbf16>, vector<28x64xf32> -> vector<28x64xf32>
    %140 = arith.addf %134, %139 : vector<28x64xf32>
    %c62 = arith.constant 62 : index
    %c0_127 = arith.constant 0 : index
    %141 = tpu.strided_load %arg10[%c62, %c0_127] {strides = array<i32: 2, 1>} : memref<118x64xf32, #tpu.memory_space<vmem>>, vector<28x64xf32>
    %142 = arith.truncf %141 : vector<28x64xf32> to vector<28x64xbf16>
    %c3_128 = arith.constant 3 : index
    %c0_129 = arith.constant 0 : index
    %c0_130 = arith.constant 0 : index
    %143 = vector.load %arg2[%c3_128, %c0_129, %c0_130] : memref<5x64x64xbf16, #tpu.memory_space<vmem>>, vector<1x64x64xbf16>
    %144 = vector.shape_cast %143 : vector<1x64x64xbf16> to vector<64x64xbf16>
    %cst_131 = arith.constant dense<0.000000e+00> : vector<28x64xf32>
    %145 = tpu.matmul %142, %144, %cst_131 {dimension_numbers = #tpu.dot_dimension_numbers<[1], [0], [0], [1], [0, 0, 1, 1], [], []>} : vector<28x64xbf16>, vector<64x64xbf16>, vector<28x64xf32> -> vector<28x64xf32>
    %146 = arith.addf %140, %145 : vector<28x64xf32>
    %c63 = arith.constant 63 : index
    %c0_132 = arith.constant 0 : index
    %147 = tpu.strided_load %arg10[%c63, %c0_132] {strides = array<i32: 2, 1>} : memref<118x64xf32, #tpu.memory_space<vmem>>, vector<28x64xf32>
    %148 = arith.truncf %147 : vector<28x64xf32> to vector<28x64xbf16>
    %c4_133 = arith.constant 4 : index
    %c0_134 = arith.constant 0 : index
    %c0_135 = arith.constant 0 : index
    %149 = vector.load %arg2[%c4_133, %c0_134, %c0_135] : memref<5x64x64xbf16, #tpu.memory_space<vmem>>, vector<1x64x64xbf16>
    %150 = vector.shape_cast %149 : vector<1x64x64xbf16> to vector<64x64xbf16>
    %cst_136 = arith.constant dense<0.000000e+00> : vector<28x64xf32>
    %151 = tpu.matmul %148, %150, %cst_136 {dimension_numbers = #tpu.dot_dimension_numbers<[1], [0], [0], [1], [0, 0, 1, 1], [], []>} : vector<28x64xbf16>, vector<64x64xbf16>, vector<28x64xf32> -> vector<28x64xf32>
    %152 = arith.addf %146, %151 : vector<28x64xf32>
    %cst_137 = arith.constant 0.000000e+00 : f32
    %153 = vector.broadcast %cst_137 : f32 to vector<28x64xf32>
    %154 = arith.maximumf %152, %153 : vector<28x64xf32>
    %c28 = arith.constant 28 : index
    %c0_138 = arith.constant 0 : index
    %155 = vector.load %arg11[%c28, %c0_138] : memref<56x64xf32, #tpu.memory_space<vmem>>, vector<28x64xf32>
    tpu.vector_store %arg11[%c28, %c0_138], %154 {strides = array<i32>} : memref<56x64xf32, #tpu.memory_space<vmem>>, vector<28x64xf32>,
    %c28_139 = arith.constant 28 : index
    %c0_140 = arith.constant 0 : index
    %156 = tpu.strided_load %arg11[%c28_139, %c0_140] {strides = array<i32: 2, 1>} : memref<56x64xf32, #tpu.memory_space<vmem>>, vector<14x64xf32>
    %c29 = arith.constant 29 : index
    %c0_141 = arith.constant 0 : index
    %157 = tpu.strided_load %arg11[%c29, %c0_141] {strides = array<i32: 2, 1>} : memref<56x64xf32, #tpu.memory_space<vmem>>, vector<14x64xf32>
    %158 = arith.maximumf %156, %157 : vector<14x64xf32>
    %c14 = arith.constant 14 : index
    %c0_142 = arith.constant 0 : index
    %159 = vector.load %arg12[%c14, %c0_142] : memref<28x64xf32, #tpu.memory_space<vmem>>, vector<14x64xf32>
    tpu.vector_store %arg12[%c14, %c0_142], %158 {strides = array<i32>} : memref<28x64xf32, #tpu.memory_space<vmem>>, vector<14x64xf32>,
    %c0_143 = arith.constant 0 : index
    %c0_144 = arith.constant 0 : index
    %160 = vector.load %arg5[%c0_143, %c0_144] : memref<1x224xf32, #tpu.memory_space<vmem>>, vector<1x224xf32>
    %161 = vector.shape_cast %160 : vector<1x224xf32> to vector<1x224xf32>
    %162 = vector.broadcast %161 : vector<1x224xf32> to vector<2x224xf32>
    %c0_145 = arith.constant 0 : index
    %c0_146 = arith.constant 0 : index
    %163 = tpu.strided_load %arg12[%c0_145, %c0_146] {strides = array<i32: 14, 1>} : memref<28x64xf32, #tpu.memory_space<vmem>>, vector<2x64xf32>
    %164 = arith.truncf %163 : vector<2x64xf32> to vector<2x64xbf16>
    %c0_147 = arith.constant 0 : index
    %c0_148 = arith.constant 0 : index
    %c0_149 = arith.constant 0 : index
    %165 = vector.load %arg4[%c0_147, %c0_148, %c0_149] : memref<14x64x224xbf16, #tpu.memory_space<vmem>>, vector<1x64x224xbf16>
    %166 = vector.shape_cast %165 : vector<1x64x224xbf16> to vector<64x224xbf16>
    %cst_150 = arith.constant dense<0.000000e+00> : vector<2x224xf32>
    %167 = tpu.matmul %164, %166, %cst_150 {dimension_numbers = #tpu.dot_dimension_numbers<[1], [0], [0], [1], [0, 0, 1, 1], [], []>} : vector<2x64xbf16>, vector<64x224xbf16>, vector<2x224xf32> -> vector<2x224xf32>
    %168 = arith.addf %162, %167 : vector<2x224xf32>
    %c1_151 = arith.constant 1 : index
    %c0_152 = arith.constant 0 : index
    %169 = tpu.strided_load %arg12[%c1_151, %c0_152] {strides = array<i32: 14, 1>} : memref<28x64xf32, #tpu.memory_space<vmem>>, vector<2x64xf32>
    %170 = arith.truncf %169 : vector<2x64xf32> to vector<2x64xbf16>
    %c1_153 = arith.constant 1 : index
    %c0_154 = arith.constant 0 : index
    %c0_155 = arith.constant 0 : index
    %171 = vector.load %arg4[%c1_153, %c0_154, %c0_155] : memref<14x64x224xbf16, #tpu.memory_space<vmem>>, vector<1x64x224xbf16>
    %172 = vector.shape_cast %171 : vector<1x64x224xbf16> to vector<64x224xbf16>
    %cst_156 = arith.constant dense<0.000000e+00> : vector<2x224xf32>
    %173 = tpu.matmul %170, %172, %cst_156 {dimension_numbers = #tpu.dot_dimension_numbers<[1], [0], [0], [1], [0, 0, 1, 1], [], []>} : vector<2x64xbf16>, vector<64x224xbf16>, vector<2x224xf32> -> vector<2x224xf32>
    %174 = arith.addf %168, %173 : vector<2x224xf32>
    %c2_157 = arith.constant 2 : index
    %c0_158 = arith.constant 0 : index
    %175 = tpu.strided_load %arg12[%c2_157, %c0_158] {strides = array<i32: 14, 1>} : memref<28x64xf32, #tpu.memory_space<vmem>>, vector<2x64xf32>
    %176 = arith.truncf %175 : vector<2x64xf32> to vector<2x64xbf16>
    %c2_159 = arith.constant 2 : index
    %c0_160 = arith.constant 0 : index
    %c0_161 = arith.constant 0 : index
    %177 = vector.load %arg4[%c2_159, %c0_160, %c0_161] : memref<14x64x224xbf16, #tpu.memory_space<vmem>>, vector<1x64x224xbf16>
    %178 = vector.shape_cast %177 : vector<1x64x224xbf16> to vector<64x224xbf16>
    %cst_162 = arith.constant dense<0.000000e+00> : vector<2x224xf32>
    %179 = tpu.matmul %176, %178, %cst_162 {dimension_numbers = #tpu.dot_dimension_numbers<[1], [0], [0], [1], [0, 0, 1, 1], [], []>} : vector<2x64xbf16>, vector<64x224xbf16>, vector<2x224xf32> -> vector<2x224xf32>
    %180 = arith.addf %174, %179 : vector<2x224xf32>
    %c3_163 = arith.constant 3 : index
    %c0_164 = arith.constant 0 : index
    %181 = tpu.strided_load %arg12[%c3_163, %c0_164] {strides = array<i32: 14, 1>} : memref<28x64xf32, #tpu.memory_space<vmem>>, vector<2x64xf32>
    %182 = arith.truncf %181 : vector<2x64xf32> to vector<2x64xbf16>
    %c3_165 = arith.constant 3 : index
    %c0_166 = arith.constant 0 : index
    %c0_167 = arith.constant 0 : index
    %183 = vector.load %arg4[%c3_165, %c0_166, %c0_167] : memref<14x64x224xbf16, #tpu.memory_space<vmem>>, vector<1x64x224xbf16>
    %184 = vector.shape_cast %183 : vector<1x64x224xbf16> to vector<64x224xbf16>
    %cst_168 = arith.constant dense<0.000000e+00> : vector<2x224xf32>
    %185 = tpu.matmul %182, %184, %cst_168 {dimension_numbers = #tpu.dot_dimension_numbers<[1], [0], [0], [1], [0, 0, 1, 1], [], []>} : vector<2x64xbf16>, vector<64x224xbf16>, vector<2x224xf32> -> vector<2x224xf32>
    %186 = arith.addf %180, %185 : vector<2x224xf32>
    %c4_169 = arith.constant 4 : index
    %c0_170 = arith.constant 0 : index
    %187 = tpu.strided_load %arg12[%c4_169, %c0_170] {strides = array<i32: 14, 1>} : memref<28x64xf32, #tpu.memory_space<vmem>>, vector<2x64xf32>
    %188 = arith.truncf %187 : vector<2x64xf32> to vector<2x64xbf16>
    %c4_171 = arith.constant 4 : index
    %c0_172 = arith.constant 0 : index
    %c0_173 = arith.constant 0 : index
    %189 = vector.load %arg4[%c4_171, %c0_172, %c0_173] : memref<14x64x224xbf16, #tpu.memory_space<vmem>>, vector<1x64x224xbf16>
    %190 = vector.shape_cast %189 : vector<1x64x224xbf16> to vector<64x224xbf16>
    %cst_174 = arith.constant dense<0.000000e+00> : vector<2x224xf32>
    %191 = tpu.matmul %188, %190, %cst_174 {dimension_numbers = #tpu.dot_dimension_numbers<[1], [0], [0], [1], [0, 0, 1, 1], [], []>} : vector<2x64xbf16>, vector<64x224xbf16>, vector<2x224xf32> -> vector<2x224xf32>
    %192 = arith.addf %186, %191 : vector<2x224xf32>
    %c5 = arith.constant 5 : index
    %c0_175 = arith.constant 0 : index
    %193 = tpu.strided_load %arg12[%c5, %c0_175] {strides = array<i32: 14, 1>} : memref<28x64xf32, #tpu.memory_space<vmem>>, vector<2x64xf32>
    %194 = arith.truncf %193 : vector<2x64xf32> to vector<2x64xbf16>
    %c5_176 = arith.constant 5 : index
    %c0_177 = arith.constant 0 : index
    %c0_178 = arith.constant 0 : index
    %195 = vector.load %arg4[%c5_176, %c0_177, %c0_178] : memref<14x64x224xbf16, #tpu.memory_space<vmem>>, vector<1x64x224xbf16>
    %196 = vector.shape_cast %195 : vector<1x64x224xbf16> to vector<64x224xbf16>
    %cst_179 = arith.constant dense<0.000000e+00> : vector<2x224xf32>
    %197 = tpu.matmul %194, %196, %cst_179 {dimension_numbers = #tpu.dot_dimension_numbers<[1], [0], [0], [1], [0, 0, 1, 1], [], []>} : vector<2x64xbf16>, vector<64x224xbf16>, vector<2x224xf32> -> vector<2x224xf32>
    %198 = arith.addf %192, %197 : vector<2x224xf32>
    %c6 = arith.constant 6 : index
    %c0_180 = arith.constant 0 : index
    %199 = tpu.strided_load %arg12[%c6, %c0_180] {strides = array<i32: 14, 1>} : memref<28x64xf32, #tpu.memory_space<vmem>>, vector<2x64xf32>
    %200 = arith.truncf %199 : vector<2x64xf32> to vector<2x64xbf16>
    %c6_181 = arith.constant 6 : index
    %c0_182 = arith.constant 0 : index
    %c0_183 = arith.constant 0 : index
    %201 = vector.load %arg4[%c6_181, %c0_182, %c0_183] : memref<14x64x224xbf16, #tpu.memory_space<vmem>>, vector<1x64x224xbf16>
    %202 = vector.shape_cast %201 : vector<1x64x224xbf16> to vector<64x224xbf16>
    %cst_184 = arith.constant dense<0.000000e+00> : vector<2x224xf32>
    %203 = tpu.matmul %200, %202, %cst_184 {dimension_numbers = #tpu.dot_dimension_numbers<[1], [0], [0], [1], [0, 0, 1, 1], [], []>} : vector<2x64xbf16>, vector<64x224xbf16>, vector<2x224xf32> -> vector<2x224xf32>
    %204 = arith.addf %198, %203 : vector<2x224xf32>
    %c7 = arith.constant 7 : index
    %c0_185 = arith.constant 0 : index
    %205 = tpu.strided_load %arg12[%c7, %c0_185] {strides = array<i32: 14, 1>} : memref<28x64xf32, #tpu.memory_space<vmem>>, vector<2x64xf32>
    %206 = arith.truncf %205 : vector<2x64xf32> to vector<2x64xbf16>
    %c7_186 = arith.constant 7 : index
    %c0_187 = arith.constant 0 : index
    %c0_188 = arith.constant 0 : index
    %207 = vector.load %arg4[%c7_186, %c0_187, %c0_188] : memref<14x64x224xbf16, #tpu.memory_space<vmem>>, vector<1x64x224xbf16>
    %208 = vector.shape_cast %207 : vector<1x64x224xbf16> to vector<64x224xbf16>
    %cst_189 = arith.constant dense<0.000000e+00> : vector<2x224xf32>
    %209 = tpu.matmul %206, %208, %cst_189 {dimension_numbers = #tpu.dot_dimension_numbers<[1], [0], [0], [1], [0, 0, 1, 1], [], []>} : vector<2x64xbf16>, vector<64x224xbf16>, vector<2x224xf32> -> vector<2x224xf32>
    %210 = arith.addf %204, %209 : vector<2x224xf32>
    %c8 = arith.constant 8 : index
    %c0_190 = arith.constant 0 : index
    %211 = tpu.strided_load %arg12[%c8, %c0_190] {strides = array<i32: 14, 1>} : memref<28x64xf32, #tpu.memory_space<vmem>>, vector<2x64xf32>
    %212 = arith.truncf %211 : vector<2x64xf32> to vector<2x64xbf16>
    %c8_191 = arith.constant 8 : index
    %c0_192 = arith.constant 0 : index
    %c0_193 = arith.constant 0 : index
    %213 = vector.load %arg4[%c8_191, %c0_192, %c0_193] : memref<14x64x224xbf16, #tpu.memory_space<vmem>>, vector<1x64x224xbf16>
    %214 = vector.shape_cast %213 : vector<1x64x224xbf16> to vector<64x224xbf16>
    %cst_194 = arith.constant dense<0.000000e+00> : vector<2x224xf32>
    %215 = tpu.matmul %212, %214, %cst_194 {dimension_numbers = #tpu.dot_dimension_numbers<[1], [0], [0], [1], [0, 0, 1, 1], [], []>} : vector<2x64xbf16>, vector<64x224xbf16>, vector<2x224xf32> -> vector<2x224xf32>
    %216 = arith.addf %210, %215 : vector<2x224xf32>
    %c9 = arith.constant 9 : index
    %c0_195 = arith.constant 0 : index
    %217 = tpu.strided_load %arg12[%c9, %c0_195] {strides = array<i32: 14, 1>} : memref<28x64xf32, #tpu.memory_space<vmem>>, vector<2x64xf32>
    %218 = arith.truncf %217 : vector<2x64xf32> to vector<2x64xbf16>
    %c9_196 = arith.constant 9 : index
    %c0_197 = arith.constant 0 : index
    %c0_198 = arith.constant 0 : index
    %219 = vector.load %arg4[%c9_196, %c0_197, %c0_198] : memref<14x64x224xbf16, #tpu.memory_space<vmem>>, vector<1x64x224xbf16>
    %220 = vector.shape_cast %219 : vector<1x64x224xbf16> to vector<64x224xbf16>
    %cst_199 = arith.constant dense<0.000000e+00> : vector<2x224xf32>
    %221 = tpu.matmul %218, %220, %cst_199 {dimension_numbers = #tpu.dot_dimension_numbers<[1], [0], [0], [1], [0, 0, 1, 1], [], []>} : vector<2x64xbf16>, vector<64x224xbf16>, vector<2x224xf32> -> vector<2x224xf32>
    %222 = arith.addf %216, %221 : vector<2x224xf32>
    %c10 = arith.constant 10 : index
    %c0_200 = arith.constant 0 : index
    %223 = tpu.strided_load %arg12[%c10, %c0_200] {strides = array<i32: 14, 1>} : memref<28x64xf32, #tpu.memory_space<vmem>>, vector<2x64xf32>
    %224 = arith.truncf %223 : vector<2x64xf32> to vector<2x64xbf16>
    %c10_201 = arith.constant 10 : index
    %c0_202 = arith.constant 0 : index
    %c0_203 = arith.constant 0 : index
    %225 = vector.load %arg4[%c10_201, %c0_202, %c0_203] : memref<14x64x224xbf16, #tpu.memory_space<vmem>>, vector<1x64x224xbf16>
    %226 = vector.shape_cast %225 : vector<1x64x224xbf16> to vector<64x224xbf16>
    %cst_204 = arith.constant dense<0.000000e+00> : vector<2x224xf32>
    %227 = tpu.matmul %224, %226, %cst_204 {dimension_numbers = #tpu.dot_dimension_numbers<[1], [0], [0], [1], [0, 0, 1, 1], [], []>} : vector<2x64xbf16>, vector<64x224xbf16>, vector<2x224xf32> -> vector<2x224xf32>
    %228 = arith.addf %222, %227 : vector<2x224xf32>
    %c11 = arith.constant 11 : index
    %c0_205 = arith.constant 0 : index
    %229 = tpu.strided_load %arg12[%c11, %c0_205] {strides = array<i32: 14, 1>} : memref<28x64xf32, #tpu.memory_space<vmem>>, vector<2x64xf32>
    %230 = arith.truncf %229 : vector<2x64xf32> to vector<2x64xbf16>
    %c11_206 = arith.constant 11 : index
    %c0_207 = arith.constant 0 : index
    %c0_208 = arith.constant 0 : index
    %231 = vector.load %arg4[%c11_206, %c0_207, %c0_208] : memref<14x64x224xbf16, #tpu.memory_space<vmem>>, vector<1x64x224xbf16>
    %232 = vector.shape_cast %231 : vector<1x64x224xbf16> to vector<64x224xbf16>
    %cst_209 = arith.constant dense<0.000000e+00> : vector<2x224xf32>
    %233 = tpu.matmul %230, %232, %cst_209 {dimension_numbers = #tpu.dot_dimension_numbers<[1], [0], [0], [1], [0, 0, 1, 1], [], []>} : vector<2x64xbf16>, vector<64x224xbf16>, vector<2x224xf32> -> vector<2x224xf32>
    %234 = arith.addf %228, %233 : vector<2x224xf32>
    %c12 = arith.constant 12 : index
    %c0_210 = arith.constant 0 : index
    %235 = tpu.strided_load %arg12[%c12, %c0_210] {strides = array<i32: 14, 1>} : memref<28x64xf32, #tpu.memory_space<vmem>>, vector<2x64xf32>
    %236 = arith.truncf %235 : vector<2x64xf32> to vector<2x64xbf16>
    %c12_211 = arith.constant 12 : index
    %c0_212 = arith.constant 0 : index
    %c0_213 = arith.constant 0 : index
    %237 = vector.load %arg4[%c12_211, %c0_212, %c0_213] : memref<14x64x224xbf16, #tpu.memory_space<vmem>>, vector<1x64x224xbf16>
    %238 = vector.shape_cast %237 : vector<1x64x224xbf16> to vector<64x224xbf16>
    %cst_214 = arith.constant dense<0.000000e+00> : vector<2x224xf32>
    %239 = tpu.matmul %236, %238, %cst_214 {dimension_numbers = #tpu.dot_dimension_numbers<[1], [0], [0], [1], [0, 0, 1, 1], [], []>} : vector<2x64xbf16>, vector<64x224xbf16>, vector<2x224xf32> -> vector<2x224xf32>
    %240 = arith.addf %234, %239 : vector<2x224xf32>
    %c13 = arith.constant 13 : index
    %c0_215 = arith.constant 0 : index
    %241 = tpu.strided_load %arg12[%c13, %c0_215] {strides = array<i32: 14, 1>} : memref<28x64xf32, #tpu.memory_space<vmem>>, vector<2x64xf32>
    %242 = arith.truncf %241 : vector<2x64xf32> to vector<2x64xbf16>
    %c13_216 = arith.constant 13 : index
    %c0_217 = arith.constant 0 : index
    %c0_218 = arith.constant 0 : index
    %243 = vector.load %arg4[%c13_216, %c0_217, %c0_218] : memref<14x64x224xbf16, #tpu.memory_space<vmem>>, vector<1x64x224xbf16>
    %244 = vector.shape_cast %243 : vector<1x64x224xbf16> to vector<64x224xbf16>
    %cst_219 = arith.constant dense<0.000000e+00> : vector<2x224xf32>
    %245 = tpu.matmul %242, %244, %cst_219 {dimension_numbers = #tpu.dot_dimension_numbers<[1], [0], [0], [1], [0, 0, 1, 1], [], []>} : vector<2x64xbf16>, vector<64x224xbf16>, vector<2x224xf32> -> vector<2x224xf32>
    %246 = arith.addf %240, %245 : vector<2x224xf32>
    %cst_220 = arith.constant 0.000000e+00 : f32
    %247 = vector.broadcast %cst_220 : f32 to vector<2x224xf32>
    %248 = arith.maximumf %246, %247 : vector<2x224xf32>
    %249 = arith.truncf %248 : vector<2x224xf32> to vector<2x224xbf16>
    %c0_221 = arith.constant 0 : index
    %c0_222 = arith.constant 0 : index
    %250 = vector.load %arg6[%c0_221, %c0_222] : memref<224x2xbf16, #tpu.memory_space<vmem>>, vector<224x2xbf16>
    %cst_223 = arith.constant dense<0.000000e+00> : vector<2x2xf32>
    %251 = tpu.matmul %249, %250, %cst_223 {dimension_numbers = #tpu.dot_dimension_numbers<[1], [0], [0], [1], [0, 0, 1, 1], [], []>} : vector<2x224xbf16>, vector<224x2xbf16>, vector<2x2xf32> -> vector<2x2xf32>
    %c0_224 = arith.constant 0 : index
    %c0_225 = arith.constant 0 : index
    %252 = vector.load %arg7[%c0_224, %c0_225] : memref<1x2xf32, #tpu.memory_space<vmem>>, vector<1x2xf32>
    %253 = vector.broadcast %252 : vector<1x2xf32> to vector<2x2xf32>
    %254 = arith.addf %251, %253 : vector<2x2xf32>
    %cst_226 = arith.constant dense<0xFF800000> : vector<2xf32>
    %255 = vector.multi_reduction <maximumf>, %254, %cst_226 [1] : vector<2x2xf32> to vector<2xf32>
    %256 = vector.shape_cast %255 : vector<2xf32> to vector<2x1xf32>
    %257 = vector.broadcast %256 : vector<2x1xf32> to vector<2x2xf32>
    %258 = arith.subf %254, %257 : vector<2x2xf32>
    %259 = math.exp %258 : vector<2x2xf32>
    %cst_227 = arith.constant dense<0.000000e+00> : vector<2xf32>
    %260 = vector.multi_reduction <add>, %259, %cst_227 [1] : vector<2x2xf32> to vector<2xf32>
    %261 = vector.shape_cast %260 : vector<2xf32> to vector<2x1xf32>
    %262 = tpu.reciprocal %261 {approx = true} : vector<2x1xf32> -> vector<2x1xf32>
    %263 = vector.broadcast %262 : vector<2x1xf32> to vector<2x2xf32>
    %264 = arith.mulf %259, %263 : vector<2x2xf32>
    %c0_228 = arith.constant 0 : index
    %c0_229 = arith.constant 0 : index
    %265 = vector.load %arg8[%c0_228, %c0_229] : memref<2x2xf32, #tpu.memory_space<vmem>>, vector<2x2xf32>
    tpu.vector_store %arg8[%c0_228, %c0_229], %264 {strides = array<i32>} : memref<2x2xf32, #tpu.memory_space<vmem>>, vector<2x2xf32>,
    return
  }
  func.func @transform_0(%arg0: i32) -> (i32, i32) {
    %c0_i32 = arith.constant 0 : i32
    %c0_i32_0 = arith.constant 0 : i32
    return %arg0, %c0_i32 : i32, i32
  }
  func.func @transform_1(%arg0: i32) -> (i32, i32, i32) {
    %c0_i32 = arith.constant 0 : i32
    %c0_i32_0 = arith.constant 0 : i32
    %c0_i32_1 = arith.constant 0 : i32
    %c0_i32_2 = arith.constant 0 : i32
    return %c0_i32, %c0_i32_0, %c0_i32_1 : i32, i32, i32
  }
  func.func @transform_2(%arg0: i32) -> (i32, i32) {
    %c0_i32 = arith.constant 0 : i32
    %c0_i32_0 = arith.constant 0 : i32
    %c0_i32_1 = arith.constant 0 : i32
    return %c0_i32, %c0_i32_0 : i32, i32
  }
  func.func @transform_3(%arg0: i32) -> (i32, i32, i32) {
    %c0_i32 = arith.constant 0 : i32
    %c0_i32_0 = arith.constant 0 : i32
    %c0_i32_1 = arith.constant 0 : i32
    %c0_i32_2 = arith.constant 0 : i32
    return %c0_i32, %c0_i32_0, %c0_i32_1 : i32, i32, i32
  }
  func.func @transform_4(%arg0: i32) -> (i32, i32) {
    %c0_i32 = arith.constant 0 : i32
    %c0_i32_0 = arith.constant 0 : i32
    %c0_i32_1 = arith.constant 0 : i32
    return %c0_i32, %c0_i32_0 : i32, i32
  }
  func.func @transform_5(%arg0: i32) -> (i32, i32) {
    %c0_i32 = arith.constant 0 : i32
    %c0_i32_0 = arith.constant 0 : i32
    %c0_i32_1 = arith.constant 0 : i32
    return %c0_i32, %c0_i32_0 : i32, i32
  }
  func.func @transform_6(%arg0: i32) -> (i32, i32) {
    %c0_i32 = arith.constant 0 : i32
    %c0_i32_0 = arith.constant 0 : i32
    %c0_i32_1 = arith.constant 0 : i32
    return %c0_i32, %c0_i32_0 : i32, i32
  }
  func.func @transform_7(%arg0: i32) -> (i32, i32) {
    %c0_i32 = arith.constant 0 : i32
    %c0_i32_0 = arith.constant 0 : i32
    return %arg0, %c0_i32 : i32, i32
  }
}

</mosaic_0001>

<bundles_post_ra>
// kernel: tpu_custom_call.1
= control target key start
LH: loop header
LB: loop body
LE: loop exit
PB: predicated region body
PF: predicated region fallthrough
CT: control target
= control target key end

     0   :  { %12 = vsyncpa [#allocation7], 0  ;;  %s7704_s0 = inlined_call_operand.vmem [shape: f32[480,64], index: 0, kind: input, shape index: {}]   ;;  %s7705_s1 = inlined_call_operand.vmem [shape: bf16[5,64,64], index: 1, kind: input, shape index: {}]   ;;  %s7706_s2 = inlined_call_operand.vmem [shape: f32[1,64], index: 2, kind: input, shape index: {}]   ;;  %s7707_s3 = inlined_call_operand.hbm [shape: bf16[14,64,224], index: 3, kind: input, shape index: {}]   ;;  %s7708_s4 = inlined_call_operand.vmem [shape: f32[1,224], index: 4, kind: input, shape index: {}]   ;;  %s7709_s5 = inlined_call_operand.vmem [shape: bf16[224,2], index: 5, kind: input, shape index: {}]   ;;  %s7710_s6 = inlined_call_operand.vmem [shape: f32[1,2], index: 6, kind: input, shape index: {}]   ;;  %s7711_s7 = inlined_call_operand.hbm [shape: f32[2,2], index: 7, kind: output, shape index: {}]  }
   0x1   :  { %13 = vsyncpa [#allocation8], 0  ;;  %s6620_s24 = smov [#allocation6]   ;;  %s6572_s28 = scalar_lea.hbm %s7707_s3, 14336 }
   0x2   :  { %s25_s25 = sshll.u32 %s6620_s24, 4  ;;  %p6573_p0 = scmp.ne.s32.totalorder %s7707_s3, %s6572_s28  ;;  %s26_s25 = int_to_ptr.vmem [resolvable:$true] %s25_s25 }
   0x3   :  { %p6576_p1 = scmp.lt.u32.totalorder %s6572_s28, %s7707_s3 }
   0x5   :  { %p6578_p2 = pnand %p6576_p1, %p6573_p0 }
   0x7   :  { %6581 = shalt.err (!%p6578_p2)
}
   0x8   :  { %s6582_s10 = scalar_lea.vmem %s26_s25, 14336  ;;  %p6587_p4 = scmp.lt.s32.totalorder %s26_s25, %s26_s25 }
   0x9   :  { %p6583_p3 = scmp.ne.s32.totalorder %s26_s25, %s6582_s10  ;;  %p6588_p5 = scmp.lt.s32.totalorder %s6582_s10, %s6582_s10 }
   0xb   :  { %p6589_p6 = por %p6588_p5, %p6587_p4 }
   0xd   :  { %p6590_p7 = pnand %p6589_p6, %p6583_p3 }
   0xf   :  { %6593 = shalt.err (!%p6590_p7)
}
  0x10   :  { %s6621_s11 = smov 128   ;;  %s6622_s12 = smov 8  }
  0x11   :  { %31 = dma.hbm_to_vmem [thread:$0]  %s7707_s3, 14336, %s26_s25, [#allocation7], %s6621_s11, %s6621_s11, %s6622_s12  }
  0x12   :  { %6616 = dma.done.wait [#allocation7], 14336  }
  0x13   :  { %6617 = vsyncadd [#allocation7], 4294952960  ;;  %v6306_v0 = vld [vmem:[%s7705_s1] sm:$0xff]   ;;  %v6308_v2 = vld [vmem:[%s7705_s1 + $0x8] sm:$0xff]   ;;  %vm118_vm0 = vcmask 523264   ;;  %vm1107_vm1 = vcmask 521216  }
  0x14   :  { %v6307_v1 = vld [vmem:[%s7705_s1 + $0x60] sm:$0xff]   ;;  %5690 = vmatprep.subr.bf16.mxu1 %v6306_v0  ;;  %v6309_v3 = vld [vmem:[%s7705_s1 + $0x68] sm:$0xff]   ;;  %v6310_v4 = vld [vmem:[%s7705_s1 + $0x10] sm:$0xff]   ;;  %vm1155_vm2 = vcmask 518144   ;;  %vm1675_vm3 = vcmask 519168   ;;  %vm4835_vm4 = vcmask 785408  }
  0x15   :  { %5762 = vmatprep.subr.bf16.mxu0 %v6307_v1  ;;  %5691 = vmatpush3.bf16.msra.mxu1 %v6306_v0  ;;  %v6311_v5 = vld [vmem:[%s7705_s1 + $0x70] sm:$0xff]   ;;  %v6312_v6 = vld [vmem:[%s7705_s1 + $0x18] sm:$0xff]   ;;  %v49_v7 = vld [vmem:[%s7704_s0] ss:$2 sm:$0xff]  ;;  %vm4879_vm5 = vcmask 9216  }
  0x16   :  { %5763 = vmatpush3.bf16.msra.mxu0 %v6307_v1  ;;  %5692 = vmatprep.subr.bf16.mxu1 %v6308_v2  ;;  %v4908_v8 = vld [vmem:[%s7704_s0 + $0x10] ss:$2 sm:$0xff]  ;;  %v5004_v9 = vld [vmem:[%s7704_s0 + $0x3] ss:$2 sm:$0xff]  ;;  %v5005_v12 = vld [vmem:[%s7704_s0 + $0x13] ss:$2 sm:$0xff] }
  0x17   :  { %5764 = vmatprep.subr.bf16.mxu0 %v6309_v3  ;;  %v6313_v10 = vld [vmem:[%s7705_s1 + $0x78] sm:$0xff]   ;;  %v78_v11 = vpack.c.bf16 %v4908_v8, %v49_v7  ;;  %v696_v13 = vpack.c.bf16 %v5005_v12, %v5004_v9  ;;  %v4909_v14 = vld [vmem:[%s7704_s0 + $0x20] ss:$2 sm:$0xff]  ;;  %v5006_v17 = vld [vmem:[%s7704_s0 + $0x23] ss:$2 sm:$0xff] }
  0x18   :  { %v4910_v15 = vld [vmem:[%s7704_s0 + $0x30] ss:$2 sm:$0xff]  ;;  %v6314_v16 = vld [vmem:[%s7705_s1 + $0x20] sm:$0xff]   ;;  %v6315_v29 = vld [vmem:[%s7705_s1 + $0x28] sm:$0xff]  }
  0x19   :  { %5693 = vmatpush3.bf16.msra.mxu1 %v6308_v2  ;;  %5698 = vmatprep.mubr.msk.bf16.mxu1 %vm118_vm0, %v78_v11  ;;  %v5007_v18 = vld [vmem:[%s7704_s0 + $0x33] ss:$2 sm:$0xff]  ;;  %v4911_v19 = vld [vmem:[%s7704_s0 + $0x40] ss:$2 sm:$0xff]  ;;  %v4912_v20 = vld [vmem:[%s7704_s0 + $0x50] ss:$2 sm:$0xff]  ;;  %v79_v23 = vpack.c.bf16 %v4910_v15, %v4909_v14 }
  0x1a   :  { %5765 = vmatpush3.bf16.msra.mxu0 %v6309_v3  ;;  %5694 = vmatprep.subr.bf16.mxu1 %v6310_v4  ;;  %v5008_v21 = vld [vmem:[%s7704_s0 + $0x43] ss:$2 sm:$0xff]  ;;  %v5009_v22 = vld [vmem:[%s7704_s0 + $0x53] ss:$2 sm:$0xff]  ;;  %v697_v24 = vpack.c.bf16 %v5007_v18, %v5006_v17  ;;  %v80_v25 = vpack.c.bf16 %v4912_v20, %v4911_v19  ;;  %v4913_v27 = vld [vmem:[%s7704_s0 + $0x60] ss:$2 sm:$0xff] }
  0x1b   :  { %5766 = vmatprep.subr.bf16.mxu0 %v6311_v5  ;;  %5770 = vmatprep.mubr.msk.bf16.mxu0 %vm118_vm0, %v696_v13  ;;  %v698_v26 = vpack.c.bf16 %v5009_v22, %v5008_v21  ;;  %v4914_v28 = vld [vmem:[%s7704_s0 + $0x70] ss:$2 sm:$0xff]  ;;  %v5010_v30 = vld [vmem:[%s7704_s0 + $0x63] ss:$2 sm:$0xff]  ;;  %v5011_v31 = vld [vmem:[%s7704_s0 + $0x73] ss:$2 sm:$0xff] }
  0x1c   :  { %v4915_v32 = vld [vmem:[%s7704_s0 + $0x80] ss:$2 sm:$0xff]  ;;  %v4916_v33 = vld [vmem:[%s7704_s0 + $0x90] ss:$2 sm:$0xff]  ;;  %v5012_v37 = vld [vmem:[%s7704_s0 + $0x83] ss:$2 sm:$0xff]  ;;  %v81_v39 = vpack.c.bf16 %v4914_v28, %v4913_v27  ;;  %v699_v40 = vpack.c.bf16 %v5011_v31, %v5010_v30 }
  0x1d   :  { %5695 = vmatpush3.bf16.msra.mxu1 %v6310_v4  ;;  %v6316_v34 = vld [vmem:[%s7705_s1 + $0x30] sm:$0xff]   ;;  %v6317_v35 = vld [vmem:[%s7705_s1 + $0x80] sm:$0xff]   ;;  %v6318_v36 = vld [vmem:[%s7705_s1 + $0x88] sm:$0xff]   ;;  %v82_v41 = vpack.c.bf16 %v4916_v33, %v4915_v32 }
  0x1e   :  { %5767 = vmatpush3.bf16.msra.mxu0 %v6311_v5  ;;  %5696 = vmatprep.subr.bf16.mxu1 %v6312_v6  ;;  %v5013_v38 = vld [vmem:[%s7704_s0 + $0x93] ss:$2 sm:$0xff]  ;;  %v4917_v45 = vld [vmem:[%s7704_s0 + $0xa0] ss:$2 sm:$0xff]  ;;  %v4918_v46 = vld [vmem:[%s7704_s0 + $0xb0] ss:$2 sm:$0xff] }
  0x1f   :  { %5768 = vmatprep.subr.bf16.mxu0 %v6313_v10  ;;  %v700_v42 = vpack.c.bf16 %v5013_v38, %v5012_v37  ;;  %v6319_v43 = vld [vmem:[%s7705_s1 + $0x38] sm:$0xff]   ;;  %v6320_v44 = vld [vmem:[%s7705_s1 + $0x90] sm:$0xff]   ;;  %v4919_v49 = vld [vmem:[%s7704_s0 + $0xc0] ss:$2 sm:$0xff]  ;;  %v83_v55 = vpack.c.bf16 %v4918_v46, %v4917_v45 }
  0x20   :  { %v5014_v47 = vld [vmem:[%s7704_s0 + $0xa3] ss:$2 sm:$0xff]  ;;  %v5015_v48 = vld [vmem:[%s7704_s0 + $0xb3] ss:$2 sm:$0xff]  ;;  %v4920_v51 = vld [vmem:[%s7704_s0 + $0xd0] ss:$2 sm:$0xff] }
  0x21   :  { %5697 = vmatpush3.bf16.msra.mxu1 %v6312_v6  ;;  %v6321_v50 = vld [vmem:[%s7705_s1 + $0x98] sm:$0xff]   ;;  %v5016_v52 = vld [vmem:[%s7704_s0 + $0xc3] ss:$2 sm:$0xff]  ;;  %v701_v56 = vpack.c.bf16 %v5015_v48, %v5014_v47  ;;  %v84_v57 = vpack.c.bf16 %v4920_v51, %v4919_v49  ;;  %v4921_v59 = vld [vmem:[%s7704_s0 + $0xe0] ss:$2 sm:$0x3f] }
  0x22   :  { %5769 = vmatpush3.bf16.msra.mxu0 %v6313_v10  ;;  %5714 = vmatprep.subr.bf16.mxu1 %v6314_v16  ;;  %v5017_v53 = vld [vmem:[%s7704_s0 + $0xd3] ss:$2 sm:$0xff]  ;;  %v5018_v60 = vld [vmem:[%s7704_s0 + $0xe3] ss:$2 sm:$0x3f]  ;;  %v85_v1 = vpack.c.bf16 %v4921_v59, %v4921_v59 }
  0x23   :  { %5786 = vmatprep.subr.bf16.mxu0 %v6317_v35  ;;  %v6322_v54 = vld [vmem:[%s7705_s1 + $0x40] sm:$0xff]   ;;  %v702_v58 = vpack.c.bf16 %v5017_v53, %v5016_v52  ;;  %v4935_v62 = vld [vmem:[%s7704_s0 + $0x11] ss:$2 sm:$0xff]  ;;  %v703_v2 = vpack.c.bf16 %v5018_v60, %v5018_v60  ;;  %v6323_v15 = vld [vmem:[%s7705_s1 + $0x48] sm:$0xff]  }
  0x24   :  { %5699 = vmatmul.mubr.msk.bf16.vlgmr.msra.gmra.mrb[0].mxu1 %vm118_vm0, %v79_v23  ;;  %v4934_v61 = vld [vmem:[%s7704_s0 + $0x1] ss:$2 sm:$0xff]  ;;  %v5039_v63 = vld [vmem:[%s7704_s0 + $0x4] ss:$2 sm:$0xff]  ;;  %v5040_v0 = vld [vmem:[%s7704_s0 + $0x14] ss:$2 sm:$0xff] }
  0x25   :  { %5771 = vmatmul.mubr.msk.bf16.vlgmr.msra.gmra.mrb[0].mxu0 %vm118_vm0, %v697_v24  ;;  %5715 = vmatpush3.bf16.msra.mxu1 %v6314_v16  ;;  %v284_v3 = vpack.c.bf16 %v4935_v62, %v4934_v61  ;;  %v902_v4 = vpack.c.bf16 %v5040_v0, %v5039_v63  ;;  %v4936_v5 = vld [vmem:[%s7704_s0 + $0x21] ss:$2 sm:$0xff]  ;;  %v4937_v6 = vld [vmem:[%s7704_s0 + $0x31] ss:$2 sm:$0xff]  ;;  %v5041_v7 = vld [vmem:[%s7704_s0 + $0x24] ss:$2 sm:$0xff] }
  0x26   :  { %5702 = vmatprep.mubr.msk.bf16.mxu1 %vm118_vm0, %v80_v25  ;;  %5774 = vmatprep.mubr.msk.bf16.mxu0 %vm118_vm0, %v698_v26  ;;  %v5042_v8 = vld [vmem:[%s7704_s0 + $0x34] ss:$2 sm:$0xff]  ;;  %v4938_v9 = vld [vmem:[%s7704_s0 + $0x41] ss:$2 sm:$0xff]  ;;  %v4939_v10 = vld [vmem:[%s7704_s0 + $0x51] ss:$2 sm:$0xff]  ;;  %v285_v13 = vpack.c.bf16 %v4937_v6, %v4936_v5 }
  0x27   :  { %5716 = vmatprep.subr.bf16.mxu1 %v6315_v29  ;;  %5787 = vmatpush3.bf16.msra.mxu0 %v6317_v35  ;;  %v5043_v11 = vld [vmem:[%s7704_s0 + $0x44] ss:$2 sm:$0xff]  ;;  %v5044_v12 = vld [vmem:[%s7704_s0 + $0x54] ss:$2 sm:$0xff]  ;;  %v903_v14 = vpack.c.bf16 %v5042_v8, %v5041_v7  ;;  %v286_v16 = vpack.c.bf16 %v4939_v10, %v4938_v9  ;;  %v4940_v18 = vld [vmem:[%s7704_s0 + $0x61] ss:$2 sm:$0xff] }
  0x28   :  { %5788 = vmatprep.subr.bf16.mxu0 %v6318_v36  ;;  %v904_v17 = vpack.c.bf16 %v5044_v12, %v5043_v11  ;;  %v4941_v19 = vld [vmem:[%s7704_s0 + $0x71] ss:$2 sm:$0xff]  ;;  %v5045_v20 = vld [vmem:[%s7704_s0 + $0x64] ss:$2 sm:$0xff]  ;;  %v5046_v21 = vld [vmem:[%s7704_s0 + $0x74] ss:$2 sm:$0xff] }
  0x29   :  { %5717 = vmatpush3.bf16.msra.mxu1 %v6315_v29  ;;  %v4942_v22 = vld [vmem:[%s7704_s0 + $0x81] ss:$2 sm:$0xff]  ;;  %v4943_v23 = vld [vmem:[%s7704_s0 + $0x91] ss:$2 sm:$0xff]  ;;  %v5047_v25 = vld [vmem:[%s7704_s0 + $0x84] ss:$2 sm:$0xff]  ;;  %v287_v27 = vpack.c.bf16 %v4941_v19, %v4940_v18  ;;  %v905_v28 = vpack.c.bf16 %v5046_v21, %v5045_v20 }
  0x2a   :  { %5718 = vmatprep.subr.bf16.mxu1 %v6316_v34  ;;  %v6324_v24 = vld [vmem:[%s7705_s1 + $0x50] sm:$0xff]   ;;  %v288_v29 = vpack.c.bf16 %v4943_v23, %v4942_v22  ;;  %v6325_v30 = vld [vmem:[%s7705_s1 + $0x58] sm:$0xff]   ;;  %v4944_v32 = vld [vmem:[%s7704_s0 + $0xa1] ss:$2 sm:$0xff] }
  0x2b   :  { %5789 = vmatpush3.bf16.msra.mxu0 %v6318_v36  ;;  %v5048_v26 = vld [vmem:[%s7704_s0 + $0x94] ss:$2 sm:$0xff]  ;;  %v4945_v33 = vld [vmem:[%s7704_s0 + $0xb1] ss:$2 sm:$0xff]  ;;  %v4946_v36 = vld [vmem:[%s7704_s0 + $0xc1] ss:$2 sm:$0xff] }
  0x2c   :  { %5703 = vmatmul.mubr.msk.bf16.gmra.mrb[4].mxu1 %vm118_vm0, %v81_v39  ;;  %5790 = vmatprep.subr.bf16.mxu0 %v6320_v44  ;;  %v906_v31 = vpack.c.bf16 %v5048_v26, %v5047_v25  ;;  %v5050_v35 = vld [vmem:[%s7704_s0 + $0xb4] ss:$2 sm:$0xff]  ;;  %v4947_v37 = vld [vmem:[%s7704_s0 + $0xd1] ss:$2 sm:$0xff]  ;;  %v5051_v38 = vld [vmem:[%s7704_s0 + $0xc4] ss:$2 sm:$0xff] }
  0x2d   :  { %5775 = vmatmul.mubr.msk.bf16.gmra.mrb[4].mxu0 %vm118_vm0, %v699_v40  ;;  %5706 = vmatprep.mubr.msk.bf16.mxu1 %vm118_vm0, %v82_v41  ;;  %v5052_v39 = vld [vmem:[%s7704_s0 + $0xd4] ss:$2 sm:$0xff]  ;;  %v289_v40 = vpack.c.bf16 %v4945_v33, %v4944_v32  ;;  %v5053_v45 = vld [vmem:[%s7704_s0 + $0xe4] ss:$2 sm:$0x3f] }
  0x2e   :  { %5778 = vmatprep.mubr.msk.bf16.mxu0 %vm118_vm0, %v700_v42  ;;  %5719 = vmatpush3.bf16.msra.mxu1 %v6316_v34  ;;  %v5049_v34 = vld [vmem:[%s7704_s0 + $0xa4] ss:$2 sm:$0xff]  ;;  %v290_v42 = vpack.c.bf16 %v4947_v37, %v4946_v36  ;;  %v909_v49 = vpack.c.bf16 %v5053_v45, %v5053_v45  ;;  %v6329_v10 = vld [vmem:[%s7705_s1 + $0x18] sm:$0xff]  }
  0x2f   :  { %5720 = vmatprep.subr.bf16.mxu1 %v6319_v43  ;;  %5791 = vmatpush3.bf16.msra.mxu0 %v6320_v44  ;;  %v907_v41 = vpack.c.bf16 %v5050_v35, %v5049_v34  ;;  %v4948_v44 = vld [vmem:[%s7704_s0 + $0xe1] ss:$2 sm:$0x3f]  ;;  %v4969_v46 = vld [vmem:[%s7704_s0 + $0x2] ss:$2 sm:$0xff] }
  0x30   :  { %5792 = vmatprep.subr.bf16.mxu0 %v6321_v50  ;;  %v4970_v47 = vld [vmem:[%s7704_s0 + $0x12] ss:$2 sm:$0xff]  ;;  %v291_v48 = vpack.c.bf16 %v4948_v44, %v4948_v44  ;;  %v4971_v51 = vld [vmem:[%s7704_s0 + $0x22] ss:$2 sm:$0xff] }
  0x31   :  { %v4972_v52 = vld [vmem:[%s7704_s0 + $0x32] ss:$2 sm:$0xff]  ;;  %v4973_v53 = vld [vmem:[%s7704_s0 + $0x42] ss:$2 sm:$0xff] }
  0x32   :  { %5721 = vmatpush3.bf16.msra.mxu1 %v6319_v43  ;;  %v908_v43 = vpack.c.bf16 %v5052_v39, %v5051_v38  ;;  %v4977_v59 = vld [vmem:[%s7704_s0 + $0x82] ss:$2 sm:$0xff]  ;;  %v4978_v60 = vld [vmem:[%s7704_s0 + $0x92] ss:$2 sm:$0xff] }
  0x33   :  { %5738 = vmatprep.subr.bf16.mxu1 %v6322_v54  ;;  %5793 = vmatpush3.bf16.msra.mxu0 %v6321_v50  ;;  %v490_v50 = vpack.c.bf16 %v4970_v47, %v4969_v46  ;;  %v494_v62 = vpack.c.bf16 %v4978_v60, %v4977_v59  ;;  %v4979_v63 = vld [vmem:[%s7704_s0 + $0xa2] ss:$2 sm:$0xff]  ;;  %v4980_v0 = vld [vmem:[%s7704_s0 + $0xb2] ss:$2 sm:$0xff] }
  0x34   :  { %5707 = vmatmul.mubr.msk.bf16.gmra.mrb[8].mxu1 %vm118_vm0, %v83_v55  ;;  %v491_v55 = vpack.c.bf16 %v4972_v52, %v4971_v51  ;;  %v4983_v5 = vld [vmem:[%s7704_s0 + $0xe2] ss:$2 sm:$0x3f]  ;;  %v6328_v9 = vld [vmem:[%s7705_s1 + $0x10] sm:$0xff]  }
  0x35   :  { %5779 = vmatmul.mubr.msk.bf16.gmra.mrb[8].mxu0 %vm118_vm0, %v701_v56  ;;  %5710 = vmatprep.mubr.msk.bf16.mxu1 %vm118_vm0, %v84_v57  ;;  %v4975_v57 = vld [vmem:[%s7704_s0 + $0x62] ss:$2 sm:$0xff]  ;;  %v497_v6 = vpack.c.bf16 %v4983_v5, %v4983_v5 }
  0x36   :  { %5782 = vmatprep.mubr.msk.bf16.mxu0 %vm118_vm0, %v702_v58  ;;  %v4976_v58 = vld [vmem:[%s7704_s0 + $0x72] ss:$2 sm:$0xff]  ;;  %v6327_v8 = vld [vmem:[%s7705_s1 + $0x8] sm:$0xff]  }
  0x37   :  { %v493_v61 = vpack.c.bf16 %v4976_v58, %v4975_v57  ;;  %v6326_v7 = vld [vmem:[%s7705_s1] sm:$0xff]  }
  0x38   :  { %v7017_v11 = vld [vmem:[%s7705_s1 + $0x20] sm:$0xff]  }
  0x3c   :  { %5711 = vmatmul.mubr.msk.bf16.gmra.mrb[12].mxu1 %vm118_vm0, %v85_v1  ;;  %v4981_v1 = vld [vmem:[%s7704_s0 + $0xc2] ss:$2 sm:$0xff] }
  0x3d   :  { %5783 = vmatmul.mubr.msk.bf16.gmra.mrb[12].mxu0 %vm118_vm0, %v703_v2  ;;  %5722 = vmatprep.mubr.msk.bf16.mxu1 %vm118_vm0, %v284_v3  ;;  %v4982_v2 = vld [vmem:[%s7704_s0 + $0xd2] ss:$2 sm:$0xff]  ;;  %v495_v3 = vpack.c.bf16 %v4980_v0, %v4979_v63 }
  0x3e   :  { %5794 = vmatprep.mubr.msk.bf16.mxu0 %vm118_vm0, %v902_v4  ;;  %v496_v4 = vpack.c.bf16 %v4982_v2, %v4981_v1 }
  0x44   :  { %5723 = vmatmul.mubr.msk.bf16.vlgmr.msra.gmra.mrb[0].mxu1 %vm118_vm0, %v285_v13 }
  0x45   :  { %5795 = vmatmul.mubr.msk.bf16.vlgmr.msra.gmra.mrb[0].mxu0 %vm118_vm0, %v903_v14  ;;  %5739 = vmatpush3.bf16.msra.mxu1 %v6322_v54  ;;  %v4974_v54 = vld [vmem:[%s7704_s0 + $0x52] ss:$2 sm:$0xff] }
  0x46   :  { %5726 = vmatprep.mubr.msk.bf16.mxu1 %vm118_vm0, %v286_v16  ;;  %5798 = vmatprep.mubr.msk.bf16.mxu0 %vm118_vm0, %v904_v17  ;;  %v492_v56 = vpack.c.bf16 %v4974_v54, %v4973_v53 }
  0x47   :  { %5740 = vmatprep.subr.bf16.mxu1 %v6323_v15 }
  0x49   :  { %5741 = vmatpush3.bf16.msra.mxu1 %v6323_v15 }
  0x4a   :  { %5742 = vmatprep.subr.bf16.mxu1 %v6324_v24 }
  0x4c   :  { %5727 = vmatmul.mubr.msk.bf16.gmra.mrb[4].mxu1 %vm118_vm0, %v287_v27 }
  0x4d   :  { %5799 = vmatmul.mubr.msk.bf16.gmra.mrb[4].mxu0 %vm118_vm0, %v905_v28  ;;  %5730 = vmatprep.mubr.msk.bf16.mxu1 %vm118_vm0, %v288_v29  ;;  %v7035_v28 = vld [vmem:[%s7706_s2] ss:$0 sm:$0xff] }
  0x4e   :  { %5802 = vmatprep.mubr.msk.bf16.mxu0 %vm118_vm0, %v906_v31  ;;  %5743 = vmatpush3.bf16.msra.mxu1 %v6324_v24 }
  0x4f   :  { %5744 = vmatprep.subr.bf16.mxu1 %v6325_v30 }
  0x52   :  { %5745 = vmatpush3.bf16.msra.mxu1 %v6325_v30 }
  0x53   :  { %5810 = vmatprep.subr.bf16.mxu1 %v6326_v7 }
  0x54   :  { %5731 = vmatmul.mubr.msk.bf16.gmra.mrb[8].mxu1 %vm118_vm0, %v289_v40 }
  0x55   :  { %5803 = vmatmul.mubr.msk.bf16.gmra.mrb[8].mxu0 %vm118_vm0, %v907_v41  ;;  %5734 = vmatprep.mubr.msk.bf16.mxu1 %vm118_vm0, %v290_v42 }
  0x56   :  { %5806 = vmatprep.mubr.msk.bf16.mxu0 %vm118_vm0, %v908_v43 }
  0x5c   :  { %5735 = vmatmul.mubr.msk.bf16.gmra.mrb[12].mxu1 %vm118_vm0, %v291_v48 }
  0x5d   :  { %5807 = vmatmul.mubr.msk.bf16.gmra.mrb[12].mxu0 %vm118_vm0, %v909_v49  ;;  %5746 = vmatprep.mubr.msk.bf16.mxu1 %vm118_vm0, %v490_v50 }
  0x64   :  { %5747 = vmatmul.mubr.msk.bf16.vlgmr.msra.gmra.mrb[0].mxu1 %vm118_vm0, %v491_v55 }
  0x65   :  { %5750 = vmatprep.mubr.msk.bf16.mxu1 %vm118_vm0, %v492_v56  ;;  %5811 = vmatpush3.bf16.msra.mxu1 %v6326_v7 }
  0x66   :  { %5812 = vmatprep.subr.bf16.mxu1 %v6327_v8 }
  0x69   :  { %5813 = vmatpush3.bf16.msra.mxu1 %v6327_v8 }
  0x6a   :  { %5814 = vmatprep.subr.bf16.mxu1 %v6328_v9 }
  0x6c   :  { %5751 = vmatmul.mubr.msk.bf16.gmra.mrb[4].mxu1 %vm118_vm0, %v493_v61 }
  0x6d   :  { %5754 = vmatprep.mubr.msk.bf16.mxu1 %vm118_vm0, %v494_v62  ;;  %5815 = vmatpush3.bf16.msra.mxu1 %v6328_v9 }
  0x6e   :  { %5816 = vmatprep.subr.bf16.mxu1 %v6329_v10 }
  0x71   :  { %5817 = vmatpush3.bf16.msra.mxu1 %v6329_v10 }
  0x72   :  { %5822 = vmatprep.subr.bf16.mxu1 %v7017_v11 }
  0x74   :  { %5755 = vmatmul.mubr.msk.bf16.gmra.mrb[8].mxu1 %vm118_vm0, %v495_v3 }
  0x75   :  { %5758 = vmatprep.mubr.msk.bf16.mxu1 %vm118_vm0, %v496_v4 }
  0x7c   :  { %5759 = vmatmul.mubr.msk.bf16.gmra.mrb[12].mxu1 %vm118_vm0, %v497_v6 }
 0x118   :  { %v5796_v12 = vpop.f32.mrb[0].mxu0 }
 0x119   :  { %v1001_v13 = vpop.f32.mrb[1].mxu0 }
 0x11a   :  { %v5797_v14 = vpop.f32.mrb[2].mxu0 }
 0x11b   :  { %v1004_v15 = vpop.f32.mrb[3].mxu0 }
 0x120   :  { %v5800_v16 = vpop.f32.mrb[4].mxu0 }
 0x121   :  { %v1017_v17 = vpop.f32.mrb[5].mxu0 }
 0x122   :  { %v5801_v18 = vpop.f32.mrb[6].mxu0 }
 0x123   :  { %v1020_v19 = vpop.f32.mrb[7].mxu0 }
 0x128   :  { %v5804_v20 = vpop.f32.mrb[8].mxu0 }
 0x129   :  { %v7020_v21 = vpop.f32.mrb[9].mxu0 }
 0x12a   :  { %v7022_v22 = vpop.f32.mrb[10].mxu0 }
 0x12b   :  { %v7024_v23 = vpop.f32.mrb[11].mxu0 }
 0x130   :  { %v7026_v24 = vpop.f32.mrb[12].mxu0 }
 0x131   :  { %v7028_v25 = vpop.f32.mrb[13].mxu0 }
 0x132   :  { %v5809_v26 = vpop.f32.mrb[14].mxu0 }
 0x133   :  { %v7030_v27 = vpop.f32.mrb[15].mxu0 }
 0x137   :  { %v5748_v29 = vpop.f32.mrb[0].mxu1 }
 0x138   :  { %v6050_v30 = vadd.f32 %v5748_v29, %v7035_v28  ;;  %v589_v31 = vpop.f32.mrb[1].mxu1 }
 0x139   :  { %v6052_v32 = vadd.f32 %v7035_v28, %v589_v31  ;;  %v5749_v33 = vpop.f32.mrb[2].mxu1 }
 0x13a   :  { %v6051_v34 = vadd.f32 %v6050_v30, %v5796_v12  ;;  %v6054_v35 = vadd.f32 %v5749_v33, %v7035_v28  ;;  %v592_v36 = vpop.f32.mrb[3].mxu1 }
 0x13b   :  { %v6053_v37 = vadd.f32 %v6052_v32, %v1001_v13  ;;  %v6056_v38 = vadd.f32 %v7035_v28, %v592_v36 }
 0x13c   :  { %v1080_v39 = vmax.f32 %v6051_v34, 0.0  ;;  %v6055_v40 = vadd.f32 %v6054_v35, %v5797_v14 }
 0x13d   :  { %v1078_v41 = vmax.f32 %v6053_v37, 0.0  ;;  %v6057_v42 = vadd.f32 %v6056_v38, %v1004_v15 }
 0x13e   :  { %1095 = vst.msk [vmem:[#allocation2 + $0x10] sm:$0xff] %vm118_vm0, %v1080_v39  ;;  %v1081_v43 = vmax.f32 %v6055_v40, 0.0 }
 0x13f   :  { %1093 = vst.msk [vmem:[#allocation2] sm:$0xff] %vm118_vm0, %v1078_v41  ;;  %v1079_v44 = vmax.f32 %v6057_v42, 0.0  ;;  %v5752_v45 = vpop.f32.mrb[4].mxu1 }
 0x140   :  { %1096 = vst.msk [vmem:[#allocation2 + $0x18] sm:$0xff] %vm118_vm0, %v1081_v43  ;;  %v6058_v46 = vadd.f32 %v5752_v45, %v7035_v28  ;;  %v605_v47 = vpop.f32.mrb[5].mxu1 }
 0x141   :  { %1094 = vst.msk [vmem:[#allocation2 + $0x8] sm:$0xff] %vm118_vm0, %v1079_v44  ;;  %v6060_v48 = vadd.f32 %v7035_v28, %v605_v47  ;;  %v5753_v49 = vpop.f32.mrb[6].mxu1 }
 0x142   :  { %v6059_v50 = vadd.f32 %v6058_v46, %v5800_v16  ;;  %v6062_v51 = vadd.f32 %v5753_v49, %v7035_v28  ;;  %v608_v52 = vpop.f32.mrb[7].mxu1 }
 0x143   :  { %v6061_v53 = vadd.f32 %v6060_v48, %v1017_v17  ;;  %v6064_v54 = vadd.f32 %v7035_v28, %v608_v52 }
 0x144   :  { %v1084_v55 = vmax.f32 %v6059_v50, 0.0  ;;  %v6063_v56 = vadd.f32 %v6062_v51, %v5801_v18 }
 0x145   :  { %v1082_v57 = vmax.f32 %v6061_v53, 0.0  ;;  %v6065_v58 = vadd.f32 %v6064_v54, %v1020_v19 }
 0x146   :  { %1099 = vst.msk [vmem:[#allocation2 + $0x30] sm:$0xff] %vm118_vm0, %v1084_v55  ;;  %v1085_v59 = vmax.f32 %v6063_v56, 0.0 }
 0x147   :  { %v1111_v60 = vld [vmem:[#allocation2 + $0x10] ss:$2 sm:$0xff]  ;;  %v1127_v61 = vld [vmem:[#allocation2 + $0x11] ss:$2 sm:$0xff]  ;;  %1097 = vst.msk [vmem:[#allocation2 + $0x20] sm:$0xff] %vm118_vm0, %v1082_v57  ;;  %v1083_v62 = vmax.f32 %v6065_v58, 0.0 }
 0x148   :  { %v5756_v63 = vpop.f32.mrb[8].mxu1  ;;  %v1141_v0 = vmax.f32 %v1111_v60, %v1127_v61  ;;  %v1109_v1 = vld [vmem:[#allocation2] ss:$2 sm:$0xff]  ;;  %v1125_v2 = vld [vmem:[#allocation2 + $0x1] ss:$2 sm:$0xff]  ;;  %1100 = vst.msk [vmem:[#allocation2 + $0x38] sm:$0xff] %vm118_vm0, %v1085_v59 }
 0x149   :  { %v6066_v3 = vadd.f32 %v5756_v63, %v7035_v28  ;;  %v621_v4 = vpop.f32.mrb[9].mxu1  ;;  %v1140_v5 = vmax.f32 %v1109_v1, %v1125_v2  ;;  %1098 = vst.msk [vmem:[#allocation2 + $0x28] sm:$0xff] %vm118_vm0, %v1083_v62  ;;  %v6331_v60 = vld [vmem:[%s7705_s1 + $0x28] sm:$0xff]   ;;  %v6332_v62 = vld [vmem:[%s7705_s1 + $0x30] sm:$0xff]   ;;  %v6333_v63 = vld [vmem:[%s7705_s1 + $0x38] sm:$0xff]  }
 0x14a   :  { %v6068_v6 = vadd.f32 %v7035_v28, %v621_v4  ;;  %v5757_v7 = vpop.f32.mrb[10].mxu1  ;;  %1149 = vst.msk [vmem:[#allocation3 + $0x8] sm:$0xff] %vm118_vm0, %v1141_v0  ;;  %v6334_v0 = vld [vmem:[%s7705_s1 + $0x40] sm:$0xff]  }
 0x14b   :  { %v6067_v8 = vadd.f32 %v6066_v3, %v5804_v20  ;;  %v6070_v9 = vadd.f32 %v5757_v7, %v7035_v28  ;;  %v624_v10 = vpop.f32.mrb[11].mxu1  ;;  %1148 = vst.msk [vmem:[#allocation3] sm:$0xff] %vm118_vm0, %v1140_v5  ;;  %v6335_v5 = vld [vmem:[%s7705_s1 + $0x48] sm:$0xff]   ;;  %v6336_v7 = vld [vmem:[%s7705_s1 + $0x50] sm:$0xff]  }
 0x14c   :  { %v6069_v12 = vadd.f32 %v6068_v6, %v7020_v21  ;;  %v6072_v13 = vadd.f32 %v7035_v28, %v624_v10 }
 0x14d   :  { %v1088_v14 = vmax.f32 %v6067_v8, 0.0  ;;  %v6071_v15 = vadd.f32 %v6070_v9, %v7022_v22  ;;  %v6337_v8 = vld [vmem:[%s7705_s1 + $0x58] sm:$0xff]   ;;  %v6338_v9 = vld [vmem:[%s7705_s1 + $0x60] sm:$0xff]  }
 0x14e   :  { %v1086_v16 = vmax.f32 %v6069_v12, 0.0  ;;  %v6073_v17 = vadd.f32 %v6072_v13, %v7024_v23 }
 0x14f   :  { %1103 = vst.msk [vmem:[#allocation2 + $0x50] sm:$0xff] %vm118_vm0, %v1088_v14  ;;  %v1089_v18 = vmax.f32 %v6071_v15, 0.0  ;;  %v1115_v19 = vld [vmem:[#allocation2 + $0x30] ss:$2 sm:$0xff]  ;;  %v1131_v20 = vld [vmem:[#allocation2 + $0x31] ss:$2 sm:$0xff] }
 0x150   :  { %1101 = vst.msk [vmem:[#allocation2 + $0x40] sm:$0xff] %vm118_vm0, %v1086_v16  ;;  %v1087_v26 = vmax.f32 %v6073_v17, 0.0  ;;  %v5760_v29 = vpop.f32.mrb[12].mxu1  ;;  %v1143_v30 = vmax.f32 %v1115_v19, %v1131_v20  ;;  %v1113_v31 = vld [vmem:[#allocation2 + $0x20] ss:$2 sm:$0xff]  ;;  %v6341_v19 = vld [vmem:[%s7705_s1 + $0x78] sm:$0xff]  }
 0x151   :  { %v1129_v21 = vld [vmem:[#allocation2 + $0x21] ss:$2 sm:$0xff]  ;;  %1104 = vst.msk [vmem:[#allocation2 + $0x58] sm:$0xff] %vm118_vm0, %v1089_v18  ;;  %v6074_v32 = vadd.f32 %v5760_v29, %v7035_v28  ;;  %v637_v22 = vpop.f32.mrb[13].mxu1  ;;  %v6340_v18 = vld [vmem:[%s7705_s1 + $0x70] sm:$0xff]  }
 0x152   :  { %v1142_v33 = vmax.f32 %v1113_v31, %v1129_v21  ;;  %1102 = vst.msk [vmem:[#allocation2 + $0x48] sm:$0xff] %vm118_vm0, %v1087_v26  ;;  %v6076_v23 = vadd.f32 %v7035_v28, %v637_v22  ;;  %v5761_v34 = vpop.f32.mrb[14].mxu1  ;;  %1151 = vst.msk [vmem:[#allocation3 + $0x18] sm:$0xff] %vm118_vm0, %v1143_v30  ;;  %v1265_v59 = vld [vmem:[#allocation3 + $0x1] ss:$2 sm:$0xff]  ;;  %v6339_v16 = vld [vmem:[%s7705_s1 + $0x68] sm:$0xff]  }
 0x153   :  { %v6075_v35 = vadd.f32 %v6074_v32, %v7026_v24  ;;  %v640_v36 = vpop.f32.mrb[15].mxu1  ;;  %v6342_v20 = vld [vmem:[%s7705_s1 + $0x80] sm:$0xff]   ;;  %v6343_v32 = vld [vmem:[%s7705_s1 + $0x88] sm:$0xff]  }
 0x154   :  { %1150 = vst.msk [vmem:[#allocation3 + $0x10] sm:$0xff] %vm118_vm0, %v1142_v33  ;;  %v6077_v37 = vadd.f32 %v6076_v23, %v7028_v25  ;;  %v6078_v38 = vadd.f32 %v7035_v28, %v640_v36  ;;  %v1164_v25 = vld [vmem:[#allocation3] ss:$2 sm:$0xff]  ;;  %v6346_v34 = vld [vmem:[%s7705_s1] sm:$0xff]  }
 0x155   :  { %v1092_v39 = vmax.f32 %v6075_v35, 0.0  ;;  %v6344_v33 = vld [vmem:[%s7705_s1 + $0x90] sm:$0xff]   ;;  %v6345_v23 = vld [vmem:[%s7705_s1 + $0x98] sm:$0xff]   ;;  %v5139_v36 = vld [vmem:[%s7704_s0 + $0x100] ss:$2 sm:$0xff] }
 0x156   :  { %v1090_v40 = vmax.f32 %v6077_v37, 0.0  ;;  %v6079_v41 = vadd.f32 %v6078_v38, %v7030_v27  ;;  %v5138_v35 = vld [vmem:[%s7704_s0 + $0xf0] ss:$2 sm:$0xff] }
 0x157   :  { %1108 = vst.msk [vmem:[#allocation2 + $0x70] sm:$0x3f] %vm1107_vm1, %v1092_v39  ;;  %v1725_v39 = vpack.c.bf16 %v5139_v36, %v5138_v35  ;;  %v5202_v36 = vld [vmem:[%s7704_s0 + $0x112] ss:$2 sm:$0xff] }
 0x158   :  { %v1119_v42 = vld [vmem:[#allocation2 + $0x50] ss:$2 sm:$0xff]  ;;  %v1135_v43 = vld [vmem:[#allocation2 + $0x51] ss:$2 sm:$0xff]  ;;  %1105 = vst.msk [vmem:[#allocation2 + $0x60] sm:$0xff] %vm118_vm0, %v1090_v40  ;;  %v1091_v44 = vmax.f32 %v6079_v41, 0.0 }
 0x159   :  { %v1145_v24 = vmax.f32 %v1119_v42, %v1135_v43  ;;  %v1117_v45 = vld [vmem:[#allocation2 + $0x40] ss:$2 sm:$0xff]  ;;  %v1133_v46 = vld [vmem:[#allocation2 + $0x41] ss:$2 sm:$0xff]  ;;  %v6348_v42 = vld [vmem:[%s7705_s1 + $0x10] sm:$0xff]  }
 0x15a   :  { %v1144_v47 = vmax.f32 %v1117_v45, %v1133_v46  ;;  %1106 = vst.msk [vmem:[#allocation2 + $0x68] sm:$0xff] %vm118_vm0, %v1091_v44  ;;  %v6347_v41 = vld [vmem:[%s7705_s1 + $0x8] sm:$0xff]   ;;  %v6349_v43 = vld [vmem:[%s7705_s1 + $0x18] sm:$0xff]   ;;  %v6350_v45 = vld [vmem:[%s7705_s1 + $0x20] sm:$0xff]  }
 0x15b   :  { %1153 = vst.msk [vmem:[#allocation3 + $0x28] sm:$0xff] %vm118_vm0, %v1145_v24  ;;  %v1166_v48 = vld [vmem:[#allocation3 + $0x10] ss:$2 sm:$0xff]  ;;  %v1267_v55 = vld [vmem:[#allocation3 + $0x11] ss:$2 sm:$0xff] }
 0x15c   :  { %1152 = vst.msk [vmem:[#allocation3 + $0x20] sm:$0xff] %vm118_vm0, %v1144_v47  ;;  %v1171_v27 = vpack.c.bf16 %v1166_v48, %v1164_v25  ;;  %v1272_v61 = vpack.c.bf16 %v1267_v55, %v1265_v59  ;;  %v1366_v4 = vld [vmem:[#allocation3 + $0x2] ss:$2 sm:$0xff]  ;;  %v1467_v15 = vld [vmem:[#allocation3 + $0x3] ss:$2 sm:$0xff] }
 0x15d   :  { %v1568_v21 = vld [vmem:[#allocation3 + $0x4] ss:$2 sm:$0xff] }
 0x15e   :  { %v1123_v49 = vld [vmem:[#allocation2 + $0x70] ss:$2 sm:$0x7]  ;;  %v1139_v50 = vld [vmem:[#allocation2 + $0x71] ss:$2 sm:$0x7]  ;;  %5818 = vmatprep.mubr.msk.bf16.mxu1 %vm118_vm0, %v1171_v27 }
 0x15f   :  { %v1147_v51 = vmax.f32 %v1123_v49, %v1139_v50  ;;  %v5140_v44 = vld [vmem:[%s7704_s0 + $0x110] ss:$2 sm:$0xff]  ;;  %v5141_v24 = vld [vmem:[%s7704_s0 + $0x120] ss:$2 sm:$0xff] }
 0x160   :  { %v5142_v46 = vld [vmem:[%s7704_s0 + $0x130] ss:$2 sm:$0xff]  ;;  %v5143_v47 = vld [vmem:[%s7704_s0 + $0x140] ss:$2 sm:$0xff]  ;;  %v1726_v25 = vpack.c.bf16 %v5141_v24, %v5140_v44 }
 0x161   :  { %v1121_v52 = vld [vmem:[#allocation2 + $0x60] ss:$2 sm:$0xff]  ;;  %v1137_v53 = vld [vmem:[#allocation2 + $0x61] ss:$2 sm:$0xff]  ;;  %1156 = vst.msk [vmem:[#allocation3 + $0x38] sm:$0x7] %vm1155_vm2, %v1147_v51  ;;  %v1727_v48 = vpack.c.bf16 %v5143_v47, %v5142_v46 }
 0x162   :  { %v1146_v54 = vmax.f32 %v1121_v52, %v1137_v53  ;;  %v6351_v27 = vld [vmem:[%s7705_s1 + $0x28] sm:$0xff]   ;;  %v5144_v49 = vld [vmem:[%s7704_s0 + $0x150] ss:$2 sm:$0xff] }
 0x163   :  { %v1168_v56 = vld [vmem:[#allocation3 + $0x20] ss:$2 sm:$0xff]  ;;  %v1269_v2 = vld [vmem:[#allocation3 + $0x21] ss:$2 sm:$0xff]  ;;  %v5145_v50 = vld [vmem:[%s7704_s0 + $0x160] ss:$2 sm:$0xff] }
 0x164   :  { %1154 = vst.msk [vmem:[#allocation3 + $0x30] sm:$0xff] %vm118_vm0, %v1146_v54  ;;  %v1368_v1 = vld [vmem:[#allocation3 + $0x12] ss:$2 sm:$0xff]  ;;  %v1469_v13 = vld [vmem:[#allocation3 + $0x13] ss:$2 sm:$0xff]  ;;  %v1728_v54 = vpack.c.bf16 %v5145_v50, %v5144_v49 }
 0x165   :  { %v1373_v6 = vpack.c.bf16 %v1368_v1, %v1366_v4  ;;  %v1474_v17 = vpack.c.bf16 %v1469_v13, %v1467_v15  ;;  %v1570_v30 = vld [vmem:[#allocation3 + $0x14] ss:$2 sm:$0xff]  ;;  %v5166_v1 = vld [vmem:[%s7704_s0 + $0x101] ss:$2 sm:$0xff]  ;;  %v5167_v4 = vld [vmem:[%s7704_s0 + $0x111] ss:$2 sm:$0xff] }
 0x166   :  { %v1575_v22 = vpack.c.bf16 %v1570_v30, %v1568_v21  ;;  %v5146_v51 = vld [vmem:[%s7704_s0 + $0x170] ss:$2 sm:$0xff]  ;;  %v5147_v52 = vld [vmem:[%s7704_s0 + $0x180] ss:$2 sm:$0xff]  ;;  %v5172_v13 = vld [vmem:[%s7704_s0 + $0x161] ss:$2 sm:$0xff] }
 0x167   :  { %v6352_v53 = vld [vmem:[%s7705_s1 + $0x30] sm:$0xff]   ;;  %v1729_v55 = vpack.c.bf16 %v5147_v52, %v5146_v51  ;;  %v5174_v15 = vld [vmem:[%s7704_s0 + $0x181] ss:$2 sm:$0xff] }
 0x168   :  { %v5150_v59 = vld [vmem:[%s7704_s0 + $0x1b0] ss:$2 sm:$0xff]  ;;  %v5178_v30 = vld [vmem:[%s7704_s0 + $0x1c1] ss:$2 sm:$0xff] }
 0x169   :  { %v5207_v44 = vld [vmem:[%s7704_s0 + $0x162] ss:$2 sm:$0xff]  ;;  %v5208_v24 = vld [vmem:[%s7704_s0 + $0x172] ss:$2 sm:$0xff] }
 0x16a   :  { %v6360_v46 = vld [vmem:[%s7705_s1 + $0x70] sm:$0xff]   ;;  %v6362_v52 = vld [vmem:[%s7705_s1 + $0x80] sm:$0xff]  }
 0x16b   :  { %v1170_v57 = vld [vmem:[#allocation3 + $0x30] ss:$2 sm:$0xf]  ;;  %v1471_v26 = vld [vmem:[#allocation3 + $0x23] ss:$2 sm:$0xff] }
 0x16c   :  { %v1172_v58 = vpack.c.bf16 %v1170_v57, %v1168_v56  ;;  %v1370_v10 = vld [vmem:[#allocation3 + $0x22] ss:$2 sm:$0xff]  ;;  %v1372_v12 = vld [vmem:[#allocation3 + $0x32] ss:$2 sm:$0xf] }
 0x16d   :  { %v1374_v14 = vpack.c.bf16 %v1372_v12, %v1370_v10  ;;  %v1473_v29 = vld [vmem:[#allocation3 + $0x33] ss:$2 sm:$0xf]  ;;  %v1572_v37 = vld [vmem:[#allocation3 + $0x24] ss:$2 sm:$0xff] }
 0x16e   :  { %5819 = vmatmul.mubr.msk.bf16.vlgmr.msra.gmra.mrb[16].mxu1 %vm118_vm0, %v1172_v58  ;;  %v1475_v31 = vpack.c.bf16 %v1473_v29, %v1471_v26  ;;  %v1574_v38 = vld [vmem:[#allocation3 + $0x34] ss:$2 sm:$0xf]  ;;  %v6353_v56 = vld [vmem:[%s7705_s1 + $0x38] sm:$0xff]   ;;  %v5176_v26 = vld [vmem:[%s7704_s0 + $0x1a1] ss:$2 sm:$0xff] }
 0x16f   :  { %5823 = vmatpush3.bf16.msra.mxu1 %v7017_v11  ;;  %5830 = vmatprep.mubr.msk.bf16.mxu1 %vm118_vm0, %v1272_v61  ;;  %v1271_v11 = vld [vmem:[#allocation3 + $0x31] ss:$2 sm:$0xf]  ;;  %v1576_v40 = vpack.c.bf16 %v1574_v38, %v1572_v37  ;;  %v5148_v57 = vld [vmem:[%s7704_s0 + $0x190] ss:$2 sm:$0xff]  ;;  %v6355_v10 = vld [vmem:[%s7705_s1 + $0x48] sm:$0xff]  }
 0x170   :  { %5824 = vmatprep.subr.bf16.mxu1 %v6331_v60  ;;  %v1273_v3 = vpack.c.bf16 %v1271_v11, %v1269_v2  ;;  %v5149_v58 = vld [vmem:[%s7704_s0 + $0x1a0] ss:$2 sm:$0xff]  ;;  %v5165_v11 = vld [vmem:[%s7704_s0 + $0xf1] ss:$2 sm:$0xff] }
 0x171   :  { %v6354_v61 = vld [vmem:[%s7705_s1 + $0x40] sm:$0xff]   ;;  %v5171_v12 = vld [vmem:[%s7704_s0 + $0x151] ss:$2 sm:$0xff] }
 0x172   :  { %v5177_v29 = vld [vmem:[%s7704_s0 + $0x1b1] ss:$2 sm:$0xff]  ;;  %v5203_v37 = vld [vmem:[%s7704_s0 + $0x122] ss:$2 sm:$0xff]  ;;  %v5204_v38 = vld [vmem:[%s7704_s0 + $0x132] ss:$2 sm:$0xff] }
 0x173   :  { %5825 = vmatpush3.bf16.msra.mxu1 %v6331_v60  ;;  %v5151_v60 = vld [vmem:[%s7704_s0 + $0x1c0] ss:$2 sm:$0xff] }
 0x174   :  { %5826 = vmatprep.subr.bf16.mxu1 %v6332_v62  ;;  %v5211_v49 = vld [vmem:[%s7704_s0 + $0x1a2] ss:$2 sm:$0xff]  ;;  %v5212_v50 = vld [vmem:[%s7704_s0 + $0x1b2] ss:$2 sm:$0xff] }
 0x175   :  { %v5213_v51 = vld [vmem:[%s7704_s0 + $0x1c2] ss:$2 sm:$0xff] }
 0x177   :  { %5827 = vmatpush3.bf16.msra.mxu1 %v6332_v62  ;;  %v1730_v62 = vpack.c.bf16 %v5149_v58, %v5148_v57  ;;  %v5236_v57 = vld [vmem:[%s7704_s0 + $0x103] ss:$2 sm:$0xff] }
 0x178   :  { %5828 = vmatprep.subr.bf16.mxu1 %v6333_v63 }
 0x17b   :  { %5829 = vmatpush3.bf16.msra.mxu1 %v6333_v63  ;;  %v1731_v63 = vpack.c.bf16 %v5151_v60, %v5150_v59  ;;  %v5237_v60 = vld [vmem:[%s7704_s0 + $0x113] ss:$2 sm:$0xff] }
 0x17c   :  { %5834 = vmatprep.subr.bf16.mxu1 %v6334_v0 }
 0x17e   :  { %5831 = vmatmul.mubr.msk.bf16.vlgmr.msra.gmra.mrb[16].mxu1 %vm118_vm0, %v1273_v3  ;;  %v1930_v3 = vpack.c.bf16 %v5166_v1, %v5165_v11  ;;  %v6363_v1 = vld [vmem:[%s7705_s1 + $0x88] sm:$0xff]  }
 0x17f   :  { %5835 = vmatpush3.bf16.msra.mxu1 %v6334_v0  ;;  %5842 = vmatprep.mubr.msk.bf16.mxu1 %vm118_vm0, %v1373_v6  ;;  %v5152_v0 = vld [vmem:[%s7704_s0 + $0x1d0] ss:$2 sm:$0x3f]  ;;  %v5169_v6 = vld [vmem:[%s7704_s0 + $0x131] ss:$2 sm:$0xff] }
 0x180   :  { %5836 = vmatprep.subr.bf16.mxu1 %v6335_v5  ;;  %v1732_v2 = vpack.c.bf16 %v5152_v0, %v5152_v0 }
 0x183   :  { %5837 = vmatpush3.bf16.msra.mxu1 %v6335_v5  ;;  %v5168_v5 = vld [vmem:[%s7704_s0 + $0x121] ss:$2 sm:$0xff] }
 0x184   :  { %5838 = vmatprep.subr.bf16.mxu1 %v6336_v7 }
 0x187   :  { %5839 = vmatpush3.bf16.msra.mxu1 %v6336_v7  ;;  %v5170_v7 = vld [vmem:[%s7704_s0 + $0x141] ss:$2 sm:$0xff] }
 0x188   :  { %5840 = vmatprep.subr.bf16.mxu1 %v6337_v8 }
 0x18b   :  { %5841 = vmatpush3.bf16.msra.mxu1 %v6337_v8  ;;  %v1931_v8 = vpack.c.bf16 %v5168_v5, %v5167_v4  ;;  %v5243_v4 = vld [vmem:[%s7704_s0 + $0x173] ss:$2 sm:$0xff]  ;;  %v5244_v5 = vld [vmem:[%s7704_s0 + $0x183] ss:$2 sm:$0xff] }
 0x18c   :  { %5846 = vmatprep.subr.bf16.mxu1 %v6338_v9 }
 0x18e   :  { %5843 = vmatmul.mubr.msk.bf16.vlgmr.msra.gmra.mrb[16].mxu1 %vm118_vm0, %v1374_v14  ;;  %v5173_v14 = vld [vmem:[%s7704_s0 + $0x171] ss:$2 sm:$0xff] }
 0x18f   :  { %5847 = vmatpush3.bf16.msra.mxu1 %v6338_v9  ;;  %5854 = vmatprep.mubr.msk.bf16.mxu1 %vm118_vm0, %v1474_v17  ;;  %v1932_v9 = vpack.c.bf16 %v5170_v7, %v5169_v6  ;;  %v1933_v17 = vpack.c.bf16 %v5172_v13, %v5171_v12  ;;  %v6364_v6 = vld [vmem:[%s7705_s1 + $0x90] sm:$0xff]  }
 0x190   :  { %5848 = vmatprep.subr.bf16.mxu1 %v6339_v16  ;;  %v5246_v12 = vld [vmem:[%s7704_s0 + $0x1a3] ss:$2 sm:$0xff]  ;;  %v5247_v13 = vld [vmem:[%s7704_s0 + $0x1b3] ss:$2 sm:$0xff] }
 0x193   :  { %5849 = vmatpush3.bf16.msra.mxu1 %v6339_v16  ;;  %v6356_v16 = vld [vmem:[%s7705_s1 + $0x50] sm:$0xff]  }
 0x194   :  { %5850 = vmatprep.subr.bf16.mxu1 %v6340_v18 }
 0x197   :  { %5851 = vmatpush3.bf16.msra.mxu1 %v6340_v18  ;;  %v1934_v18 = vpack.c.bf16 %v5174_v15, %v5173_v14  ;;  %v5248_v14 = vld [vmem:[%s7704_s0 + $0x1c3] ss:$2 sm:$0xff] }
 0x198   :  { %5852 = vmatprep.subr.bf16.mxu1 %v6341_v19 }
 0x19b   :  { %5853 = vmatpush3.bf16.msra.mxu1 %v6341_v19  ;;  %v6357_v19 = vld [vmem:[%s7705_s1 + $0x58] sm:$0xff]  }
 0x19c   :  { %5858 = vmatprep.subr.bf16.mxu1 %v6342_v20 }
 0x19e   :  { %5855 = vmatmul.mubr.msk.bf16.vlgmr.msra.gmra.mrb[16].mxu1 %vm118_vm0, %v1475_v31  ;;  %v6358_v31 = vld [vmem:[%s7705_s1 + $0x60] sm:$0xff]  }
 0x19f   :  { %5859 = vmatpush3.bf16.msra.mxu1 %v6342_v20  ;;  %5866 = vmatprep.mubr.msk.bf16.mxu1 %vm118_vm0, %v1575_v22  ;;  %v5175_v20 = vld [vmem:[%s7704_s0 + $0x191] ss:$2 sm:$0xff] }
 0x1a0   :  { %5860 = vmatprep.subr.bf16.mxu1 %v6343_v32  ;;  %v1935_v21 = vpack.c.bf16 %v5176_v26, %v5175_v20  ;;  %v5179_v22 = vld [vmem:[%s7704_s0 + $0x1d1] ss:$2 sm:$0x3f] }
 0x1a3   :  { %5861 = vmatpush3.bf16.msra.mxu1 %v6343_v32  ;;  %v1936_v32 = vpack.c.bf16 %v5178_v30, %v5177_v29  ;;  %v5272_v29 = vld [vmem:[%s7704_s0 + $0x114] ss:$2 sm:$0xff]  ;;  %v5273_v30 = vld [vmem:[%s7704_s0 + $0x124] ss:$2 sm:$0xff] }
 0x1a4   :  { %5862 = vmatprep.subr.bf16.mxu1 %v6344_v33 }
 0x1a7   :  { %5863 = vmatpush3.bf16.msra.mxu1 %v6344_v33  ;;  %v5200_v33 = vld [vmem:[%s7704_s0 + $0xf2] ss:$2 sm:$0xff] }
 0x1a8   :  { %5864 = vmatprep.subr.bf16.mxu1 %v6345_v23 }
 0x1ab   :  { %5865 = vmatpush3.bf16.msra.mxu1 %v6345_v23  ;;  %v5201_v23 = vld [vmem:[%s7704_s0 + $0x102] ss:$2 sm:$0xff] }
 0x1ac   :  { %5870 = vmatprep.subr.bf16.mxu1 %v6346_v34  ;;  %v2135_v35 = vpack.c.bf16 %v5201_v23, %v5200_v33  ;;  %v5276_v33 = vld [vmem:[%s7704_s0 + $0x154] ss:$2 sm:$0xff]  ;;  %v5277_v23 = vld [vmem:[%s7704_s0 + $0x164] ss:$2 sm:$0xff] }
 0x1ae   :  { %5867 = vmatmul.mubr.msk.bf16.vlgmr.msra.gmra.mrb[16].mxu1 %vm118_vm0, %v1576_v40  ;;  %v2136_v40 = vpack.c.bf16 %v5203_v37, %v5202_v36  ;;  %v2548_v36 = vpack.c.bf16 %v5277_v23, %v5276_v33 }
 0x1af   :  { %5871 = vmatpush3.bf16.msra.mxu1 %v6346_v34  ;;  %5878 = vmatprep.mubr.msk.bf16.mxu1 %vm118_vm0, %v1725_v39  ;;  %v1937_v34 = vpack.c.bf16 %v5179_v22, %v5179_v22  ;;  %v5205_v39 = vld [vmem:[%s7704_s0 + $0x142] ss:$2 sm:$0xff] }
 0x1b0   :  { %5872 = vmatprep.subr.bf16.mxu1 %v6347_v41 }
 0x1b3   :  { %5873 = vmatpush3.bf16.msra.mxu1 %v6347_v41  ;;  %v2137_v41 = vpack.c.bf16 %v5205_v39, %v5204_v38  ;;  %v5280_v38 = vld [vmem:[%s7704_s0 + $0x194] ss:$2 sm:$0xff]  ;;  %v5281_v39 = vld [vmem:[%s7704_s0 + $0x1a4] ss:$2 sm:$0xff] }
 0x1b4   :  { %5874 = vmatprep.subr.bf16.mxu1 %v6348_v42 }
 0x1b7   :  { %5875 = vmatpush3.bf16.msra.mxu1 %v6348_v42  ;;  %v6359_v42 = vld [vmem:[%s7705_s1 + $0x68] sm:$0xff]  }
 0x1b8   :  { %5876 = vmatprep.subr.bf16.mxu1 %v6349_v43 }
 0x1bb   :  { %5877 = vmatpush3.bf16.msra.mxu1 %v6349_v43  ;;  %v5206_v43 = vld [vmem:[%s7704_s0 + $0x152] ss:$2 sm:$0xff] }
 0x1bc   :  { %5894 = vmatprep.subr.bf16.mxu1 %v6350_v45  ;;  %v2138_v47 = vpack.c.bf16 %v5207_v44, %v5206_v43  ;;  %v5284_v44 = vld [vmem:[%s7704_s0 + $0x1d4] ss:$2 sm:$0x3f] }
 0x1be   :  { %5879 = vmatmul.mubr.msk.bf16.vlgmr.msra.gmra.mrb[20].mxu1 %vm118_vm0, %v1726_v25 }
 0x1bf   :  { %5895 = vmatpush3.bf16.msra.mxu1 %v6350_v45  ;;  %5882 = vmatprep.mubr.msk.bf16.mxu1 %vm118_vm0, %v1727_v48  ;;  %v5209_v45 = vld [vmem:[%s7704_s0 + $0x182] ss:$2 sm:$0xff]  ;;  %v6361_v48 = vld [vmem:[%s7705_s1 + $0x78] sm:$0xff]  }
 0x1c0   :  { %5896 = vmatprep.subr.bf16.mxu1 %v6351_v27  ;;  %v2139_v25 = vpack.c.bf16 %v5209_v45, %v5208_v24  ;;  %v2552_v24 = vpack.c.bf16 %v5284_v44, %v5284_v44 }
 0x1c3   :  { %5897 = vmatpush3.bf16.msra.mxu1 %v6351_v27  ;;  %v5210_v27 = vld [vmem:[%s7704_s0 + $0x192] ss:$2 sm:$0xff] }
 0x1c4   :  { %5898 = vmatprep.subr.bf16.mxu1 %v6352_v53 }
 0x1c6   :  { %5883 = vmatmul.mubr.msk.bf16.gmra.mrb[24].mxu1 %vm118_vm0, %v1728_v54  ;;  %v2141_v54 = vpack.c.bf16 %v5213_v51, %v5212_v50 }
 0x1c7   :  { %5886 = vmatprep.mubr.msk.bf16.mxu1 %vm118_vm0, %v1729_v55  ;;  %5899 = vmatpush3.bf16.msra.mxu1 %v6352_v53  ;;  %v2140_v53 = vpack.c.bf16 %v5211_v49, %v5210_v27  ;;  %v5214_v55 = vld [vmem:[%s7704_s0 + $0x1d2] ss:$2 sm:$0x3f] }
 0x1c8   :  { %5900 = vmatprep.subr.bf16.mxu1 %v6353_v56  ;;  %v2142_v58 = vpack.c.bf16 %v5214_v55, %v5214_v55 }
 0x1cb   :  { %5901 = vmatpush3.bf16.msra.mxu1 %v6353_v56  ;;  %v5235_v56 = vld [vmem:[%s7704_s0 + $0xf3] ss:$2 sm:$0xff] }
 0x1cc   :  { %5918 = vmatprep.subr.bf16.mxu1 %v6354_v61  ;;  %v2340_v59 = vpack.c.bf16 %v5236_v57, %v5235_v56 }
 0x1ce   :  { %5887 = vmatmul.mubr.msk.bf16.gmra.mrb[28].mxu1 %vm118_vm0, %v1730_v62  ;;  %v5239_v62 = vld [vmem:[%s7704_s0 + $0x133] ss:$2 sm:$0xff] }
 0x1cf   :  { %5890 = vmatprep.mubr.msk.bf16.mxu1 %vm118_vm0, %v1731_v63  ;;  %v5240_v63 = vld [vmem:[%s7704_s0 + $0x143] ss:$2 sm:$0xff] }
 0x1d0   :  { %v2342_v11 = vpack.c.bf16 %v5240_v63, %v5239_v62  ;;  %v6368_v62 = vld [vmem:[%s7705_s1 + $0x10] sm:$0xff]   ;;  %v6369_v63 = vld [vmem:[%s7705_s1 + $0x18] sm:$0xff]  }
 0x1d6   :  { %5891 = vmatmul.mubr.msk.bf16.gmra.mrb[32].mxu1 %vm118_vm0, %v1732_v2  ;;  %v5241_v2 = vld [vmem:[%s7704_s0 + $0x153] ss:$2 sm:$0xff] }
 0x1d7   :  { %5902 = vmatprep.mubr.msk.bf16.mxu1 %vm118_vm0, %v1930_v3  ;;  %v5242_v3 = vld [vmem:[%s7704_s0 + $0x163] ss:$2 sm:$0xff] }
 0x1d8   :  { %v2343_v7 = vpack.c.bf16 %v5242_v3, %v5241_v2 }
 0x1de   :  { %5903 = vmatmul.mubr.msk.bf16.vlgmr.msra.gmra.mrb[20].mxu1 %vm118_vm0, %v1931_v8  ;;  %v2344_v8 = vpack.c.bf16 %v5244_v5, %v5243_v4 }
 0x1df   :  { %5919 = vmatpush3.bf16.msra.mxu1 %v6354_v61  ;;  %5906 = vmatprep.mubr.msk.bf16.mxu1 %vm118_vm0, %v1932_v9  ;;  %v5238_v61 = vld [vmem:[%s7704_s0 + $0x123] ss:$2 sm:$0xff]  ;;  %v6365_v9 = vld [vmem:[%s7705_s1 + $0x98] sm:$0xff]  }
 0x1e0   :  { %5920 = vmatprep.subr.bf16.mxu1 %v6355_v10  ;;  %v2341_v0 = vpack.c.bf16 %v5238_v61, %v5237_v60  ;;  %v6367_v61 = vld [vmem:[%s7705_s1 + $0x8] sm:$0xff]  }
 0x1e3   :  { %5921 = vmatpush3.bf16.msra.mxu1 %v6355_v10  ;;  %v5245_v10 = vld [vmem:[%s7704_s0 + $0x193] ss:$2 sm:$0xff] }
 0x1e4   :  { %5922 = vmatprep.subr.bf16.mxu1 %v6356_v16  ;;  %v2345_v15 = vpack.c.bf16 %v5246_v12, %v5245_v10 }
 0x1e6   :  { %5907 = vmatmul.mubr.msk.bf16.gmra.mrb[24].mxu1 %vm118_vm0, %v1933_v17  ;;  %v5249_v17 = vld [vmem:[%s7704_s0 + $0x1d3] ss:$2 sm:$0x3f] }
 0x1e7   :  { %5910 = vmatprep.mubr.msk.bf16.mxu1 %vm118_vm0, %v1934_v18  ;;  %5923 = vmatpush3.bf16.msra.mxu1 %v6356_v16  ;;  %v2346_v16 = vpack.c.bf16 %v5248_v14, %v5247_v13  ;;  %v5270_v18 = vld [vmem:[%s7704_s0 + $0xf4] ss:$2 sm:$0xff]  ;;  %v2347_v20 = vpack.c.bf16 %v5249_v17, %v5249_v17 }
 0x1e8   :  { %5924 = vmatprep.subr.bf16.mxu1 %v6357_v19 }
 0x1eb   :  { %5925 = vmatpush3.bf16.msra.mxu1 %v6357_v19  ;;  %v5271_v19 = vld [vmem:[%s7704_s0 + $0x104] ss:$2 sm:$0xff] }
 0x1ec   :  { %5942 = vmatprep.subr.bf16.mxu1 %v6358_v31  ;;  %v2545_v26 = vpack.c.bf16 %v5271_v19, %v5270_v18 }
 0x1ee   :  { %5911 = vmatmul.mubr.msk.bf16.gmra.mrb[28].mxu1 %vm118_vm0, %v1935_v21  ;;  %v5275_v21 = vld [vmem:[%s7704_s0 + $0x144] ss:$2 sm:$0xff] }
 0x1ef   :  { %5914 = vmatprep.mubr.msk.bf16.mxu1 %vm118_vm0, %v1936_v32  ;;  %v2546_v32 = vpack.c.bf16 %v5273_v30, %v5272_v29 }
 0x1f6   :  { %5915 = vmatmul.mubr.msk.bf16.gmra.mrb[32].mxu1 %vm118_vm0, %v1937_v34  ;;  %v5278_v34 = vld [vmem:[%s7704_s0 + $0x174] ss:$2 sm:$0xff] }
 0x1f7   :  { %5926 = vmatprep.mubr.msk.bf16.mxu1 %vm118_vm0, %v2135_v35  ;;  %v5279_v35 = vld [vmem:[%s7704_s0 + $0x184] ss:$2 sm:$0xff] }
 0x1f8   :  { %v2549_v37 = vpack.c.bf16 %v5279_v35, %v5278_v34 }
 0x1fe   :  { %5927 = vmatmul.mubr.msk.bf16.vlgmr.msra.gmra.mrb[20].mxu1 %vm118_vm0, %v2136_v40  ;;  %v5282_v40 = vld [vmem:[%s7704_s0 + $0x1b4] ss:$2 sm:$0xff] }
 0x1ff   :  { %5943 = vmatpush3.bf16.msra.mxu1 %v6358_v31  ;;  %5930 = vmatprep.mubr.msk.bf16.mxu1 %vm118_vm0, %v2137_v41  ;;  %v5274_v31 = vld [vmem:[%s7704_s0 + $0x134] ss:$2 sm:$0xff]  ;;  %v5283_v41 = vld [vmem:[%s7704_s0 + $0x1c4] ss:$2 sm:$0xff] }
 0x200   :  { %5944 = vmatprep.subr.bf16.mxu1 %v6359_v42  ;;  %v2547_v22 = vpack.c.bf16 %v5275_v21, %v5274_v31  ;;  %v2551_v43 = vpack.c.bf16 %v5283_v41, %v5282_v40 }
 0x203   :  { %5945 = vmatpush3.bf16.msra.mxu1 %v6359_v42  ;;  %v2550_v42 = vpack.c.bf16 %v5281_v39, %v5280_v38 }
 0x204   :  { %5946 = vmatprep.subr.bf16.mxu1 %v6360_v46 }
 0x206   :  { %5931 = vmatmul.mubr.msk.bf16.gmra.mrb[24].mxu1 %vm118_vm0, %v2138_v47 }
 0x207   :  { %5934 = vmatprep.mubr.msk.bf16.mxu1 %vm118_vm0, %v2139_v25  ;;  %5947 = vmatpush3.bf16.msra.mxu1 %v6360_v46 }
 0x208   :  { %5948 = vmatprep.subr.bf16.mxu1 %v6361_v48 }
 0x20b   :  { %5949 = vmatpush3.bf16.msra.mxu1 %v6361_v48 }
 0x20c   :  { %5966 = vmatprep.subr.bf16.mxu1 %v6362_v52 }
 0x20e   :  { %5935 = vmatmul.mubr.msk.bf16.gmra.mrb[28].mxu1 %vm118_vm0, %v2140_v53 }
 0x20f   :  { %5938 = vmatprep.mubr.msk.bf16.mxu1 %vm118_vm0, %v2141_v54 }
 0x216   :  { %5939 = vmatmul.mubr.msk.bf16.gmra.mrb[32].mxu1 %vm118_vm0, %v2142_v58 }
 0x217   :  { %5950 = vmatprep.mubr.msk.bf16.mxu1 %vm118_vm0, %v2340_v59 }
 0x21e   :  { %5951 = vmatmul.mubr.msk.bf16.vlgmr.msra.gmra.mrb[20].mxu1 %vm118_vm0, %v2341_v0  ;;  %v7487_v0 = vld [vmem:[%s7705_s1 + $0x20] sm:$0xff]  }
 0x21f   :  { %5967 = vmatpush3.bf16.msra.mxu1 %v6362_v52  ;;  %5954 = vmatprep.mubr.msk.bf16.mxu1 %vm118_vm0, %v2342_v11  ;;  %v7493_v11 = vld [vmem:[%s7706_s2] ss:$0 sm:$0xff] }
 0x220   :  { %5968 = vmatprep.subr.bf16.mxu1 %v6363_v1 }
 0x223   :  { %5969 = vmatpush3.bf16.msra.mxu1 %v6363_v1 }
 0x224   :  { %5970 = vmatprep.subr.bf16.mxu1 %v6364_v6 }
 0x226   :  { %5955 = vmatmul.mubr.msk.bf16.gmra.mrb[24].mxu1 %vm118_vm0, %v2343_v7 }
 0x227   :  { %5958 = vmatprep.mubr.msk.bf16.mxu1 %vm118_vm0, %v2344_v8  ;;  %5971 = vmatpush3.bf16.msra.mxu1 %v6364_v6 }
 0x228   :  { %5972 = vmatprep.subr.bf16.mxu1 %v6365_v9 }
 0x22b   :  { %5973 = vmatpush3.bf16.msra.mxu1 %v6365_v9 }
 0x22e   :  { %5959 = vmatmul.mubr.msk.bf16.gmra.mrb[28].mxu1 %vm118_vm0, %v2345_v15 }
 0x22f   :  { %5962 = vmatprep.mubr.msk.bf16.mxu1 %vm118_vm0, %v2346_v16 }
 0x236   :  { %5963 = vmatmul.mubr.msk.bf16.gmra.mrb[32].mxu1 %vm118_vm0, %v2347_v20 }
 0x237   :  { %5974 = vmatprep.mubr.msk.bf16.mxu1 %vm118_vm0, %v2545_v26 }
 0x23e   :  { %5975 = vmatmul.mubr.msk.bf16.vlgmr.msra.gmra.mrb[20].mxu1 %vm118_vm0, %v2546_v32 }
 0x23f   :  { %5978 = vmatprep.mubr.msk.bf16.mxu1 %vm118_vm0, %v2547_v22 }
 0x246   :  { %5979 = vmatmul.mubr.msk.bf16.gmra.mrb[24].mxu1 %vm118_vm0, %v2548_v36 }
 0x247   :  { %5982 = vmatprep.mubr.msk.bf16.mxu1 %vm118_vm0, %v2549_v37 }
 0x24e   :  { %5983 = vmatmul.mubr.msk.bf16.gmra.mrb[28].mxu1 %vm118_vm0, %v2550_v42 }
 0x24f   :  { %5986 = vmatprep.mubr.msk.bf16.mxu1 %vm118_vm0, %v2551_v43 }
 0x256   :  { %5987 = vmatmul.mubr.msk.bf16.gmra.mrb[32].mxu1 %vm118_vm0, %v2552_v24 }
 0x281   :  { %v5868_v45 = vpop.f32.mrb[16].mxu1 }
 0x282   :  { %v6080_v46 = vadd.f32 %v5868_v45, %v7035_v28  ;;  %v1649_v47 = vpop.f32.mrb[17].mxu1 }
 0x283   :  { %v6081_v25 = vadd.f32 %v7035_v28, %v1649_v47  ;;  %v5869_v48 = vpop.f32.mrb[18].mxu1 }
 0x284   :  { %v1670_v27 = vmax.f32 %v6080_v46, 0.0  ;;  %v6082_v49 = vadd.f32 %v5869_v48, %v7035_v28  ;;  %v1652_v50 = vpop.f32.mrb[19].mxu1 }
 0x285   :  { %v1668_v51 = vmax.f32 %v6081_v25, 0.0  ;;  %v6083_v52 = vadd.f32 %v7035_v28, %v1652_v50  ;;  %v6366_v28 = vld [vmem:[%s7705_s1] sm:$0xff]  }
 0x286   :  { %1674 = vst.msk [vmem:[#allocation4 + $0x10] sm:$0xff] %vm118_vm0, %v1670_v27  ;;  %v1671_v53 = vmax.f32 %v6082_v49, 0.0  ;;  %5990 = vmatprep.subr.bf16.mxu0 %v6366_v28 }
 0x287   :  { %1672 = vst.msk [vmem:[#allocation4] sm:$0xff] %vm118_vm0, %v1668_v51  ;;  %v1669_v54 = vmax.f32 %v6083_v52, 0.0  ;;  %5991 = vmatpush3.bf16.msra.mxu0 %v6366_v28 }
 0x288   :  { %1676 = vst.msk [vmem:[#allocation4 + $0x18] sm:$0xf] %vm1675_vm3, %v1671_v53  ;;  %5992 = vmatprep.subr.bf16.mxu0 %v6367_v61 }
 0x289   :  { %1673 = vst.msk [vmem:[#allocation4 + $0x8] sm:$0xff] %vm118_vm0, %v1669_v54 }
 0x28b   :  { %5993 = vmatpush3.bf16.msra.mxu0 %v6367_v61 }
 0x28c   :  { %5994 = vmatprep.subr.bf16.mxu0 %v6368_v62 }
 0x28f   :  { %v1679_v55 = vld [vmem:[#allocation4 + $0x10] ss:$2 sm:$0x3f]  ;;  %v1683_v56 = vld [vmem:[#allocation4 + $0x11] ss:$2 sm:$0x3f]  ;;  %5995 = vmatpush3.bf16.msra.mxu0 %v6368_v62 }
 0x290   :  { %v1685_v57 = vmax.f32 %v1679_v55, %v1683_v56  ;;  %v1677_v58 = vld [vmem:[#allocation4] ss:$2 sm:$0xff]  ;;  %v1681_v59 = vld [vmem:[#allocation4 + $0x1] ss:$2 sm:$0xff]  ;;  %5996 = vmatprep.subr.bf16.mxu0 %v6369_v63 }
 0x291   :  { %v1684_v60 = vmax.f32 %v1677_v58, %v1681_v59 }
 0x292   :  { %1687 = vst.msk [vmem:[#allocation5 + $0x8] sm:$0x3f] %vm1107_vm1, %v1685_v57 }
 0x293   :  { %1686 = vst.msk [vmem:[#allocation5] sm:$0xff] %vm118_vm0, %v1684_v60  ;;  %5997 = vmatpush3.bf16.msra.mxu0 %v6369_v63 }
 0x294   :  { %6002 = vmatprep.subr.bf16.mxu0 %v7487_v0 }
 0x311   :  { %v5976_v1 = vpop.f32.mrb[20].mxu1 }
 0x312   :  { %v6084_v2 = vadd.f32 %v5976_v1, %v7493_v11  ;;  %v2643_v3 = vpop.f32.mrb[21].mxu1 }
 0x313   :  { %v6085_v4 = vadd.f32 %v7493_v11, %v2643_v3  ;;  %v5977_v5 = vpop.f32.mrb[22].mxu1 }
 0x314   :  { %v2722_v6 = vmax.f32 %v6084_v2, 0.0  ;;  %v6086_v7 = vadd.f32 %v5977_v5, %v7493_v11  ;;  %v2646_v8 = vpop.f32.mrb[23].mxu1 }
 0x315   :  { %v2720_v9 = vmax.f32 %v6085_v4, 0.0  ;;  %v6087_v10 = vadd.f32 %v7493_v11, %v2646_v8 }
 0x316   :  { %2737 = vst.msk [vmem:[#allocation2 + $0x86] sm:$0xff] %vm118_vm0, %v2722_v6  ;;  %v2723_v12 = vmax.f32 %v6086_v7, 0.0 }
 0x317   :  { %2735 = vst.msk [vmem:[#allocation2 + $0x76] sm:$0xff] %vm118_vm0, %v2720_v9  ;;  %v2721_v13 = vmax.f32 %v6087_v10, 0.0 }
 0x318   :  { %2738 = vst.msk [vmem:[#allocation2 + $0x8e] sm:$0xff] %vm118_vm0, %v2723_v12 }
 0x319   :  { %2736 = vst.msk [vmem:[#allocation2 + $0x7e] sm:$0xff] %vm118_vm0, %v2721_v13  ;;  %v5980_v14 = vpop.f32.mrb[24].mxu1 }
 0x31a   :  { %v6088_v15 = vadd.f32 %v5980_v14, %v7493_v11  ;;  %v2659_v16 = vpop.f32.mrb[25].mxu1 }
 0x31b   :  { %v6089_v17 = vadd.f32 %v7493_v11, %v2659_v16  ;;  %v5981_v18 = vpop.f32.mrb[26].mxu1 }
 0x31c   :  { %v2726_v19 = vmax.f32 %v6088_v15, 0.0  ;;  %v6090_v20 = vadd.f32 %v5981_v18, %v7493_v11  ;;  %v2662_v26 = vpop.f32.mrb[27].mxu1  ;;  %v6371_v18 = vld [vmem:[%s7705_s1 + $0x28] sm:$0xff]  }
 0x31d   :  { %v2724_v29 = vmax.f32 %v6089_v17, 0.0  ;;  %v6091_v30 = vadd.f32 %v7493_v11, %v2662_v26  ;;  %v6373_v26 = vld [vmem:[%s7705_s1 + $0x38] sm:$0xff]  }
 0x31e   :  { %2741 = vst.msk [vmem:[#allocation2 + $0xa6] sm:$0xff] %vm118_vm0, %v2726_v19  ;;  %v2727_v31 = vmax.f32 %v6090_v20, 0.0  ;;  %v6372_v20 = vld [vmem:[%s7705_s1 + $0x30] sm:$0xff]  }
 0x31f   :  { %v2753_v21 = vld [vmem:[#allocation2 + $0x86] ss:$2 sm:$0xff]  ;;  %v2769_v32 = vld [vmem:[#allocation2 + $0x87] ss:$2 sm:$0xff]  ;;  %2739 = vst.msk [vmem:[#allocation2 + $0x96] sm:$0xff] %vm118_vm0, %v2724_v29  ;;  %v2725_v22 = vmax.f32 %v6091_v30, 0.0 }
 0x320   :  { %v2783_v33 = vmax.f32 %v2753_v21, %v2769_v32  ;;  %v2751_v23 = vld [vmem:[#allocation2 + $0x76] ss:$2 sm:$0xff]  ;;  %v2767_v34 = vld [vmem:[#allocation2 + $0x77] ss:$2 sm:$0xff]  ;;  %2742 = vst.msk [vmem:[#allocation2 + $0xae] sm:$0xff] %vm118_vm0, %v2727_v31 }
 0x321   :  { %v2782_v35 = vmax.f32 %v2751_v23, %v2767_v34  ;;  %2740 = vst.msk [vmem:[#allocation2 + $0x9e] sm:$0xff] %vm118_vm0, %v2725_v22  ;;  %v5984_v36 = vpop.f32.mrb[28].mxu1  ;;  %v6374_v29 = vld [vmem:[%s7705_s1 + $0x40] sm:$0xff]   ;;  %v6375_v22 = vld [vmem:[%s7705_s1 + $0x48] sm:$0xff]   ;;  %v6376_v23 = vld [vmem:[%s7705_s1 + $0x50] sm:$0xff]  }
 0x322   :  { %2791 = vst.msk [vmem:[#allocation3 + $0x43] sm:$0xff] %vm118_vm0, %v2783_v33  ;;  %v6092_v37 = vadd.f32 %v5984_v36, %v7493_v11  ;;  %v2675_v38 = vpop.f32.mrb[29].mxu1  ;;  %v6377_v34 = vld [vmem:[%s7705_s1 + $0x58] sm:$0xff]  }
 0x323   :  { %2790 = vst.msk [vmem:[#allocation3 + $0x3b] sm:$0xff] %vm118_vm0, %v2782_v35  ;;  %v6093_v39 = vadd.f32 %v7493_v11, %v2675_v38  ;;  %v5985_v40 = vpop.f32.mrb[30].mxu1  ;;  %v6378_v35 = vld [vmem:[%s7705_s1 + $0x60] sm:$0xff]  }
 0x324   :  { %v2730_v41 = vmax.f32 %v6092_v37, 0.0  ;;  %v6094_v42 = vadd.f32 %v5985_v40, %v7493_v11  ;;  %v2678_v43 = vpop.f32.mrb[31].mxu1 }
 0x325   :  { %v2728_v44 = vmax.f32 %v6093_v39, 0.0  ;;  %v6095_v24 = vadd.f32 %v7493_v11, %v2678_v43  ;;  %v6380_v43 = vld [vmem:[%s7705_s1 + $0x70] sm:$0xff]  }
 0x326   :  { %2745 = vst.msk [vmem:[#allocation2 + $0xc6] sm:$0xff] %vm118_vm0, %v2730_v41  ;;  %v2731_v45 = vmax.f32 %v6094_v42, 0.0  ;;  %v6379_v41 = vld [vmem:[%s7705_s1 + $0x68] sm:$0xff]  }
 0x327   :  { %v2757_v46 = vld [vmem:[#allocation2 + $0xa6] ss:$2 sm:$0xff]  ;;  %v2773_v47 = vld [vmem:[#allocation2 + $0xa7] ss:$2 sm:$0xff]  ;;  %2743 = vst.msk [vmem:[#allocation2 + $0xb6] sm:$0xff] %vm118_vm0, %v2728_v44  ;;  %v2729_v25 = vmax.f32 %v6095_v24, 0.0 }
 0x328   :  { %v2785_v48 = vmax.f32 %v2757_v46, %v2773_v47  ;;  %v2755_v27 = vld [vmem:[#allocation2 + $0x96] ss:$2 sm:$0xff]  ;;  %v2771_v49 = vld [vmem:[#allocation2 + $0x97] ss:$2 sm:$0xff]  ;;  %2746 = vst.msk [vmem:[#allocation2 + $0xce] sm:$0xff] %vm118_vm0, %v2731_v45 }
 0x329   :  { %v2784_v50 = vmax.f32 %v2755_v27, %v2771_v49  ;;  %2744 = vst.msk [vmem:[#allocation2 + $0xbe] sm:$0xff] %vm118_vm0, %v2729_v25  ;;  %v5988_v51 = vpop.f32.mrb[32].mxu1  ;;  %v6381_v44 = vld [vmem:[%s7705_s1 + $0x78] sm:$0xff]   ;;  %v6382_v24 = vld [vmem:[%s7705_s1 + $0x80] sm:$0xff]   ;;  %v6383_v27 = vld [vmem:[%s7705_s1 + $0x88] sm:$0xff]  }
 0x32a   :  { %2793 = vst.msk [vmem:[#allocation3 + $0x53] sm:$0xff] %vm118_vm0, %v2785_v48  ;;  %v6096_v52 = vadd.f32 %v5988_v51, %v7493_v11  ;;  %v2691_v53 = vpop.f32.mrb[33].mxu1  ;;  %v2806_v3 = vld [vmem:[#allocation3 + $0x3b] ss:$2 sm:$0xff]  ;;  %v2907_v17 = vld [vmem:[#allocation3 + $0x3c] ss:$2 sm:$0xff] }
 0x32b   :  { %2792 = vst.msk [vmem:[#allocation3 + $0x4b] sm:$0xff] %vm118_vm0, %v2784_v50  ;;  %v6097_v54 = vadd.f32 %v7493_v11, %v2691_v53  ;;  %v5989_v55 = vpop.f32.mrb[34].mxu1  ;;  %v6384_v50 = vld [vmem:[%s7705_s1 + $0x90] sm:$0xff]   ;;  %v6385_v51 = vld [vmem:[%s7705_s1 + $0x98] sm:$0xff]  }
 0x32c   :  { %v2734_v56 = vmax.f32 %v6096_v52, 0.0  ;;  %v2694_v57 = vpop.f32.mrb[35].mxu1  ;;  %v6388_v55 = vld [vmem:[#allocation6 + $0x4] ss:$8 sps:$4 sm:$0xff]  }
 0x32d   :  { %v2732_v58 = vmax.f32 %v6097_v54, 0.0  ;;  %v6098_v59 = vadd.f32 %v7493_v11, %v2694_v57  ;;  %v6391_v57 = vld [vmem:[#allocation6 + $0x14] ss:$8 sps:$4 sm:$0xff]  }
 0x32e   :  { %2749 = vst.msk [vmem:[#allocation2 + $0xe6] sm:$0x3f] %vm1107_vm1, %v2734_v56  ;;  %v6386_v56 = vld [vmem:[#allocation6] ss:$8 sps:$4 sm:$0xff]  }
 0x32f   :  { %v2761_v60 = vld [vmem:[#allocation2 + $0xc6] ss:$2 sm:$0xff]  ;;  %v2777_v28 = vld [vmem:[#allocation2 + $0xc7] ss:$2 sm:$0xff]  ;;  %2747 = vst.msk [vmem:[#allocation2 + $0xd6] sm:$0xff] %vm118_vm0, %v2732_v58  ;;  %v2733_v61 = vmax.f32 %v6098_v59, 0.0 }
 0x330   :  { %v2787_v62 = vmax.f32 %v2761_v60, %v2777_v28  ;;  %v2759_v63 = vld [vmem:[#allocation2 + $0xb6] ss:$2 sm:$0xff]  ;;  %v2775_v1 = vld [vmem:[#allocation2 + $0xb7] ss:$2 sm:$0xff] }
 0x331   :  { %v2786_v2 = vmax.f32 %v2759_v63, %v2775_v1  ;;  %2748 = vst.msk [vmem:[#allocation2 + $0xde] sm:$0xff] %vm118_vm0, %v2733_v61  ;;  %v6389_v58 = vld [vmem:[#allocation6 + $0x10] ss:$8 sps:$4 sm:$0xff]   ;;  %v6392_v59 = vld [vmem:[#allocation6 + $0x20] ss:$8 sps:$4 sm:$0xff]   ;;  %v6623_v61 = vmov 0  }
 0x332   :  { %2795 = vst.msk [vmem:[#allocation3 + $0x63] sm:$0xff] %vm118_vm0, %v2787_v62  ;;  %v2808_v4 = vld [vmem:[#allocation3 + $0x4b] ss:$2 sm:$0xff]  ;;  %v2909_v13 = vld [vmem:[#allocation3 + $0x4c] ss:$2 sm:$0xff]  ;;  %4839 = vmatprep.subr.bf16.mxu1 %v6623_v61 }
 0x333   :  { %2794 = vst.msk [vmem:[#allocation3 + $0x5b] sm:$0xff] %vm118_vm0, %v2786_v2  ;;  %v2813_v5 = vpack.c.bf16 %v2808_v4, %v2806_v3  ;;  %v2914_v19 = vpack.c.bf16 %v2909_v13, %v2907_v17  ;;  %v3008_v32 = vld [vmem:[#allocation3 + $0x3d] ss:$2 sm:$0xff]  ;;  %v3109_v40 = vld [vmem:[#allocation3 + $0x3e] ss:$2 sm:$0xff] }
 0x334   :  { %v3210_v48 = vld [vmem:[#allocation3 + $0x3f] ss:$2 sm:$0xff] }
 0x335   :  { %v2765_v6 = vld [vmem:[#allocation2 + $0xe6] ss:$2 sm:$0x7]  ;;  %v2781_v7 = vld [vmem:[#allocation2 + $0xe7] ss:$2 sm:$0x7]  ;;  %5998 = vmatprep.mubr.msk.bf16.mxu0 %vm118_vm0, %v2813_v5 }
 0x336   :  { %v2789_v8 = vmax.f32 %v2765_v6, %v2781_v7  ;;  %v6394_v60 = vld [vmem:[#allocation6 + $0x24] ss:$8 sps:$4 sm:$0xff]   ;;  %v6397_v28 = vld [vmem:[#allocation6 + $0x34] ss:$8 sps:$4 sm:$0xff]   ;;  %v6395_v62 = vld [vmem:[#allocation6 + $0x30] ss:$8 sps:$4 sm:$0xff]  }
 0x337   :  { %v6400_v63 = vld [vmem:[#allocation6 + $0x44] ss:$8 sps:$4 sm:$0xff]  }
 0x338   :  { %2797 = vst.msk [vmem:[#allocation3 + $0x73] sm:$0x7] %vm1155_vm2, %v2789_v8  ;;  %v2763_v9 = vld [vmem:[#allocation2 + $0xd6] ss:$2 sm:$0xff]  ;;  %v2779_v10 = vld [vmem:[#allocation2 + $0xd7] ss:$2 sm:$0xff] }
 0x339   :  { %v2788_v12 = vmax.f32 %v2763_v9, %v2779_v10 }
 0x33a   :  { %v2810_v14 = vld [vmem:[#allocation3 + $0x5b] ss:$2 sm:$0xff]  ;;  %v2911_v31 = vld [vmem:[#allocation3 + $0x5c] ss:$2 sm:$0xff] }
 0x33b   :  { %2796 = vst.msk [vmem:[#allocation3 + $0x6b] sm:$0xff] %vm118_vm0, %v2788_v12  ;;  %v3010_v30 = vld [vmem:[#allocation3 + $0x4d] ss:$2 sm:$0xff]  ;;  %v3111_v38 = vld [vmem:[#allocation3 + $0x4e] ss:$2 sm:$0xff] }
 0x33c   :  { %v3015_v33 = vpack.c.bf16 %v3010_v30, %v3008_v32  ;;  %v3116_v42 = vpack.c.bf16 %v3111_v38, %v3109_v40  ;;  %v3212_v47 = vld [vmem:[#allocation3 + $0x4f] ss:$2 sm:$0xff]  ;;  %v6407_v32 = vld [vmem:[#allocation6 + $0x70] ss:$8 sps:$4 sm:$0xff]  }
 0x33d   :  { %v3217_v49 = vpack.c.bf16 %v3212_v47, %v3210_v48  ;;  %v6406_v30 = vld [vmem:[#allocation6 + $0x64] ss:$8 sps:$4 sm:$0xff]   ;;  %v6416_v38 = vld [vmem:[#allocation6 + $0xa0] ss:$8 sps:$4 sm:$0xff]   ;;  %v6419_v40 = vld [vmem:[#allocation6 + $0xb0] ss:$8 sps:$4 sm:$0xff]  }
 0x33e   :  { %v6428_v47 = vld [vmem:[#allocation6 + $0xe0] ss:$8 sps:$4 sm:$0xff]   ;;  %v6431_v48 = vld [vmem:[#allocation6 + $0xf0] ss:$8 sps:$4 sm:$0xff]  }
 0x342   :  { %v2812_v15 = vld [vmem:[#allocation3 + $0x6b] ss:$2 sm:$0xf]  ;;  %v3113_v45 = vld [vmem:[#allocation3 + $0x5e] ss:$2 sm:$0xff] }
 0x343   :  { %v2814_v16 = vpack.c.bf16 %v2812_v15, %v2810_v14  ;;  %v3012_v36 = vld [vmem:[#allocation3 + $0x5d] ss:$2 sm:$0xff]  ;;  %v3014_v37 = vld [vmem:[#allocation3 + $0x6d] ss:$2 sm:$0xf] }
 0x344   :  { %v3016_v39 = vpack.c.bf16 %v3014_v37, %v3012_v36  ;;  %v3115_v46 = vld [vmem:[#allocation3 + $0x6e] ss:$2 sm:$0xf]  ;;  %v3214_v52 = vld [vmem:[#allocation3 + $0x5f] ss:$2 sm:$0xff] }
 0x345   :  { %5999 = vmatmul.mubr.msk.bf16.vlgmr.msra.gmra.mrb[16].mxu0 %vm118_vm0, %v2814_v16  ;;  %v3117_v25 = vpack.c.bf16 %v3115_v46, %v3113_v45  ;;  %v3216_v53 = vld [vmem:[#allocation3 + $0x6f] ss:$2 sm:$0xf]  ;;  %v6413_v36 = vld [vmem:[#allocation6 + $0x90] ss:$8 sps:$4 sm:$0xff]  }
 0x346   :  { %6003 = vmatpush3.bf16.msra.mxu0 %v7487_v0  ;;  %6010 = vmatprep.mubr.msk.bf16.mxu0 %vm118_vm0, %v2914_v19  ;;  %v2913_v0 = vld [vmem:[#allocation3 + $0x6c] ss:$2 sm:$0xf]  ;;  %v3218_v54 = vpack.c.bf16 %v3216_v53, %v3214_v52  ;;  %v6418_v37 = vld [vmem:[#allocation6 + $0xa4] ss:$8 sps:$4 sm:$0xff]  }
 0x347   :  { %6004 = vmatprep.subr.bf16.mxu0 %v6371_v18  ;;  %v2915_v21 = vpack.c.bf16 %v2913_v0, %v2911_v31  ;;  %v6401_v0 = vld [vmem:[#allocation6 + $0x50] ss:$8 sps:$4 sm:$0xff]   ;;  %v6404_v31 = vld [vmem:[#allocation6 + $0x60] ss:$8 sps:$4 sm:$0xff]   ;;  %v6430_v46 = vld [vmem:[#allocation6 + $0xe4] ss:$8 sps:$4 sm:$0xff]  }
 0x348   :  { %v6425_v45 = vld [vmem:[#allocation6 + $0xd0] ss:$8 sps:$4 sm:$0xff]   ;;  %v6439_v52 = vld [vmem:[#allocation6 + $0x114] ss:$8 sps:$4 sm:$0xff]  }
 0x349   :  { %v6437_v53 = vld [vmem:[#allocation6 + $0x110] ss:$8 sps:$4 sm:$0xff]  }
 0x34a   :  { %6005 = vmatpush3.bf16.msra.mxu0 %v6371_v18 }
 0x34b   :  { %6006 = vmatprep.subr.bf16.mxu0 %v6372_v20 }
 0x34e   :  { %6007 = vmatpush3.bf16.msra.mxu0 %v6372_v20 }
 0x34f   :  { %6008 = vmatprep.subr.bf16.mxu0 %v6373_v26 }
 0x352   :  { %6009 = vmatpush3.bf16.msra.mxu0 %v6373_v26 }
 0x353   :  { %6014 = vmatprep.subr.bf16.mxu0 %v6374_v29 }
 0x355   :  { %6011 = vmatmul.mubr.msk.bf16.vlgmr.msra.gmra.mrb[16].mxu0 %vm118_vm0, %v2915_v21  ;;  %v6409_v21 = vld [vmem:[#allocation6 + $0x74] ss:$8 sps:$4 sm:$0xff]  }
 0x356   :  { %6015 = vmatpush3.bf16.msra.mxu0 %v6374_v29  ;;  %6022 = vmatprep.mubr.msk.bf16.mxu0 %vm118_vm0, %v3015_v33  ;;  %v6403_v29 = vld [vmem:[#allocation6 + $0x54] ss:$8 sps:$4 sm:$0xff]  }
 0x357   :  { %6016 = vmatprep.subr.bf16.mxu0 %v6375_v22 }
 0x35a   :  { %6017 = vmatpush3.bf16.msra.mxu0 %v6375_v22  ;;  %v6412_v22 = vld [vmem:[#allocation6 + $0x84] ss:$8 sps:$4 sm:$0xff]  }
 0x35b   :  { %6018 = vmatprep.subr.bf16.mxu0 %v6376_v23 }
 0x35e   :  { %6019 = vmatpush3.bf16.msra.mxu0 %v6376_v23  ;;  %v6410_v23 = vld [vmem:[#allocation6 + $0x80] ss:$8 sps:$4 sm:$0xff]  }
 0x35f   :  { %6020 = vmatprep.subr.bf16.mxu0 %v6377_v34 }
 0x362   :  { %6021 = vmatpush3.bf16.msra.mxu0 %v6377_v34 }
 0x363   :  { %6026 = vmatprep.subr.bf16.mxu0 %v6378_v35 }
 0x365   :  { %6023 = vmatmul.mubr.msk.bf16.vlgmr.msra.gmra.mrb[16].mxu0 %vm118_vm0, %v3016_v39  ;;  %v6421_v39 = vld [vmem:[#allocation6 + $0xb4] ss:$8 sps:$4 sm:$0xff]  }
 0x366   :  { %6027 = vmatpush3.bf16.msra.mxu0 %v6378_v35  ;;  %6034 = vmatprep.mubr.msk.bf16.mxu0 %vm118_vm0, %v3116_v42  ;;  %v6415_v35 = vld [vmem:[#allocation6 + $0x94] ss:$8 sps:$4 sm:$0xff]  }
 0x367   :  { %6028 = vmatprep.subr.bf16.mxu0 %v6379_v41 }
 0x36a   :  { %6029 = vmatpush3.bf16.msra.mxu0 %v6379_v41  ;;  %v6424_v41 = vld [vmem:[#allocation6 + $0xc4] ss:$8 sps:$4 sm:$0xff]  }
 0x36b   :  { %6030 = vmatprep.subr.bf16.mxu0 %v6380_v43 }
 0x36e   :  { %6031 = vmatpush3.bf16.msra.mxu0 %v6380_v43  ;;  %v6422_v43 = vld [vmem:[#allocation6 + $0xc0] ss:$8 sps:$4 sm:$0xff]  }
 0x36f   :  { %6032 = vmatprep.subr.bf16.mxu0 %v6381_v44 }
 0x372   :  { %6033 = vmatpush3.bf16.msra.mxu0 %v6381_v44 }
 0x373   :  { %6038 = vmatprep.subr.bf16.mxu0 %v6382_v24 }
 0x375   :  { %6035 = vmatmul.mubr.msk.bf16.vlgmr.msra.gmra.mrb[16].mxu0 %vm118_vm0, %v3117_v25  ;;  %v6433_v25 = vld [vmem:[#allocation6 + $0xf4] ss:$8 sps:$4 sm:$0xff]  }
 0x376   :  { %6039 = vmatpush3.bf16.msra.mxu0 %v6382_v24  ;;  %6046 = vmatprep.mubr.msk.bf16.mxu0 %vm118_vm0, %v3217_v49  ;;  %v6427_v24 = vld [vmem:[#allocation6 + $0xd4] ss:$8 sps:$4 sm:$0xff]  }
 0x377   :  { %6040 = vmatprep.subr.bf16.mxu0 %v6383_v27 }
 0x37a   :  { %6041 = vmatpush3.bf16.msra.mxu0 %v6383_v27  ;;  %v6436_v27 = vld [vmem:[#allocation6 + $0x104] ss:$8 sps:$4 sm:$0xff]  }
 0x37b   :  { %6042 = vmatprep.subr.bf16.mxu0 %v6384_v50 }
 0x37e   :  { %6043 = vmatpush3.bf16.msra.mxu0 %v6384_v50  ;;  %v6434_v50 = vld [vmem:[#allocation6 + $0x100] ss:$8 sps:$4 sm:$0xff]  }
 0x37f   :  { %6044 = vmatprep.subr.bf16.mxu0 %v6385_v51 }
 0x382   :  { %6045 = vmatpush3.bf16.msra.mxu0 %v6385_v51 }
 0x383   :  { %3395 = vmatprep.subr.bf16.mxu0 %v6388_v55  ;;  %v6440_v55 = vld [vmem:[#allocation6 + $0x120] ss:$8 sps:$4 sm:$0xff]  }
 0x385   :  { %6047 = vmatmul.mubr.msk.bf16.vlgmr.msra.gmra.mrb[16].mxu0 %vm118_vm0, %v3218_v54  ;;  %v6442_v54 = vld [vmem:[#allocation6 + $0x124] ss:$8 sps:$4 sm:$0xff]  }
 0x386   :  { %3396 = vmatpush1.bf16.msra.mxu0 %v6386_v56  ;;  %3427 = vmatprep.mubr.bf16.mxu0 %v6623_v61  ;;  %v6445_v56 = vld [vmem:[#allocation6 + $0x134] ss:$8 sps:$4 sm:$0xff]  }
 0x387   :  { %3397 = vmatprep.subr.bf16.mxu0 %v6391_v57  ;;  %v6443_v57 = vld [vmem:[#allocation6 + $0x130] ss:$8 sps:$4 sm:$0xff]  }
 0x38a   :  { %3398 = vmatpush1.bf16.msra.mxu0 %v6389_v58  ;;  %v6448_v58 = vld [vmem:[#allocation6 + $0x144] ss:$8 sps:$4 sm:$0xff]  }
 0x38b   :  { %3399 = vmatprep.subr.bf16.mxu0 %v6394_v60  ;;  %v6446_v60 = vld [vmem:[#allocation6 + $0x140] ss:$8 sps:$4 sm:$0xff]  }
 0x38e   :  { %3400 = vmatpush1.bf16.msra.mxu0 %v6392_v59 }
 0x38f   :  { %3401 = vmatprep.subr.bf16.mxu0 %v6397_v28 }
 0x392   :  { %3402 = vmatpush1.bf16.msra.mxu0 %v6395_v62  ;;  %v6451_v62 = vld [vmem:[#allocation6 + $0x154] ss:$8 sps:$4 sm:$0xff]  }
 0x393   :  { %3493 = vmatprep.subr.bf16.mxu0 %v6400_v63  ;;  %v6449_v63 = vld [vmem:[#allocation6 + $0x150] ss:$8 sps:$4 sm:$0xff]  }
 0x458   :  { %v6048_v1 = vpop.f32.mrb[16].mxu0 }
 0x459   :  { %v6099_v2 = vadd.f32 %v6048_v1, %v7493_v11  ;;  %v3291_v3 = vpop.f32.mrb[17].mxu0  ;;  %v6454_v1 = vld [vmem:[#allocation6 + $0x164] ss:$8 sps:$4 sm:$0xff]  }
 0x45a   :  { %v6100_v4 = vadd.f32 %v7493_v11, %v3291_v3  ;;  %v6049_v5 = vpop.f32.mrb[18].mxu0  ;;  %v6457_v3 = vld [vmem:[#allocation6 + $0x174] ss:$8 sps:$4 sm:$0xff]  }
 0x45b   :  { %v3312_v6 = vmax.f32 %v6099_v2, 0.0  ;;  %v6101_v7 = vadd.f32 %v6049_v5, %v7493_v11  ;;  %v3294_v8 = vpop.f32.mrb[19].mxu0  ;;  %v6452_v2 = vld [vmem:[#allocation6 + $0x160] ss:$8 sps:$4 sm:$0xff]   ;;  %v6460_v5 = vld [vmem:[#allocation6 + $0x184] ss:$8 sps:$4 sm:$0xff]  }
 0x45c   :  { %v3310_v9 = vmax.f32 %v6100_v4, 0.0  ;;  %v6102_v10 = vadd.f32 %v7493_v11, %v3294_v8  ;;  %v6398_v11 = vld [vmem:[#allocation6 + $0x40] ss:$8 sps:$4 sm:$0xff]   ;;  %v6455_v4 = vld [vmem:[#allocation6 + $0x170] ss:$8 sps:$4 sm:$0xff]  }
 0x45d   :  { %3316 = vst.msk [vmem:[#allocation4 + $0x2c] sm:$0xff] %vm118_vm0, %v3312_v6  ;;  %v3313_v12 = vmax.f32 %v6101_v7, 0.0  ;;  %v6458_v7 = vld [vmem:[#allocation6 + $0x180] ss:$8 sps:$4 sm:$0xff]  }
 0x45e   :  { %3314 = vst.msk [vmem:[#allocation4 + $0x1c] sm:$0xff] %vm118_vm0, %v3310_v9  ;;  %v3311_v13 = vmax.f32 %v6102_v10, 0.0  ;;  %v6463_v9 = vld [vmem:[#allocation6 + $0x194] ss:$8 sps:$4 sm:$0xff]   ;;  %v6554_v10 = vld [vmem:[%s7709_s5] sm:$0xff]  }
 0x45f   :  { %3317 = vst.msk [vmem:[#allocation4 + $0x34] sm:$0xf] %vm1675_vm3, %v3313_v12  ;;  %v6461_v12 = vld [vmem:[#allocation6 + $0x190] ss:$8 sps:$4 sm:$0xff]   ;;  %4840 = vmatpush1.bf16.msra.mxu1 %v6554_v10  ;;  %v6526_v10 = vld [vmem:[#allocation6 + $0x2e4] ss:$8 sps:$4 sm:$0xff]  }
 0x460   :  { %3315 = vst.msk [vmem:[#allocation4 + $0x24] sm:$0xff] %vm118_vm0, %v3311_v13  ;;  %v6466_v13 = vld [vmem:[#allocation6 + $0x1a4] ss:$8 sps:$4 sm:$0xff]   ;;  %4841 = vmatprep.subr.bf16.mxu1 %v6623_v61 }
 0x466   :  { %v3321_v14 = vld [vmem:[#allocation4 + $0x2c] ss:$2 sm:$0x3f]  ;;  %v3325_v15 = vld [vmem:[#allocation4 + $0x2d] ss:$2 sm:$0x3f] }
 0x467   :  { %v3327_v16 = vmax.f32 %v3321_v14, %v3325_v15  ;;  %v3319_v17 = vld [vmem:[#allocation4 + $0x1c] ss:$2 sm:$0xff]  ;;  %v3323_v18 = vld [vmem:[#allocation4 + $0x1d] ss:$2 sm:$0xff] }
 0x468   :  { %v3326_v19 = vmax.f32 %v3319_v17, %v3323_v18  ;;  %v6555_v14 = vld [vmem:[%s7709_s5 + $0x8] sm:$0xff]   ;;  %v6556_v17 = vld [vmem:[%s7709_s5 + $0x10] sm:$0xff]  }
 0x469   :  { %3329 = vst.msk [vmem:[#allocation5 + $0x16] sm:$0x3f] %vm1107_vm1, %v3327_v16  ;;  %v6464_v15 = vld [vmem:[#allocation6 + $0x1a0] ss:$8 sps:$4 sm:$0xff]   ;;  %v6469_v16 = vld [vmem:[#allocation6 + $0x1b4] ss:$8 sps:$4 sm:$0xff]   ;;  %4842 = vmatpush1.bf16.msra.mxu1 %v6555_v14 }
 0x46a   :  { %3328 = vst.msk [vmem:[#allocation5 + $0xe] sm:$0xff] %vm118_vm0, %v3326_v19  ;;  %4843 = vmatprep.subr.bf16.mxu1 %v6623_v61  ;;  %v6467_v18 = vld [vmem:[#allocation6 + $0x1b0] ss:$8 sps:$4 sm:$0xff]   ;;  %v6472_v19 = vld [vmem:[#allocation6 + $0x1c4] ss:$8 sps:$4 sm:$0xff]  }
 0x46b   :  { %v6527_v14 = vld [vmem:[#allocation6 + $0x2f0] ss:$8 sps:$4 sm:$0xff]  }
 0x46d   :  { %4844 = vmatpush1.bf16.msra.mxu1 %v6556_v17  ;;  %v6530_v17 = vld [vmem:[#allocation6 + $0x300] ss:$8 sps:$4 sm:$0xff]  }
 0x46e   :  { %4845 = vmatprep.subr.bf16.mxu1 %v6623_v61 }
 0x471   :  { %v3342_v20 = vld [vmem:[#allocation5] ss:$14 sm:$0x3]  ;;  %v3439_v33 = vld [vmem:[#allocation5 + $0x1] ss:$14 sm:$0x3] }
 0x472   :  { %v3343_v26 = vpack.c.bf16 %v3342_v20, %v3342_v20  ;;  %v3440_v34 = vpack.c.bf16 %v3439_v33, %v3439_v33  ;;  %v3537_v42 = vld [vmem:[#allocation5 + $0x2] ss:$14 sm:$0x3]  ;;  %v3635_v49 = vld [vmem:[#allocation5 + $0x3] ss:$14 sm:$0x3] }
 0x473   :  { %v3538_v44 = vpack.c.bf16 %v3537_v42, %v3537_v42  ;;  %v3636_v51 = vpack.c.bf16 %v3635_v49, %v3635_v49  ;;  %v3733_v59 = vld [vmem:[#allocation5 + $0x4] ss:$14 sm:$0x3]  ;;  %v3831_v6 = vld [vmem:[#allocation5 + $0x5] ss:$14 sm:$0x3] }
 0x474   :  { %5376 = vmatmul.mubr.msk.bf16.vlgmr.msra.gmra.mrb[20].mxu0 %vm118_vm0, %v3343_v26  ;;  %v3734_v28 = vpack.c.bf16 %v3733_v59, %v3733_v59  ;;  %v3832_v8 = vpack.c.bf16 %v3831_v6, %v3831_v6  ;;  %v3929_v20 = vld [vmem:[#allocation5 + $0x6] ss:$14 sm:$0x3]  ;;  %v6470_v26 = vld [vmem:[#allocation6 + $0x1c0] ss:$8 sps:$4 sm:$0xff]  }
 0x475   :  { %3494 = vmatpush1.bf16.msra.mxu0 %v6398_v11  ;;  %3525 = vmatprep.mubr.bf16.mxu0 %v6623_v61  ;;  %v6557_v11 = vld [vmem:[%s7709_s5 + $0x18] sm:$0xff]   ;;  %v6494_v49 = vld [vmem:[#allocation6 + $0x240] ss:$8 sps:$4 sm:$0xff]  }
 0x476   :  { %3495 = vmatprep.subr.bf16.mxu0 %v6403_v29  ;;  %v3930_v29 = vpack.c.bf16 %v3929_v20, %v3929_v20  ;;  %4846 = vmatpush1.bf16.msra.mxu1 %v6557_v11  ;;  %v6481_v33 = vld [vmem:[#allocation6 + $0x1f4] ss:$8 sps:$4 sm:$0xff]   ;;  %v6485_v42 = vld [vmem:[#allocation6 + $0x210] ss:$8 sps:$4 sm:$0xff]   ;;  %v6506_v59 = vld [vmem:[#allocation6 + $0x280] ss:$8 sps:$4 sm:$0xff]  }
 0x477   :  { %4847 = vmatprep.subr.bf16.mxu1 %v6623_v61  ;;  %v6518_v6 = vld [vmem:[#allocation6 + $0x2c0] ss:$8 sps:$4 sm:$0xff]   ;;  %v6533_v11 = vld [vmem:[#allocation6 + $0x310] ss:$8 sps:$4 sm:$0xff]   ;;  %v6538_v20 = vld [vmem:[#allocation6 + $0x324] ss:$8 sps:$4 sm:$0xff]  }
 0x479   :  { %3496 = vmatpush1.bf16.msra.mxu0 %v6401_v0  ;;  %v6475_v0 = vld [vmem:[#allocation6 + $0x1d4] ss:$8 sps:$4 sm:$0xff]  }
 0x47a   :  { %3497 = vmatprep.subr.bf16.mxu0 %v6406_v30  ;;  %v6558_v30 = vld [vmem:[%s7709_s5 + $0x20] sm:$0xff]  }
 0x47b   :  { %4848 = vmatpush1.bf16.msra.mxu1 %v6558_v30  ;;  %v6544_v30 = vld [vmem:[#allocation6 + $0x344] ss:$8 sps:$4 sm:$0xff]  }
 0x47c   :  { %4849 = vmatprep.subr.bf16.mxu1 %v6623_v61 }
 0x47d   :  { %3498 = vmatpush1.bf16.msra.mxu0 %v6404_v31  ;;  %v6473_v31 = vld [vmem:[#allocation6 + $0x1d0] ss:$8 sps:$4 sm:$0xff]  }
 0x47e   :  { %3499 = vmatprep.subr.bf16.mxu0 %v6409_v21  ;;  %v6478_v21 = vld [vmem:[#allocation6 + $0x1e4] ss:$8 sps:$4 sm:$0xff]  }
 0x481   :  { %3500 = vmatpush1.bf16.msra.mxu0 %v6407_v32  ;;  %v6559_v32 = vld [vmem:[%s7709_s5 + $0x28] sm:$0xff]  }
 0x482   :  { %3591 = vmatprep.subr.bf16.mxu0 %v6412_v22  ;;  %v6476_v22 = vld [vmem:[#allocation6 + $0x1e0] ss:$8 sps:$4 sm:$0xff]   ;;  %4850 = vmatpush1.bf16.msra.mxu1 %v6559_v32 }
 0x483   :  { %4851 = vmatprep.subr.bf16.mxu1 %v6623_v61 }
 0x484   :  { %5385 = vmatmul.mubr.msk.bf16.vlgmr.msra.gmra.mrb[20].mxu0 %vm118_vm0, %v3440_v34  ;;  %v6479_v34 = vld [vmem:[#allocation6 + $0x1f0] ss:$8 sps:$4 sm:$0xff]  }
 0x485   :  { %3592 = vmatpush1.bf16.msra.mxu0 %v6410_v23  ;;  %3623 = vmatprep.mubr.bf16.mxu0 %v6623_v61  ;;  %v6560_v23 = vld [vmem:[%s7709_s5 + $0x30] sm:$0xff]  }
 0x486   :  { %3593 = vmatprep.subr.bf16.mxu0 %v6415_v35  ;;  %v6484_v35 = vld [vmem:[#allocation6 + $0x204] ss:$8 sps:$4 sm:$0xff]   ;;  %4852 = vmatpush1.bf16.msra.mxu1 %v6560_v23 }
 0x487   :  { %4853 = vmatprep.subr.bf16.mxu1 %v6623_v61  ;;  %v6550_v23 = vld [vmem:[#allocation6 + $0x364] ss:$8 sps:$4 sm:$0xff]  }
 0x489   :  { %3594 = vmatpush1.bf16.msra.mxu0 %v6413_v36  ;;  %v6561_v36 = vld [vmem:[%s7709_s5 + $0x38] sm:$0xff]  }
 0x48a   :  { %3595 = vmatprep.subr.bf16.mxu0 %v6418_v37  ;;  %v4027_v37 = vld [vmem:[#allocation5 + $0x7] ss:$14 sm:$0x3]  ;;  %4854 = vmatpush1.bf16.msra.mxu1 %v6561_v36  ;;  %v6551_v36 = vld [vmem:[#allocation6 + $0x370] ss:$8 sps:$4 sm:$0xff]  }
 0x48b   :  { %4855 = vmatprep.subr.bf16.mxu1 %v6623_v61 }
 0x48d   :  { %3596 = vmatpush1.bf16.msra.mxu0 %v6416_v38  ;;  %v6482_v38 = vld [vmem:[#allocation6 + $0x200] ss:$8 sps:$4 sm:$0xff]  }
 0x48e   :  { %3597 = vmatprep.subr.bf16.mxu0 %v6421_v39  ;;  %v4028_v39 = vpack.c.bf16 %v4027_v37, %v4027_v37  ;;  %v4615_v37 = vld [vmem:[#allocation5 + $0xd] ss:$14 sm:$0x3] }
 0x491   :  { %3598 = vmatpush1.bf16.msra.mxu0 %v6419_v40  ;;  %v6487_v40 = vld [vmem:[#allocation6 + $0x214] ss:$8 sps:$4 sm:$0xff]  }
 0x492   :  { %3689 = vmatprep.subr.bf16.mxu0 %v6424_v41  ;;  %v6562_v41 = vld [vmem:[%s7709_s5 + $0x40] sm:$0xff]  }
 0x493   :  { %4856 = vmatpush1.bf16.msra.mxu1 %v6562_v41  ;;  %v3332_v41 = vlaneseq }
 0x494   :  { %5394 = vmatmul.mubr.msk.bf16.vlgmr.msra.gmra.mrb[20].mxu0 %vm118_vm0, %v3538_v44  ;;  %v6563_v44 = vld [vmem:[%s7709_s5 + $0x48] sm:$0xff]   ;;  %4857 = vmatprep.subr.bf16.mxu1 %v6623_v61 }
 0x495   :  { %3690 = vmatpush1.bf16.msra.mxu0 %v6422_v43  ;;  %3721 = vmatprep.mubr.bf16.mxu0 %v6623_v61  ;;  %v6490_v43 = vld [vmem:[#allocation6 + $0x224] ss:$8 sps:$4 sm:$0xff]  }
 0x496   :  { %3691 = vmatprep.subr.bf16.mxu0 %v6427_v24  ;;  %v6488_v24 = vld [vmem:[#allocation6 + $0x220] ss:$8 sps:$4 sm:$0xff]  }
 0x497   :  { %4858 = vmatpush1.bf16.msra.mxu1 %v6563_v44  ;;  %v3330_v44 = vld [vmem:[%s7708_s4] sm:$0x3]  ;;  %s6624_s4 = smov [#allocation9]  }
 0x498   :  { %4859 = vmatprep.subr.bf16.mxu1 %v6623_v61 }
 0x499   :  { %3692 = vmatpush1.bf16.msra.mxu0 %v6425_v45  ;;  %v6493_v45 = vld [vmem:[#allocation6 + $0x234] ss:$8 sps:$4 sm:$0xff]  }
 0x49a   :  { %3693 = vmatprep.subr.bf16.mxu0 %v6430_v46  ;;  %v6564_v46 = vld [vmem:[%s7709_s5 + $0x50] sm:$0xff]  }
 0x49b   :  { %4860 = vmatpush1.bf16.msra.mxu1 %v6564_v46 }
 0x49c   :  { %4861 = vmatprep.subr.bf16.mxu1 %v6623_v61 }
 0x49d   :  { %3694 = vmatpush1.bf16.msra.mxu0 %v6428_v47  ;;  %v6491_v47 = vld [vmem:[#allocation6 + $0x230] ss:$8 sps:$4 sm:$0xff]  }
 0x49e   :  { %3695 = vmatprep.subr.bf16.mxu0 %v6433_v25  ;;  %v6496_v25 = vld [vmem:[#allocation6 + $0x244] ss:$8 sps:$4 sm:$0xff]  }
 0x4a1   :  { %3696 = vmatpush1.bf16.msra.mxu0 %v6431_v48  ;;  %v6565_v48 = vld [vmem:[%s7709_s5 + $0x58] sm:$0xff]  }
 0x4a2   :  { %3787 = vmatprep.subr.bf16.mxu0 %v6436_v27  ;;  %v4125_v27 = vld [vmem:[#allocation5 + $0x8] ss:$14 sm:$0x3]  ;;  %4862 = vmatpush1.bf16.msra.mxu1 %v6565_v48 }
 0x4a3   :  { %4863 = vmatprep.subr.bf16.mxu1 %v6623_v61 }
 0x4a4   :  { %5403 = vmatmul.mubr.msk.bf16.vlgmr.msra.gmra.mrb[20].mxu0 %vm118_vm0, %v3636_v51  ;;  %v6499_v51 = vld [vmem:[#allocation6 + $0x254] ss:$8 sps:$4 sm:$0xff]  }
 0x4a5   :  { %3788 = vmatpush1.bf16.msra.mxu0 %v6434_v50  ;;  %3819 = vmatprep.mubr.bf16.mxu0 %v6623_v61  ;;  %v4126_v50 = vpack.c.bf16 %v4125_v27, %v4125_v27 }
 0x4a6   :  { %3789 = vmatprep.subr.bf16.mxu0 %v6439_v52  ;;  %v6497_v52 = vld [vmem:[#allocation6 + $0x250] ss:$8 sps:$4 sm:$0xff]  }
 0x4a9   :  { %3790 = vmatpush1.bf16.msra.mxu0 %v6437_v53  ;;  %v6502_v53 = vld [vmem:[#allocation6 + $0x264] ss:$8 sps:$4 sm:$0xff]  }
 0x4aa   :  { %3791 = vmatprep.subr.bf16.mxu0 %v6442_v54  ;;  %v6500_v54 = vld [vmem:[#allocation6 + $0x260] ss:$8 sps:$4 sm:$0xff]  }
 0x4ad   :  { %3792 = vmatpush1.bf16.msra.mxu0 %v6440_v55  ;;  %v6505_v55 = vld [vmem:[#allocation6 + $0x274] ss:$8 sps:$4 sm:$0xff]  }
 0x4ae   :  { %3793 = vmatprep.subr.bf16.mxu0 %v6445_v56  ;;  %v6503_v56 = vld [vmem:[#allocation6 + $0x270] ss:$8 sps:$4 sm:$0xff]  }
 0x4b1   :  { %3794 = vmatpush1.bf16.msra.mxu0 %v6443_v57  ;;  %v6508_v57 = vld [vmem:[#allocation6 + $0x284] ss:$8 sps:$4 sm:$0xff]  }
 0x4b2   :  { %3885 = vmatprep.subr.bf16.mxu0 %v6448_v58  ;;  %v4223_v58 = vld [vmem:[#allocation5 + $0x9] ss:$14 sm:$0x3] }
 0x4b4   :  { %5412 = vmatmul.mubr.msk.bf16.vlgmr.msra.gmra.mrb[20].mxu0 %vm118_vm0, %v3734_v28  ;;  %v6511_v28 = vld [vmem:[#allocation6 + $0x294] ss:$8 sps:$4 sm:$0xff]  }
 0x4b5   :  { %3886 = vmatpush1.bf16.msra.mxu0 %v6446_v60  ;;  %3917 = vmatprep.mubr.bf16.mxu0 %v6623_v61  ;;  %v4224_v60 = vpack.c.bf16 %v4223_v58, %v4223_v58 }
 0x4b6   :  { %3887 = vmatprep.subr.bf16.mxu0 %v6451_v62  ;;  %v6509_v62 = vld [vmem:[#allocation6 + $0x290] ss:$8 sps:$4 sm:$0xff]  }
 0x4b9   :  { %3888 = vmatpush1.bf16.msra.mxu0 %v6449_v63  ;;  %v6514_v63 = vld [vmem:[#allocation6 + $0x2a4] ss:$8 sps:$4 sm:$0xff]  }
 0x4ba   :  { %3889 = vmatprep.subr.bf16.mxu0 %v6454_v1  ;;  %v6512_v1 = vld [vmem:[#allocation6 + $0x2a0] ss:$8 sps:$4 sm:$0xff]  }
 0x4bd   :  { %3890 = vmatpush1.bf16.msra.mxu0 %v6452_v2  ;;  %v6517_v2 = vld [vmem:[#allocation6 + $0x2b4] ss:$8 sps:$4 sm:$0xff]  }
 0x4be   :  { %3891 = vmatprep.subr.bf16.mxu0 %v6457_v3  ;;  %v6515_v3 = vld [vmem:[#allocation6 + $0x2b0] ss:$8 sps:$4 sm:$0xff]  }
 0x4c1   :  { %3892 = vmatpush1.bf16.msra.mxu0 %v6455_v4  ;;  %v6520_v4 = vld [vmem:[#allocation6 + $0x2c4] ss:$8 sps:$4 sm:$0xff]  }
 0x4c2   :  { %3983 = vmatprep.subr.bf16.mxu0 %v6460_v5  ;;  %v4321_v5 = vld [vmem:[#allocation5 + $0xa] ss:$14 sm:$0x3] }
 0x4c4   :  { %5421 = vmatmul.mubr.msk.bf16.vlgmr.msra.gmra.mrb[20].mxu0 %vm118_vm0, %v3832_v8  ;;  %v6523_v8 = vld [vmem:[#allocation6 + $0x2d4] ss:$8 sps:$4 sm:$0xff]  }
 0x4c5   :  { %3984 = vmatpush1.bf16.msra.mxu0 %v6458_v7  ;;  %4015 = vmatprep.mubr.bf16.mxu0 %v6623_v61  ;;  %v4322_v7 = vpack.c.bf16 %v4321_v5, %v4321_v5 }
 0x4c6   :  { %3985 = vmatprep.subr.bf16.mxu0 %v6463_v9  ;;  %v6521_v9 = vld [vmem:[#allocation6 + $0x2d0] ss:$8 sps:$4 sm:$0xff]  }
 0x4c9   :  { %3986 = vmatpush1.bf16.msra.mxu0 %v6461_v12  ;;  %v6524_v12 = vld [vmem:[#allocation6 + $0x2e0] ss:$8 sps:$4 sm:$0xff]  }
 0x4ca   :  { %3987 = vmatprep.subr.bf16.mxu0 %v6466_v13  ;;  %v6529_v13 = vld [vmem:[#allocation6 + $0x2f4] ss:$8 sps:$4 sm:$0xff]  }
 0x4cd   :  { %3988 = vmatpush1.bf16.msra.mxu0 %v6464_v15  ;;  %v6532_v15 = vld [vmem:[#allocation6 + $0x304] ss:$8 sps:$4 sm:$0xff]  }
 0x4ce   :  { %3989 = vmatprep.subr.bf16.mxu0 %v6469_v16  ;;  %v4419_v16 = vld [vmem:[#allocation5 + $0xb] ss:$14 sm:$0x3] }
 0x4d1   :  { %3990 = vmatpush1.bf16.msra.mxu0 %v6467_v18  ;;  %v4420_v18 = vpack.c.bf16 %v4419_v16, %v4419_v16 }
 0x4d2   :  { %4081 = vmatprep.subr.bf16.mxu0 %v6472_v19  ;;  %v6535_v19 = vld [vmem:[#allocation6 + $0x314] ss:$8 sps:$4 sm:$0xff]  }
 0x4d4   :  { %5430 = vmatmul.mubr.msk.bf16.vlgmr.msra.gmra.mrb[20].mxu0 %vm118_vm0, %v3930_v29  ;;  %v6541_v29 = vld [vmem:[#allocation6 + $0x334] ss:$8 sps:$4 sm:$0xff]  }
 0x4d5   :  { %4082 = vmatpush1.bf16.msra.mxu0 %v6470_v26  ;;  %4113 = vmatprep.mubr.bf16.mxu0 %v6623_v61  ;;  %v6536_v26 = vld [vmem:[#allocation6 + $0x320] ss:$8 sps:$4 sm:$0xff]  }
 0x4d6   :  { %4083 = vmatprep.subr.bf16.mxu0 %v6475_v0  ;;  %v6539_v0 = vld [vmem:[#allocation6 + $0x330] ss:$8 sps:$4 sm:$0xff]  }
 0x4d9   :  { %4084 = vmatpush1.bf16.msra.mxu0 %v6473_v31  ;;  %v4517_v31 = vld [vmem:[#allocation5 + $0xc] ss:$14 sm:$0x3] }
 0x4da   :  { %4085 = vmatprep.subr.bf16.mxu0 %v6478_v21  ;;  %v6542_v21 = vld [vmem:[#allocation6 + $0x340] ss:$8 sps:$4 sm:$0xff]   ;;  %v4518_v32 = vpack.c.bf16 %v4517_v31, %v4517_v31 }
 0x4dd   :  { %4086 = vmatpush1.bf16.msra.mxu0 %v6476_v22  ;;  %v6547_v22 = vld [vmem:[#allocation6 + $0x354] ss:$8 sps:$4 sm:$0xff]  }
 0x4de   :  { %4087 = vmatprep.subr.bf16.mxu0 %v6481_v33  ;;  %v6545_v33 = vld [vmem:[#allocation6 + $0x350] ss:$8 sps:$4 sm:$0xff]  }
 0x4e1   :  { %4088 = vmatpush1.bf16.msra.mxu0 %v6479_v34  ;;  %v6548_v34 = vld [vmem:[#allocation6 + $0x360] ss:$8 sps:$4 sm:$0xff]  }
 0x4e2   :  { %4179 = vmatprep.subr.bf16.mxu0 %v6484_v35  ;;  %v6553_v35 = vld [vmem:[#allocation6 + $0x374] ss:$8 sps:$4 sm:$0xff]  }
 0x4e4   :  { %5439 = vmatmul.mubr.msk.bf16.vlgmr.msra.gmra.mrb[20].mxu0 %vm118_vm0, %v4028_v39  ;;  %v6566_v39 = vld [vmem:[%s7709_s5 + $0x60] sm:$0xff]  }
 0x4e5   :  { %4180 = vmatpush1.bf16.msra.mxu0 %v6482_v38  ;;  %4211 = vmatprep.mubr.bf16.mxu0 %v6623_v61  ;;  %v4616_v38 = vpack.c.bf16 %v4615_v37, %v4615_v37 }
 0x4e6   :  { %4181 = vmatprep.subr.bf16.mxu0 %v6487_v40  ;;  %4864 = vmatpush1.bf16.msra.mxu1 %v6566_v39  ;;  %v6567_v40 = vld [vmem:[%s7709_s5 + $0x68] sm:$0xff]  }
 0x4e7   :  { %4865 = vmatprep.subr.bf16.mxu1 %v6623_v61 }
 0x4e9   :  { %4182 = vmatpush1.bf16.msra.mxu0 %v6485_v42  ;;  %v3333_v42 = vshrl.u32 %v3332_v41, 7 }
 0x4ea   :  { %4183 = vmatprep.subr.bf16.mxu0 %v6490_v43  ;;  %4866 = vmatpush1.bf16.msra.mxu1 %v6567_v40 }
 0x4eb   :  { %v3334_v43 = vsub.s32 0, %v3333_v42 }
 0x4ed   :  { %4184 = vmatpush1.bf16.msra.mxu0 %v6488_v24  ;;  %v3338_v24 = vsub.s32 1, %v3333_v42 }
 0x4ee   :  { %4185 = vmatprep.subr.bf16.mxu0 %v6493_v45  ;;  %v3335_v45 = vrot.slane %v3330_v44, %v3334_v43 }
 0x4ef   :  { %v3339_v46 = vrot.slane %v3330_v44, %v3338_v24 }
 0x4f1   :  { %4186 = vmatpush1.bf16.msra.mxu0 %v6491_v47 }
 0x4f2   :  { %4277 = vmatprep.subr.bf16.mxu0 %v6496_v25 }
 0x4f4   :  { %5448 = vmatmul.mubr.msk.bf16.vlgmr.msra.gmra.mrb[20].mxu0 %vm118_vm0, %v4126_v50 }
 0x4f5   :  { %4278 = vmatpush1.bf16.msra.mxu0 %v6494_v49  ;;  %4309 = vmatprep.mubr.bf16.mxu0 %v6623_v61 }
 0x4f6   :  { %4279 = vmatprep.subr.bf16.mxu0 %v6499_v51 }
 0x4f9   :  { %4280 = vmatpush1.bf16.msra.mxu0 %v6497_v52 }
 0x4fa   :  { %4281 = vmatprep.subr.bf16.mxu0 %v6502_v53 }
 0x4fd   :  { %4282 = vmatpush1.bf16.msra.mxu0 %v6500_v54  ;;  %v5494_v54 = vld [vmem:[%s7710_s6] ss:$0 sm:$0xff]  ;;  %s4898_s6 = sshll.u32 %s6624_s4, 4  ;;  %s4899_s6 = int_to_ptr.vmem [resolvable:$true] %s4898_s6 }
 0x4fe   :  { %4283 = vmatprep.subr.bf16.mxu0 %v6505_v55  ;;  %s6594_s22 = scalar_lea.vmem %s4899_s6, 32  ;;  %p6599_p9 = scmp.lt.s32.totalorder %s4899_s6, %s4899_s6 }
 0x4ff   :  { %p6595_p8 = scmp.ne.s32.totalorder %s4899_s6, %s6594_s22  ;;  %p6600_p10 = scmp.lt.s32.totalorder %s6594_s22, %s6594_s22 }
 0x501   :  { %4284 = vmatpush1.bf16.msra.mxu0 %v6503_v56  ;;  %p6601_p11 = por %p6600_p10, %p6599_p9 }
 0x502   :  { %4375 = vmatprep.subr.bf16.mxu0 %v6508_v57 }
 0x503   :  { %p6602_p12 = pnand %p6601_p11, %p6595_p8 }
 0x504   :  { %5457 = vmatmul.mubr.msk.bf16.vlgmr.msra.gmra.mrb[20].mxu0 %vm118_vm0, %v4224_v60 }
 0x505   :  { %4376 = vmatpush1.bf16.msra.mxu0 %v6506_v59  ;;  %4407 = vmatprep.mubr.bf16.mxu0 %v6623_v61 }
 0x506   :  { %4377 = vmatprep.subr.bf16.mxu0 %v6511_v28 }
 0x509   :  { %4378 = vmatpush1.bf16.msra.mxu0 %v6509_v62 }
 0x50a   :  { %4379 = vmatprep.subr.bf16.mxu0 %v6514_v63 }
 0x50d   :  { %4380 = vmatpush1.bf16.msra.mxu0 %v6512_v1 }
 0x50e   :  { %4381 = vmatprep.subr.bf16.mxu0 %v6517_v2 }
 0x511   :  { %4382 = vmatpush1.bf16.msra.mxu0 %v6515_v3 }
 0x512   :  { %4473 = vmatprep.subr.bf16.mxu0 %v6520_v4 }
 0x514   :  { %5466 = vmatmul.mubr.msk.bf16.vlgmr.msra.gmra.mrb[20].mxu0 %vm118_vm0, %v4322_v7 }
 0x515   :  { %4474 = vmatpush1.bf16.msra.mxu0 %v6518_v6  ;;  %4505 = vmatprep.mubr.bf16.mxu0 %v6623_v61 }
 0x516   :  { %4475 = vmatprep.subr.bf16.mxu0 %v6523_v8 }
 0x519   :  { %4476 = vmatpush1.bf16.msra.mxu0 %v6521_v9 }
 0x51a   :  { %4477 = vmatprep.subr.bf16.mxu0 %v6526_v10 }
 0x51d   :  { %4478 = vmatpush1.bf16.msra.mxu0 %v6524_v12 }
 0x51e   :  { %4479 = vmatprep.subr.bf16.mxu0 %v6529_v13 }
 0x521   :  { %4480 = vmatpush1.bf16.msra.mxu0 %v6527_v14 }
 0x522   :  { %4571 = vmatprep.subr.bf16.mxu0 %v6532_v15 }
 0x524   :  { %5475 = vmatmul.mubr.msk.bf16.vlgmr.msra.gmra.mrb[20].mxu0 %vm118_vm0, %v4420_v18 }
 0x525   :  { %4572 = vmatpush1.bf16.msra.mxu0 %v6530_v17  ;;  %4603 = vmatprep.mubr.bf16.mxu0 %v6623_v61 }
 0x526   :  { %4573 = vmatprep.subr.bf16.mxu0 %v6535_v19 }
 0x529   :  { %4574 = vmatpush1.bf16.msra.mxu0 %v6533_v11 }
 0x52a   :  { %4575 = vmatprep.subr.bf16.mxu0 %v6538_v20 }
 0x52d   :  { %4576 = vmatpush1.bf16.msra.mxu0 %v6536_v26 }
 0x52e   :  { %4577 = vmatprep.subr.bf16.mxu0 %v6541_v29 }
 0x531   :  { %4578 = vmatpush1.bf16.msra.mxu0 %v6539_v0 }
 0x532   :  { %4669 = vmatprep.subr.bf16.mxu0 %v6544_v30 }
 0x534   :  { %5484 = vmatmul.mubr.msk.bf16.vlgmr.msra.gmra.mrb[20].mxu0 %vm118_vm0, %v4518_v32 }
 0x535   :  { %4670 = vmatpush1.bf16.msra.mxu0 %v6542_v21  ;;  %4701 = vmatprep.mubr.bf16.mxu0 %v6623_v61 }
 0x536   :  { %4671 = vmatprep.subr.bf16.mxu0 %v6547_v22 }
 0x539   :  { %4672 = vmatpush1.bf16.msra.mxu0 %v6545_v33 }
 0x53a   :  { %4673 = vmatprep.subr.bf16.mxu0 %v6550_v23 }
 0x53d   :  { %4674 = vmatpush1.bf16.msra.mxu0 %v6548_v34 }
 0x53e   :  { %4675 = vmatprep.subr.bf16.mxu0 %v6553_v35 }
 0x541   :  { %4676 = vmatpush1.bf16.msra.mxu0 %v6551_v36 }
 0x544   :  { %5493 = vmatmul.mubr.msk.bf16.vlgmr.msra.gmra.mrb[20].mxu0 %vm118_vm0, %v4616_v38 }
 0x617   :  { %v4703_v47 = vpop.f32.mrb[20].mxu0 }
 0x618   :  { %v6103_v25 = vadd.f32 %v4703_v47, %v3335_v45  ;;  %v4705_v48 = vpop.f32.mrb[21].mxu0 }
 0x619   :  { %v6104_v27 = vadd.f32 %v4705_v48, %v3339_v46  ;;  %v4707_v49 = vpop.f32.mrb[22].mxu0 }
 0x61a   :  { %v4712_v50 = vmax.f32 %v6103_v25, 0.0  ;;  %v4708_v51 = vpop.f32.mrb[23].mxu0 }
 0x61b   :  { %v4713_v52 = vmax.f32 %v6104_v27, 0.0 }
 0x61c   :  { %v4714_v53 = vpack.c.bf16 %v4712_v50, %v4712_v50 }
 0x61d   :  { %v4715_v61 = vpack.c.bf16 %v4713_v52, %v4713_v52 }
 0x61f   :  { %5509 = vmatprep.mubr.msk.bf16.mxu1 %vm4835_vm4, %v4715_v61 }
 0x620   :  { %4872 = vmatmul.mubr.bf16.vlgmr.msra.gmra.mrb[36].mxu1 %v4714_v53 }
 0x6f3   :  { %v4873_v55 = vpop.f32.mrb[36].mxu1 }
 0x6f4   :  { %v4874_v56 = vadd.f32 %v5494_v54, %v4873_v55  ;;  %v4875_v57 = vpop.f32.mrb[37].mxu1 }
 0x6f5   :  { %v4876_v58 = vpop.f32.mrb[38].mxu1 }
 0x6f6   :  { %v4877_v59 = vpop.f32.mrb[39].mxu1  ;;  %v4880_v60 = vsel %vm4879_vm5, %v4874_v56, -inf }
 0x6f7   :  { %4881 = vmax.xlane.f32.xlu0 %v4880_v60 }
 0x784   :  { %v4882_v28 = vpop.xlane.xlu0 %4881 }
 0x785   :  { %v4883_v62 = vsub.f32 %v4874_v56, %v4882_v28 }
 0x787   :  { %v4884_v63 = vmul.f32 1.442695, %v4883_v62 }
 0x789   :  { %6568 = vpow2.f32 %v4884_v63 }
 0x793   :  { %v6569_v1 = vpop.eup %6568 }
 0x794   :  { %v4886_v2 = vsel %vm4879_vm5, %v6569_v1, 0.0 }
 0x795   :  { %4887 = vadd.xlane.f32.xlu0 %v4886_v2 }
 0x822   :  { %v4888_v3 = vpop.xlane.xlu0 %4887 }
 0x823   :  { %6570 = vrcp.f32 %v4888_v3 }
 0x82d   :  { %v6571_v4 = vpop.eup %6570 }
 0x82e   :  { %v4890_v5 = vmul.f32 %v6571_v4, %v6569_v1 }
 0x830   :  { %4891 = vst.msk [vmem:[#allocation9] sm:$0x3] %vm4879_vm5, %v4890_v5 }
 0x831   :  { %6605 = shalt.err (!%p6602_p12)
}
 0x832   :  { %s6606_s24 = scalar_lea.hbm %s7711_s7, 32 }
 0x833   :  { %p6607_p13 = scmp.ne.s32.totalorder %s7711_s7, %s6606_s24  ;;  %p6610_p0 = scmp.lt.u32.totalorder %s6606_s24, %s7711_s7 }
 0x835   :  { %p6612_p1 = pnand %p6610_p0, %p6607_p13 }
 0x837   :  { %6615 = shalt.err (!%p6612_p1)
}
 0x838   :  { %4901 = dma.vmem_to_hbm [thread:$0]  %s4899_s6, 32, %s7711_s7, [#allocation8]  }
 0x839   :  { %6618 = dma.done.wait [#allocation8], 32  }
 0x83a   :  { %6619 = vsyncadd [#allocation8], 4294967264 }
 0x83b   :  { %4905 = vsyncpa [#allocation7], 1 }
 0x83c   :  { %4906 = vsyncpa [#allocation8], 1 }

</bundles_post_ra>
